<compile_context>
chip_gen: v5e
topology: v5e:2x2
jax: 0.10.0
libtpu: 0.0.40
codegen_flags: <defaults>
</compile_context>

<pallas_src>
import jax
import jax.numpy as jnp
import numpy as np
from jax import lax
from jax.experimental import pallas as pl
from jax.experimental.pallas import tpu as pltpu

# MXU-aligned tiles. TB = 128 matches the v5e MXU height and half of v6e/v7x's
# 256-tall array (raise to 256 on v6e/v7x if the gather cost is well amortized).
TOKENS_PER_BLOCK = 128   # M tile (sublane axis of the logits)
VOCAB_TILE = 512         # N tile (lane axis of the logits), multiple of 128


def _w2v_kernel(ids_ref, emb_ref, w_ref, out_ref, h_scr):
    """Grid = (token_blocks, vocab_tiles); vocab axis is innermost.

    ids_ref : SMEM (n_tok_pad,) int32   scalar-prefetched, pre-clamped token ids
    emb_ref : VMEM (V, E)       f32     full embedding table (invariant block)
    w_ref   : VMEM (TN, E)      bf16    vocab tile of the expand weight (torch layout)
    out_ref : VMEM (TB, TN)     f32     logits tile
    h_scr   : VMEM (TB, E)      f32     gathered hidden states, persists across vocab tiles
    """
    i = pl.program_id(0)
    j = pl.program_id(1)

    # Gather the TB embedding rows for this token block once, on the first vocab
    # tile.  The scratch persists while j sweeps the vocab axis, so the gather
    # cost is paid once per V/TN matmul steps instead of every step.
    # TODO(synk): for vocabularies whose (V, E) table does not fit VMEM (esp. v7x
    # 64 MiB), keep the table in HBM (memory_space=pl.ANY) and gather rows with
    # overlapped make_async_copy DMAs instead of this in-VMEM row loop.
    @pl.when(j == 0)
    def _gather():
        base = i * TOKENS_PER_BLOCK
        for r in range(TOKENS_PER_BLOCK):        # static trip count, unrolled
            tok = ids_ref[base + r]              # scalar int32 from SMEM
            h_scr[r, :] = emb_ref[tok, :]        # dynamic row load from VMEM

    # Expand: (TB, E) x (TN, E)^T on the MXU — bf16 operands, f32 accumulation.
    hidden = h_scr[...].astype(jnp.bfloat16)
    out_ref[...] = lax.dot_general(
        hidden,
        w_ref[...],
        dimension_numbers=(((1,), (1,)), ((), ())),   # contract E with E ("nt" form)
        preferred_element_type=jnp.float32,
    )


def _pad_axis(x, axis, multiple):
    size = x.shape[axis]
    pad = (-size) % multiple
    if pad == 0:
        return x
    widths = [(0, 0)] * x.ndim
    widths[axis] = (0, pad)
    return jnp.pad(x, widths)


@jax.jit
def word2vec_forward(ids, emb_table, expand_weight):
    """ids: int (B, S); emb_table: (V, E) f32; expand_weight: (V, E) f32 (torch Linear layout)."""
    B, S = ids.shape
    V, E = emb_table.shape
    n_tokens = B * S
    TB, TN = TOKENS_PER_BLOCK, VOCAB_TILE

    # Clamp ids so an out-of-range token can't silently read adjacent/stale VMEM.
    ids_flat = jnp.clip(ids.reshape(n_tokens).astype(jnp.int32), 0, V - 1)
    n_tok_pad = ((n_tokens + TB - 1) // TB) * TB
    ids_flat = jnp.pad(ids_flat, (0, n_tok_pad - n_tokens))

    # Stream the expand weight in bf16 and pad its vocab axis to the tile size;
    # padded logits are sliced off below.  No host-side W.T materialization.
    w_bf16 = _pad_axis(expand_weight.astype(jnp.bfloat16), 0, TN)
    v_pad = w_bf16.shape[0]

    grid = (n_tok_pad // TB, v_pad // TN)

    logits_flat = pl.pallas_call(
        _w2v_kernel,
        out_shape=jax.ShapeDtypeStruct((n_tok_pad, v_pad), jnp.float32),
        grid_spec=pltpu.PrefetchScalarGridSpec(
            num_scalar_prefetch=1,                    # ids -> SMEM
            grid=grid,
            in_specs=[
                # Full embedding table, resident in VMEM (invariant block index,
                # fetched once).  Kept f32 so the dynamic single-row gather loads
                # stay on the safe (unpacked) layout path.
                pl.BlockSpec((V, E), lambda i, j, ids: (0, 0)),
                # Expand weight kept in torch (V, E) layout, tiled along V; the
                # transposed contraction in the kernel puts V on the lane axis.
                pl.BlockSpec((TN, E), lambda i, j, ids: (j, 0)),
            ],
            out_specs=pl.BlockSpec((TB, TN), lambda i, j, ids: (i, j)),
            scratch_shapes=[pltpu.VMEM((TB, E), jnp.float32)],
        ),
        compiler_params=pltpu.CompilerParams(
            # Token blocks shard across TensorCores (v7x megacore); the vocab
            # axis must stay sequential so the j == 0 gather precedes its tiles.
            dimension_semantics=("parallel", "arbitrary"),
            # Demo working set is ~2 MiB; keep an explicit cap well under the
            # 64 MiB physical VMEM of v7x (and default scoped limits elsewhere).
            vmem_limit_bytes=32 * 1024 * 1024,
        ),
    )(ids_flat, emb_table.astype(jnp.float32), w_bf16)

    return logits_flat[:n_tokens, :V].reshape(B, S, V)


if __name__ == "__main__":
    # Small, module-consistent shapes; intentionally not tile-aligned so the
    # padding paths (tokens and vocab) are exercised.
    vocab_size = 1000
    embedding_size = 128
    batch, seq = 4, 100   # 400 tokens -> padded to 512 (4 token blocks)

    key = jax.random.PRNGKey(0)
    k_emb, k_lin, k_ids = jax.random.split(key, 3)

    # nn.Embedding default init: N(0, 1)
    emb_table = jax.random.normal(k_emb, (vocab_size, embedding_size), dtype=jnp.float32)
    # nn.Linear(E, V, bias=False) default init: U(-1/sqrt(E), 1/sqrt(E)), weight shape (V, E)
    bound = 1.0 / np.sqrt(embedding_size)
    expand_weight = jax.random.uniform(
        k_lin, (vocab_size, embedding_size), minval=-bound, maxval=bound, dtype=jnp.float32
    )

    ids = jax.random.randint(k_ids, (batch, seq), 0, vocab_size, dtype=jnp.int32)

    logits = jax.block_until_ready(word2vec_forward(ids, emb_table, expand_weight))

    # Reference applies the same bf16 quantization of the operands the kernel
    # uses, then does exact f32 math in numpy, so the comparison is tight.
    hidden_q = np.asarray(
        jnp.take(emb_table, ids, axis=0).astype(jnp.bfloat16).astype(jnp.float32)
    )
    w_q = np.asarray(expand_weight.astype(jnp.bfloat16).astype(jnp.float32))
    ref = (hidden_q.reshape(-1, embedding_size) @ w_q.T).reshape(batch, seq, vocab_size)

    assert logits.shape == (batch, seq, vocab_size)
    np.testing.assert_allclose(np.asarray(logits), ref, rtol=1e-3, atol=1e-3)

    print("KERNEL_OK")
</pallas_src>

<mosaic_0001>
module attributes {stable_mosaic.version = 11 : i64} {
  func.func @_w2v_kernel(%arg0: i32, %arg1: i32, %arg2: memref<512xi32, #tpu.memory_space<smem>>, %arg3: memref<1000x128xf32, #tpu.memory_space<vmem>>, %arg4: memref<512x128xbf16, #tpu.memory_space<vmem>>, %arg5: memref<128x512xf32, #tpu.memory_space<vmem>>, %arg6: memref<128x128xf32, #tpu.memory_space<vmem>>) attributes {dimension_semantics = [#tpu.dimension_semantics<parallel>, #tpu.dimension_semantics<arbitrary>], iteration_bounds = array<i64: 4, 2>, scalar_prefetch = 1 : i64, scratch_operands = 1 : i64, tpu.core_type = #tpu.core_type<tc>, window_params = [{pipeline_mode = #tpu.pipeline_mode<synchronous>, transform_indices = @transform_0, window_bounds = array<i64: 1000, 128>}, {transform_indices = @transform_1, window_bounds = array<i64: 512, 128>}, {transform_indices = @transform_2, window_bounds = array<i64: 128, 512>}]} {
    %c0_i32 = arith.constant 0 : i32
    %0 = arith.cmpi eq, %arg1, %c0_i32 : i32
    %1 = arith.extui %0 : i1 to i32
    %c0_i32_0 = arith.constant 0 : i32
    %2 = arith.cmpi ne, %1, %c0_i32_0 : i32
    scf.if %2 {
      %c128_i32 = arith.constant 128 : i32
      %8 = arith.muli %arg0, %c128_i32 : i32
      %c0_i32_6 = arith.constant 0 : i32
      %9 = arith.addi %8, %c0_i32_6 : i32
      %10 = arith.index_cast %9 : i32 to index
      %11 = memref.load %arg2[%10] : memref<512xi32, #tpu.memory_space<smem>>
      %12 = arith.index_cast %11 : i32 to index
      %c0_7 = arith.constant 0 : index
      %13 = vector.load %arg3[%12, %c0_7] : memref<1000x128xf32, #tpu.memory_space<vmem>>, vector<1x128xf32>
      %14 = vector.shape_cast %13 : vector<1x128xf32> to vector<128xf32>
      %c0_8 = arith.constant 0 : index
      %c0_9 = arith.constant 0 : index
      %15 = vector.load %arg6[%c0_8, %c0_9] : memref<128x128xf32, #tpu.memory_space<vmem>>, vector<1x128xf32>
      %16 = vector.shape_cast %15 : vector<1x128xf32> to vector<128xf32>
      %17 = vector.shape_cast %14 : vector<128xf32> to vector<1x128xf32>
      tpu.vector_store %arg6[%c0_8, %c0_9], %17 {strides = array<i32>} : memref<128x128xf32, #tpu.memory_space<vmem>>, vector<1x128xf32>,
      %c1_i32 = arith.constant 1 : i32
      %18 = arith.addi %8, %c1_i32 : i32
      %19 = arith.index_cast %18 : i32 to index
      %20 = memref.load %arg2[%19] : memref<512xi32, #tpu.memory_space<smem>>
      %21 = arith.index_cast %20 : i32 to index
      %c0_10 = arith.constant 0 : index
      %22 = vector.load %arg3[%21, %c0_10] : memref<1000x128xf32, #tpu.memory_space<vmem>>, vector<1x128xf32>
      %23 = vector.shape_cast %22 : vector<1x128xf32> to vector<128xf32>
      %c1 = arith.constant 1 : index
      %c0_11 = arith.constant 0 : index
      %24 = vector.load %arg6[%c1, %c0_11] : memref<128x128xf32, #tpu.memory_space<vmem>>, vector<1x128xf32>
      %25 = vector.shape_cast %24 : vector<1x128xf32> to vector<128xf32>
      %26 = vector.shape_cast %23 : vector<128xf32> to vector<1x128xf32>
      tpu.vector_store %arg6[%c1, %c0_11], %26 {strides = array<i32>} : memref<128x128xf32, #tpu.memory_space<vmem>>, vector<1x128xf32>,
      %c2_i32 = arith.constant 2 : i32
      %27 = arith.addi %8, %c2_i32 : i32
      %28 = arith.index_cast %27 : i32 to index
      %29 = memref.load %arg2[%28] : memref<512xi32, #tpu.memory_space<smem>>
      %30 = arith.index_cast %29 : i32 to index
      %c0_12 = arith.constant 0 : index
      %31 = vector.load %arg3[%30, %c0_12] : memref<1000x128xf32, #tpu.memory_space<vmem>>, vector<1x128xf32>
      %32 = vector.shape_cast %31 : vector<1x128xf32> to vector<128xf32>
      %c2 = arith.constant 2 : index
      %c0_13 = arith.constant 0 : index
      %33 = vector.load %arg6[%c2, %c0_13] : memref<128x128xf32, #tpu.memory_space<vmem>>, vector<1x128xf32>
      %34 = vector.shape_cast %33 : vector<1x128xf32> to vector<128xf32>
      %35 = vector.shape_cast %32 : vector<128xf32> to vector<1x128xf32>
      tpu.vector_store %arg6[%c2, %c0_13], %35 {strides = array<i32>} : memref<128x128xf32, #tpu.memory_space<vmem>>, vector<1x128xf32>,
      %c3_i32 = arith.constant 3 : i32
      %36 = arith.addi %8, %c3_i32 : i32
      %37 = arith.index_cast %36 : i32 to index
      %38 = memref.load %arg2[%37] : memref<512xi32, #tpu.memory_space<smem>>
      %39 = arith.index_cast %38 : i32 to index
      %c0_14 = arith.constant 0 : index
      %40 = vector.load %arg3[%39, %c0_14] : memref<1000x128xf32, #tpu.memory_space<vmem>>, vector<1x128xf32>
      %41 = vector.shape_cast %40 : vector<1x128xf32> to vector<128xf32>
      %c3 = arith.constant 3 : index
      %c0_15 = arith.constant 0 : index
      %42 = vector.load %arg6[%c3, %c0_15] : memref<128x128xf32, #tpu.memory_space<vmem>>, vector<1x128xf32>
      %43 = vector.shape_cast %42 : vector<1x128xf32> to vector<128xf32>
      %44 = vector.shape_cast %41 : vector<128xf32> to vector<1x128xf32>
      tpu.vector_store %arg6[%c3, %c0_15], %44 {strides = array<i32>} : memref<128x128xf32, #tpu.memory_space<vmem>>, vector<1x128xf32>,
      %c4_i32 = arith.constant 4 : i32
      %45 = arith.addi %8, %c4_i32 : i32
      %46 = arith.index_cast %45 : i32 to index
      %47 = memref.load %arg2[%46] : memref<512xi32, #tpu.memory_space<smem>>
      %48 = arith.index_cast %47 : i32 to index
      %c0_16 = arith.constant 0 : index
      %49 = vector.load %arg3[%48, %c0_16] : memref<1000x128xf32, #tpu.memory_space<vmem>>, vector<1x128xf32>
      %50 = vector.shape_cast %49 : vector<1x128xf32> to vector<128xf32>
      %c4 = arith.constant 4 : index
      %c0_17 = arith.constant 0 : index
      %51 = vector.load %arg6[%c4, %c0_17] : memref<128x128xf32, #tpu.memory_space<vmem>>, vector<1x128xf32>
      %52 = vector.shape_cast %51 : vector<1x128xf32> to vector<128xf32>
      %53 = vector.shape_cast %50 : vector<128xf32> to vector<1x128xf32>
      tpu.vector_store %arg6[%c4, %c0_17], %53 {strides = array<i32>} : memref<128x128xf32, #tpu.memory_space<vmem>>, vector<1x128xf32>,
      %c5_i32 = arith.constant 5 : i32
      %54 = arith.addi %8, %c5_i32 : i32
      %55 = arith.index_cast %54 : i32 to index
      %56 = memref.load %arg2[%55] : memref<512xi32, #tpu.memory_space<smem>>
      %57 = arith.index_cast %56 : i32 to index
      %c0_18 = arith.constant 0 : index
      %58 = vector.load %arg3[%57, %c0_18] : memref<1000x128xf32, #tpu.memory_space<vmem>>, vector<1x128xf32>
      %59 = vector.shape_cast %58 : vector<1x128xf32> to vector<128xf32>
      %c5 = arith.constant 5 : index
      %c0_19 = arith.constant 0 : index
      %60 = vector.load %arg6[%c5, %c0_19] : memref<128x128xf32, #tpu.memory_space<vmem>>, vector<1x128xf32>
      %61 = vector.shape_cast %60 : vector<1x128xf32> to vector<128xf32>
      %62 = vector.shape_cast %59 : vector<128xf32> to vector<1x128xf32>
      tpu.vector_store %arg6[%c5, %c0_19], %62 {strides = array<i32>} : memref<128x128xf32, #tpu.memory_space<vmem>>, vector<1x128xf32>,
      %c6_i32 = arith.constant 6 : i32
      %63 = arith.addi %8, %c6_i32 : i32
      %64 = arith.index_cast %63 : i32 to index
      %65 = memref.load %arg2[%64] : memref<512xi32, #tpu.memory_space<smem>>
      %66 = arith.index_cast %65 : i32 to index
      %c0_20 = arith.constant 0 : index
      %67 = vector.load %arg3[%66, %c0_20] : memref<1000x128xf32, #tpu.memory_space<vmem>>, vector<1x128xf32>
      %68 = vector.shape_cast %67 : vector<1x128xf32> to vector<128xf32>
      %c6 = arith.constant 6 : index
      %c0_21 = arith.constant 0 : index
      %69 = vector.load %arg6[%c6, %c0_21] : memref<128x128xf32, #tpu.memory_space<vmem>>, vector<1x128xf32>
      %70 = vector.shape_cast %69 : vector<1x128xf32> to vector<128xf32>
      %71 = vector.shape_cast %68 : vector<128xf32> to vector<1x128xf32>
      tpu.vector_store %arg6[%c6, %c0_21], %71 {strides = array<i32>} : memref<128x128xf32, #tpu.memory_space<vmem>>, vector<1x128xf32>,
      %c7_i32 = arith.constant 7 : i32
      %72 = arith.addi %8, %c7_i32 : i32
      %73 = arith.index_cast %72 : i32 to index
      %74 = memref.load %arg2[%73] : memref<512xi32, #tpu.memory_space<smem>>
      %75 = arith.index_cast %74 : i32 to index
      %c0_22 = arith.constant 0 : index
      %76 = vector.load %arg3[%75, %c0_22] : memref<1000x128xf32, #tpu.memory_space<vmem>>, vector<1x128xf32>
      %77 = vector.shape_cast %76 : vector<1x128xf32> to vector<128xf32>
      %c7 = arith.constant 7 : index
      %c0_23 = arith.constant 0 : index
      %78 = vector.load %arg6[%c7, %c0_23] : memref<128x128xf32, #tpu.memory_space<vmem>>, vector<1x128xf32>
      %79 = vector.shape_cast %78 : vector<1x128xf32> to vector<128xf32>
      %80 = vector.shape_cast %77 : vector<128xf32> to vector<1x128xf32>
      tpu.vector_store %arg6[%c7, %c0_23], %80 {strides = array<i32>} : memref<128x128xf32, #tpu.memory_space<vmem>>, vector<1x128xf32>,
      %c8_i32 = arith.constant 8 : i32
      %81 = arith.addi %8, %c8_i32 : i32
      %82 = arith.index_cast %81 : i32 to index
      %83 = memref.load %arg2[%82] : memref<512xi32, #tpu.memory_space<smem>>
      %84 = arith.index_cast %83 : i32 to index
      %c0_24 = arith.constant 0 : index
      %85 = vector.load %arg3[%84, %c0_24] : memref<1000x128xf32, #tpu.memory_space<vmem>>, vector<1x128xf32>
      %86 = vector.shape_cast %85 : vector<1x128xf32> to vector<128xf32>
      %c8 = arith.constant 8 : index
      %c0_25 = arith.constant 0 : index
      %87 = vector.load %arg6[%c8, %c0_25] : memref<128x128xf32, #tpu.memory_space<vmem>>, vector<1x128xf32>
      %88 = vector.shape_cast %87 : vector<1x128xf32> to vector<128xf32>
      %89 = vector.shape_cast %86 : vector<128xf32> to vector<1x128xf32>
      tpu.vector_store %arg6[%c8, %c0_25], %89 {strides = array<i32>} : memref<128x128xf32, #tpu.memory_space<vmem>>, vector<1x128xf32>,
      %c9_i32 = arith.constant 9 : i32
      %90 = arith.addi %8, %c9_i32 : i32
      %91 = arith.index_cast %90 : i32 to index
      %92 = memref.load %arg2[%91] : memref<512xi32, #tpu.memory_space<smem>>
      %93 = arith.index_cast %92 : i32 to index
      %c0_26 = arith.constant 0 : index
      %94 = vector.load %arg3[%93, %c0_26] : memref<1000x128xf32, #tpu.memory_space<vmem>>, vector<1x128xf32>
      %95 = vector.shape_cast %94 : vector<1x128xf32> to vector<128xf32>
      %c9 = arith.constant 9 : index
      %c0_27 = arith.constant 0 : index
      %96 = vector.load %arg6[%c9, %c0_27] : memref<128x128xf32, #tpu.memory_space<vmem>>, vector<1x128xf32>
      %97 = vector.shape_cast %96 : vector<1x128xf32> to vector<128xf32>
      %98 = vector.shape_cast %95 : vector<128xf32> to vector<1x128xf32>
      tpu.vector_store %arg6[%c9, %c0_27], %98 {strides = array<i32>} : memref<128x128xf32, #tpu.memory_space<vmem>>, vector<1x128xf32>,
      %c10_i32 = arith.constant 10 : i32
      %99 = arith.addi %8, %c10_i32 : i32
      %100 = arith.index_cast %99 : i32 to index
      %101 = memref.load %arg2[%100] : memref<512xi32, #tpu.memory_space<smem>>
      %102 = arith.index_cast %101 : i32 to index
      %c0_28 = arith.constant 0 : index
      %103 = vector.load %arg3[%102, %c0_28] : memref<1000x128xf32, #tpu.memory_space<vmem>>, vector<1x128xf32>
      %104 = vector.shape_cast %103 : vector<1x128xf32> to vector<128xf32>
      %c10 = arith.constant 10 : index
      %c0_29 = arith.constant 0 : index
      %105 = vector.load %arg6[%c10, %c0_29] : memref<128x128xf32, #tpu.memory_space<vmem>>, vector<1x128xf32>
      %106 = vector.shape_cast %105 : vector<1x128xf32> to vector<128xf32>
      %107 = vector.shape_cast %104 : vector<128xf32> to vector<1x128xf32>
      tpu.vector_store %arg6[%c10, %c0_29], %107 {strides = array<i32>} : memref<128x128xf32, #tpu.memory_space<vmem>>, vector<1x128xf32>,
      %c11_i32 = arith.constant 11 : i32
      %108 = arith.addi %8, %c11_i32 : i32
      %109 = arith.index_cast %108 : i32 to index
      %110 = memref.load %arg2[%109] : memref<512xi32, #tpu.memory_space<smem>>
      %111 = arith.index_cast %110 : i32 to index
      %c0_30 = arith.constant 0 : index
      %112 = vector.load %arg3[%111, %c0_30] : memref<1000x128xf32, #tpu.memory_space<vmem>>, vector<1x128xf32>
      %113 = vector.shape_cast %112 : vector<1x128xf32> to vector<128xf32>
      %c11 = arith.constant 11 : index
      %c0_31 = arith.constant 0 : index
      %114 = vector.load %arg6[%c11, %c0_31] : memref<128x128xf32, #tpu.memory_space<vmem>>, vector<1x128xf32>
      %115 = vector.shape_cast %114 : vector<1x128xf32> to vector<128xf32>
      %116 = vector.shape_cast %113 : vector<128xf32> to vector<1x128xf32>
      tpu.vector_store %arg6[%c11, %c0_31], %116 {strides = array<i32>} : memref<128x128xf32, #tpu.memory_space<vmem>>, vector<1x128xf32>,
      %c12_i32 = arith.constant 12 : i32
      %117 = arith.addi %8, %c12_i32 : i32
      %118 = arith.index_cast %117 : i32 to index
      %119 = memref.load %arg2[%118] : memref<512xi32, #tpu.memory_space<smem>>
      %120 = arith.index_cast %119 : i32 to index
      %c0_32 = arith.constant 0 : index
      %121 = vector.load %arg3[%120, %c0_32] : memref<1000x128xf32, #tpu.memory_space<vmem>>, vector<1x128xf32>
      %122 = vector.shape_cast %121 : vector<1x128xf32> to vector<128xf32>
      %c12 = arith.constant 12 : index
      %c0_33 = arith.constant 0 : index
      %123 = vector.load %arg6[%c12, %c0_33] : memref<128x128xf32, #tpu.memory_space<vmem>>, vector<1x128xf32>
      %124 = vector.shape_cast %123 : vector<1x128xf32> to vector<128xf32>
      %125 = vector.shape_cast %122 : vector<128xf32> to vector<1x128xf32>
      tpu.vector_store %arg6[%c12, %c0_33], %125 {strides = array<i32>} : memref<128x128xf32, #tpu.memory_space<vmem>>, vector<1x128xf32>,
      %c13_i32 = arith.constant 13 : i32
      %126 = arith.addi %8, %c13_i32 : i32
      %127 = arith.index_cast %126 : i32 to index
      %128 = memref.load %arg2[%127] : memref<512xi32, #tpu.memory_space<smem>>
      %129 = arith.index_cast %128 : i32 to index
      %c0_34 = arith.constant 0 : index
      %130 = vector.load %arg3[%129, %c0_34] : memref<1000x128xf32, #tpu.memory_space<vmem>>, vector<1x128xf32>
      %131 = vector.shape_cast %130 : vector<1x128xf32> to vector<128xf32>
      %c13 = arith.constant 13 : index
      %c0_35 = arith.constant 0 : index
      %132 = vector.load %arg6[%c13, %c0_35] : memref<128x128xf32, #tpu.memory_space<vmem>>, vector<1x128xf32>
      %133 = vector.shape_cast %132 : vector<1x128xf32> to vector<128xf32>
      %134 = vector.shape_cast %131 : vector<128xf32> to vector<1x128xf32>
      tpu.vector_store %arg6[%c13, %c0_35], %134 {strides = array<i32>} : memref<128x128xf32, #tpu.memory_space<vmem>>, vector<1x128xf32>,
      %c14_i32 = arith.constant 14 : i32
      %135 = arith.addi %8, %c14_i32 : i32
      %136 = arith.index_cast %135 : i32 to index
      %137 = memref.load %arg2[%136] : memref<512xi32, #tpu.memory_space<smem>>
      %138 = arith.index_cast %137 : i32 to index
      %c0_36 = arith.constant 0 : index
      %139 = vector.load %arg3[%138, %c0_36] : memref<1000x128xf32, #tpu.memory_space<vmem>>, vector<1x128xf32>
      %140 = vector.shape_cast %139 : vector<1x128xf32> to vector<128xf32>
      %c14 = arith.constant 14 : index
      %c0_37 = arith.constant 0 : index
      %141 = vector.load %arg6[%c14, %c0_37] : memref<128x128xf32, #tpu.memory_space<vmem>>, vector<1x128xf32>
      %142 = vector.shape_cast %141 : vector<1x128xf32> to vector<128xf32>
      %143 = vector.shape_cast %140 : vector<128xf32> to vector<1x128xf32>
      tpu.vector_store %arg6[%c14, %c0_37], %143 {strides = array<i32>} : memref<128x128xf32, #tpu.memory_space<vmem>>, vector<1x128xf32>,
      %c15_i32 = arith.constant 15 : i32
      %144 = arith.addi %8, %c15_i32 : i32
      %145 = arith.index_cast %144 : i32 to index
      %146 = memref.load %arg2[%145] : memref<512xi32, #tpu.memory_space<smem>>
      %147 = arith.index_cast %146 : i32 to index
      %c0_38 = arith.constant 0 : index
      %148 = vector.load %arg3[%147, %c0_38] : memref<1000x128xf32, #tpu.memory_space<vmem>>, vector<1x128xf32>
      %149 = vector.shape_cast %148 : vector<1x128xf32> to vector<128xf32>
      %c15 = arith.constant 15 : index
      %c0_39 = arith.constant 0 : index
      %150 = vector.load %arg6[%c15, %c0_39] : memref<128x128xf32, #tpu.memory_space<vmem>>, vector<1x128xf32>
      %151 = vector.shape_cast %150 : vector<1x128xf32> to vector<128xf32>
      %152 = vector.shape_cast %149 : vector<128xf32> to vector<1x128xf32>
      tpu.vector_store %arg6[%c15, %c0_39], %152 {strides = array<i32>} : memref<128x128xf32, #tpu.memory_space<vmem>>, vector<1x128xf32>,
      %c16_i32 = arith.constant 16 : i32
      %153 = arith.addi %8, %c16_i32 : i32
      %154 = arith.index_cast %153 : i32 to index
      %155 = memref.load %arg2[%154] : memref<512xi32, #tpu.memory_space<smem>>
      %156 = arith.index_cast %155 : i32 to index
      %c0_40 = arith.constant 0 : index
      %157 = vector.load %arg3[%156, %c0_40] : memref<1000x128xf32, #tpu.memory_space<vmem>>, vector<1x128xf32>
      %158 = vector.shape_cast %157 : vector<1x128xf32> to vector<128xf32>
      %c16 = arith.constant 16 : index
      %c0_41 = arith.constant 0 : index
      %159 = vector.load %arg6[%c16, %c0_41] : memref<128x128xf32, #tpu.memory_space<vmem>>, vector<1x128xf32>
      %160 = vector.shape_cast %159 : vector<1x128xf32> to vector<128xf32>
      %161 = vector.shape_cast %158 : vector<128xf32> to vector<1x128xf32>
      tpu.vector_store %arg6[%c16, %c0_41], %161 {strides = array<i32>} : memref<128x128xf32, #tpu.memory_space<vmem>>, vector<1x128xf32>,
      %c17_i32 = arith.constant 17 : i32
      %162 = arith.addi %8, %c17_i32 : i32
      %163 = arith.index_cast %162 : i32 to index
      %164 = memref.load %arg2[%163] : memref<512xi32, #tpu.memory_space<smem>>
      %165 = arith.index_cast %164 : i32 to index
      %c0_42 = arith.constant 0 : index
      %166 = vector.load %arg3[%165, %c0_42] : memref<1000x128xf32, #tpu.memory_space<vmem>>, vector<1x128xf32>
      %167 = vector.shape_cast %166 : vector<1x128xf32> to vector<128xf32>
      %c17 = arith.constant 17 : index
      %c0_43 = arith.constant 0 : index
      %168 = vector.load %arg6[%c17, %c0_43] : memref<128x128xf32, #tpu.memory_space<vmem>>, vector<1x128xf32>
      %169 = vector.shape_cast %168 : vector<1x128xf32> to vector<128xf32>
      %170 = vector.shape_cast %167 : vector<128xf32> to vector<1x128xf32>
      tpu.vector_store %arg6[%c17, %c0_43], %170 {strides = array<i32>} : memref<128x128xf32, #tpu.memory_space<vmem>>, vector<1x128xf32>,
      %c18_i32 = arith.constant 18 : i32
      %171 = arith.addi %8, %c18_i32 : i32
      %172 = arith.index_cast %171 : i32 to index
      %173 = memref.load %arg2[%172] : memref<512xi32, #tpu.memory_space<smem>>
      %174 = arith.index_cast %173 : i32 to index
      %c0_44 = arith.constant 0 : index
      %175 = vector.load %arg3[%174, %c0_44] : memref<1000x128xf32, #tpu.memory_space<vmem>>, vector<1x128xf32>
      %176 = vector.shape_cast %175 : vector<1x128xf32> to vector<128xf32>
      %c18 = arith.constant 18 : index
      %c0_45 = arith.constant 0 : index
      %177 = vector.load %arg6[%c18, %c0_45] : memref<128x128xf32, #tpu.memory_space<vmem>>, vector<1x128xf32>
      %178 = vector.shape_cast %177 : vector<1x128xf32> to vector<128xf32>
      %179 = vector.shape_cast %176 : vector<128xf32> to vector<1x128xf32>
      tpu.vector_store %arg6[%c18, %c0_45], %179 {strides = array<i32>} : memref<128x128xf32, #tpu.memory_space<vmem>>, vector<1x128xf32>,
      %c19_i32 = arith.constant 19 : i32
      %180 = arith.addi %8, %c19_i32 : i32
      %181 = arith.index_cast %180 : i32 to index
      %182 = memref.load %arg2[%181] : memref<512xi32, #tpu.memory_space<smem>>
      %183 = arith.index_cast %182 : i32 to index
      %c0_46 = arith.constant 0 : index
      %184 = vector.load %arg3[%183, %c0_46] : memref<1000x128xf32, #tpu.memory_space<vmem>>, vector<1x128xf32>
      %185 = vector.shape_cast %184 : vector<1x128xf32> to vector<128xf32>
      %c19 = arith.constant 19 : index
      %c0_47 = arith.constant 0 : index
      %186 = vector.load %arg6[%c19, %c0_47] : memref<128x128xf32, #tpu.memory_space<vmem>>, vector<1x128xf32>
      %187 = vector.shape_cast %186 : vector<1x128xf32> to vector<128xf32>
      %188 = vector.shape_cast %185 : vector<128xf32> to vector<1x128xf32>
      tpu.vector_store %arg6[%c19, %c0_47], %188 {strides = array<i32>} : memref<128x128xf32, #tpu.memory_space<vmem>>, vector<1x128xf32>,
      %c20_i32 = arith.constant 20 : i32
      %189 = arith.addi %8, %c20_i32 : i32
      %190 = arith.index_cast %189 : i32 to index
      %191 = memref.load %arg2[%190] : memref<512xi32, #tpu.memory_space<smem>>
      %192 = arith.index_cast %191 : i32 to index
      %c0_48 = arith.constant 0 : index
      %193 = vector.load %arg3[%192, %c0_48] : memref<1000x128xf32, #tpu.memory_space<vmem>>, vector<1x128xf32>
      %194 = vector.shape_cast %193 : vector<1x128xf32> to vector<128xf32>
      %c20 = arith.constant 20 : index
      %c0_49 = arith.constant 0 : index
      %195 = vector.load %arg6[%c20, %c0_49] : memref<128x128xf32, #tpu.memory_space<vmem>>, vector<1x128xf32>
      %196 = vector.shape_cast %195 : vector<1x128xf32> to vector<128xf32>
      %197 = vector.shape_cast %194 : vector<128xf32> to vector<1x128xf32>
      tpu.vector_store %arg6[%c20, %c0_49], %197 {strides = array<i32>} : memref<128x128xf32, #tpu.memory_space<vmem>>, vector<1x128xf32>,
      %c21_i32 = arith.constant 21 : i32
      %198 = arith.addi %8, %c21_i32 : i32
      %199 = arith.index_cast %198 : i32 to index
      %200 = memref.load %arg2[%199] : memref<512xi32, #tpu.memory_space<smem>>
      %201 = arith.index_cast %200 : i32 to index
      %c0_50 = arith.constant 0 : index
      %202 = vector.load %arg3[%201, %c0_50] : memref<1000x128xf32, #tpu.memory_space<vmem>>, vector<1x128xf32>
      %203 = vector.shape_cast %202 : vector<1x128xf32> to vector<128xf32>
      %c21 = arith.constant 21 : index
      %c0_51 = arith.constant 0 : index
      %204 = vector.load %arg6[%c21, %c0_51] : memref<128x128xf32, #tpu.memory_space<vmem>>, vector<1x128xf32>
      %205 = vector.shape_cast %204 : vector<1x128xf32> to vector<128xf32>
      %206 = vector.shape_cast %203 : vector<128xf32> to vector<1x128xf32>
      tpu.vector_store %arg6[%c21, %c0_51], %206 {strides = array<i32>} : memref<128x128xf32, #tpu.memory_space<vmem>>, vector<1x128xf32>,
      %c22_i32 = arith.constant 22 : i32
      %207 = arith.addi %8, %c22_i32 : i32
      %208 = arith.index_cast %207 : i32 to index
      %209 = memref.load %arg2[%208] : memref<512xi32, #tpu.memory_space<smem>>
      %210 = arith.index_cast %209 : i32 to index
      %c0_52 = arith.constant 0 : index
      %211 = vector.load %arg3[%210, %c0_52] : memref<1000x128xf32, #tpu.memory_space<vmem>>, vector<1x128xf32>
      %212 = vector.shape_cast %211 : vector<1x128xf32> to vector<128xf32>
      %c22 = arith.constant 22 : index
      %c0_53 = arith.constant 0 : index
      %213 = vector.load %arg6[%c22, %c0_53] : memref<128x128xf32, #tpu.memory_space<vmem>>, vector<1x128xf32>
      %214 = vector.shape_cast %213 : vector<1x128xf32> to vector<128xf32>
      %215 = vector.shape_cast %212 : vector<128xf32> to vector<1x128xf32>
      tpu.vector_store %arg6[%c22, %c0_53], %215 {strides = array<i32>} : memref<128x128xf32, #tpu.memory_space<vmem>>, vector<1x128xf32>,
      %c23_i32 = arith.constant 23 : i32
      %216 = arith.addi %8, %c23_i32 : i32
      %217 = arith.index_cast %216 : i32 to index
      %218 = memref.load %arg2[%217] : memref<512xi32, #tpu.memory_space<smem>>
      %219 = arith.index_cast %218 : i32 to index
      %c0_54 = arith.constant 0 : index
      %220 = vector.load %arg3[%219, %c0_54] : memref<1000x128xf32, #tpu.memory_space<vmem>>, vector<1x128xf32>
      %221 = vector.shape_cast %220 : vector<1x128xf32> to vector<128xf32>
      %c23 = arith.constant 23 : index
      %c0_55 = arith.constant 0 : index
      %222 = vector.load %arg6[%c23, %c0_55] : memref<128x128xf32, #tpu.memory_space<vmem>>, vector<1x128xf32>
      %223 = vector.shape_cast %222 : vector<1x128xf32> to vector<128xf32>
      %224 = vector.shape_cast %221 : vector<128xf32> to vector<1x128xf32>
      tpu.vector_store %arg6[%c23, %c0_55], %224 {strides = array<i32>} : memref<128x128xf32, #tpu.memory_space<vmem>>, vector<1x128xf32>,
      %c24_i32 = arith.constant 24 : i32
      %225 = arith.addi %8, %c24_i32 : i32
      %226 = arith.index_cast %225 : i32 to index
      %227 = memref.load %arg2[%226] : memref<512xi32, #tpu.memory_space<smem>>
      %228 = arith.index_cast %227 : i32 to index
      %c0_56 = arith.constant 0 : index
      %229 = vector.load %arg3[%228, %c0_56] : memref<1000x128xf32, #tpu.memory_space<vmem>>, vector<1x128xf32>
      %230 = vector.shape_cast %229 : vector<1x128xf32> to vector<128xf32>
      %c24 = arith.constant 24 : index
      %c0_57 = arith.constant 0 : index
      %231 = vector.load %arg6[%c24, %c0_57] : memref<128x128xf32, #tpu.memory_space<vmem>>, vector<1x128xf32>
      %232 = vector.shape_cast %231 : vector<1x128xf32> to vector<128xf32>
      %233 = vector.shape_cast %230 : vector<128xf32> to vector<1x128xf32>
      tpu.vector_store %arg6[%c24, %c0_57], %233 {strides = array<i32>} : memref<128x128xf32, #tpu.memory_space<vmem>>, vector<1x128xf32>,
      %c25_i32 = arith.constant 25 : i32
      %234 = arith.addi %8, %c25_i32 : i32
      %235 = arith.index_cast %234 : i32 to index
      %236 = memref.load %arg2[%235] : memref<512xi32, #tpu.memory_space<smem>>
      %237 = arith.index_cast %236 : i32 to index
      %c0_58 = arith.constant 0 : index
      %238 = vector.load %arg3[%237, %c0_58] : memref<1000x128xf32, #tpu.memory_space<vmem>>, vector<1x128xf32>
      %239 = vector.shape_cast %238 : vector<1x128xf32> to vector<128xf32>
      %c25 = arith.constant 25 : index
      %c0_59 = arith.constant 0 : index
      %240 = vector.load %arg6[%c25, %c0_59] : memref<128x128xf32, #tpu.memory_space<vmem>>, vector<1x128xf32>
      %241 = vector.shape_cast %240 : vector<1x128xf32> to vector<128xf32>
      %242 = vector.shape_cast %239 : vector<128xf32> to vector<1x128xf32>
      tpu.vector_store %arg6[%c25, %c0_59], %242 {strides = array<i32>} : memref<128x128xf32, #tpu.memory_space<vmem>>, vector<1x128xf32>,
      %c26_i32 = arith.constant 26 : i32
      %243 = arith.addi %8, %c26_i32 : i32
      %244 = arith.index_cast %243 : i32 to index
      %245 = memref.load %arg2[%244] : memref<512xi32, #tpu.memory_space<smem>>
      %246 = arith.index_cast %245 : i32 to index
      %c0_60 = arith.constant 0 : index
      %247 = vector.load %arg3[%246, %c0_60] : memref<1000x128xf32, #tpu.memory_space<vmem>>, vector<1x128xf32>
      %248 = vector.shape_cast %247 : vector<1x128xf32> to vector<128xf32>
      %c26 = arith.constant 26 : index
      %c0_61 = arith.constant 0 : index
      %249 = vector.load %arg6[%c26, %c0_61] : memref<128x128xf32, #tpu.memory_space<vmem>>, vector<1x128xf32>
      %250 = vector.shape_cast %249 : vector<1x128xf32> to vector<128xf32>
      %251 = vector.shape_cast %248 : vector<128xf32> to vector<1x128xf32>
      tpu.vector_store %arg6[%c26, %c0_61], %251 {strides = array<i32>} : memref<128x128xf32, #tpu.memory_space<vmem>>, vector<1x128xf32>,
      %c27_i32 = arith.constant 27 : i32
      %252 = arith.addi %8, %c27_i32 : i32
      %253 = arith.index_cast %252 : i32 to index
      %254 = memref.load %arg2[%253] : memref<512xi32, #tpu.memory_space<smem>>
      %255 = arith.index_cast %254 : i32 to index
      %c0_62 = arith.constant 0 : index
      %256 = vector.load %arg3[%255, %c0_62] : memref<1000x128xf32, #tpu.memory_space<vmem>>, vector<1x128xf32>
      %257 = vector.shape_cast %256 : vector<1x128xf32> to vector<128xf32>
      %c27 = arith.constant 27 : index
      %c0_63 = arith.constant 0 : index
      %258 = vector.load %arg6[%c27, %c0_63] : memref<128x128xf32, #tpu.memory_space<vmem>>, vector<1x128xf32>
      %259 = vector.shape_cast %258 : vector<1x128xf32> to vector<128xf32>
      %260 = vector.shape_cast %257 : vector<128xf32> to vector<1x128xf32>
      tpu.vector_store %arg6[%c27, %c0_63], %260 {strides = array<i32>} : memref<128x128xf32, #tpu.memory_space<vmem>>, vector<1x128xf32>,
      %c28_i32 = arith.constant 28 : i32
      %261 = arith.addi %8, %c28_i32 : i32
      %262 = arith.index_cast %261 : i32 to index
      %263 = memref.load %arg2[%262] : memref<512xi32, #tpu.memory_space<smem>>
      %264 = arith.index_cast %263 : i32 to index
      %c0_64 = arith.constant 0 : index
      %265 = vector.load %arg3[%264, %c0_64] : memref<1000x128xf32, #tpu.memory_space<vmem>>, vector<1x128xf32>
      %266 = vector.shape_cast %265 : vector<1x128xf32> to vector<128xf32>
      %c28 = arith.constant 28 : index
      %c0_65 = arith.constant 0 : index
      %267 = vector.load %arg6[%c28, %c0_65] : memref<128x128xf32, #tpu.memory_space<vmem>>, vector<1x128xf32>
      %268 = vector.shape_cast %267 : vector<1x128xf32> to vector<128xf32>
      %269 = vector.shape_cast %266 : vector<128xf32> to vector<1x128xf32>
      tpu.vector_store %arg6[%c28, %c0_65], %269 {strides = array<i32>} : memref<128x128xf32, #tpu.memory_space<vmem>>, vector<1x128xf32>,
      %c29_i32 = arith.constant 29 : i32
      %270 = arith.addi %8, %c29_i32 : i32
      %271 = arith.index_cast %270 : i32 to index
      %272 = memref.load %arg2[%271] : memref<512xi32, #tpu.memory_space<smem>>
      %273 = arith.index_cast %272 : i32 to index
      %c0_66 = arith.constant 0 : index
      %274 = vector.load %arg3[%273, %c0_66] : memref<1000x128xf32, #tpu.memory_space<vmem>>, vector<1x128xf32>
      %275 = vector.shape_cast %274 : vector<1x128xf32> to vector<128xf32>
      %c29 = arith.constant 29 : index
      %c0_67 = arith.constant 0 : index
      %276 = vector.load %arg6[%c29, %c0_67] : memref<128x128xf32, #tpu.memory_space<vmem>>, vector<1x128xf32>
      %277 = vector.shape_cast %276 : vector<1x128xf32> to vector<128xf32>
      %278 = vector.shape_cast %275 : vector<128xf32> to vector<1x128xf32>
      tpu.vector_store %arg6[%c29, %c0_67], %278 {strides = array<i32>} : memref<128x128xf32, #tpu.memory_space<vmem>>, vector<1x128xf32>,
      %c30_i32 = arith.constant 30 : i32
      %279 = arith.addi %8, %c30_i32 : i32
      %280 = arith.index_cast %279 : i32 to index
      %281 = memref.load %arg2[%280] : memref<512xi32, #tpu.memory_space<smem>>
      %282 = arith.index_cast %281 : i32 to index
      %c0_68 = arith.constant 0 : index
      %283 = vector.load %arg3[%282, %c0_68] : memref<1000x128xf32, #tpu.memory_space<vmem>>, vector<1x128xf32>
      %284 = vector.shape_cast %283 : vector<1x128xf32> to vector<128xf32>
      %c30 = arith.constant 30 : index
      %c0_69 = arith.constant 0 : index
      %285 = vector.load %arg6[%c30, %c0_69] : memref<128x128xf32, #tpu.memory_space<vmem>>, vector<1x128xf32>
      %286 = vector.shape_cast %285 : vector<1x128xf32> to vector<128xf32>
      %287 = vector.shape_cast %284 : vector<128xf32> to vector<1x128xf32>
      tpu.vector_store %arg6[%c30, %c0_69], %287 {strides = array<i32>} : memref<128x128xf32, #tpu.memory_space<vmem>>, vector<1x128xf32>,
      %c31_i32 = arith.constant 31 : i32
      %288 = arith.addi %8, %c31_i32 : i32
      %289 = arith.index_cast %288 : i32 to index
      %290 = memref.load %arg2[%289] : memref<512xi32, #tpu.memory_space<smem>>
      %291 = arith.index_cast %290 : i32 to index
      %c0_70 = arith.constant 0 : index
      %292 = vector.load %arg3[%291, %c0_70] : memref<1000x128xf32, #tpu.memory_space<vmem>>, vector<1x128xf32>
      %293 = vector.shape_cast %292 : vector<1x128xf32> to vector<128xf32>
      %c31 = arith.constant 31 : index
      %c0_71 = arith.constant 0 : index
      %294 = vector.load %arg6[%c31, %c0_71] : memref<128x128xf32, #tpu.memory_space<vmem>>, vector<1x128xf32>
      %295 = vector.shape_cast %294 : vector<1x128xf32> to vector<128xf32>
      %296 = vector.shape_cast %293 : vector<128xf32> to vector<1x128xf32>
      tpu.vector_store %arg6[%c31, %c0_71], %296 {strides = array<i32>} : memref<128x128xf32, #tpu.memory_space<vmem>>, vector<1x128xf32>,
      %c32_i32 = arith.constant 32 : i32
      %297 = arith.addi %8, %c32_i32 : i32
      %298 = arith.index_cast %297 : i32 to index
      %299 = memref.load %arg2[%298] : memref<512xi32, #tpu.memory_space<smem>>
      %300 = arith.index_cast %299 : i32 to index
      %c0_72 = arith.constant 0 : index
      %301 = vector.load %arg3[%300, %c0_72] : memref<1000x128xf32, #tpu.memory_space<vmem>>, vector<1x128xf32>
      %302 = vector.shape_cast %301 : vector<1x128xf32> to vector<128xf32>
      %c32 = arith.constant 32 : index
      %c0_73 = arith.constant 0 : index
      %303 = vector.load %arg6[%c32, %c0_73] : memref<128x128xf32, #tpu.memory_space<vmem>>, vector<1x128xf32>
      %304 = vector.shape_cast %303 : vector<1x128xf32> to vector<128xf32>
      %305 = vector.shape_cast %302 : vector<128xf32> to vector<1x128xf32>
      tpu.vector_store %arg6[%c32, %c0_73], %305 {strides = array<i32>} : memref<128x128xf32, #tpu.memory_space<vmem>>, vector<1x128xf32>,
      %c33_i32 = arith.constant 33 : i32
      %306 = arith.addi %8, %c33_i32 : i32
      %307 = arith.index_cast %306 : i32 to index
      %308 = memref.load %arg2[%307] : memref<512xi32, #tpu.memory_space<smem>>
      %309 = arith.index_cast %308 : i32 to index
      %c0_74 = arith.constant 0 : index
      %310 = vector.load %arg3[%309, %c0_74] : memref<1000x128xf32, #tpu.memory_space<vmem>>, vector<1x128xf32>
      %311 = vector.shape_cast %310 : vector<1x128xf32> to vector<128xf32>
      %c33 = arith.constant 33 : index
      %c0_75 = arith.constant 0 : index
      %312 = vector.load %arg6[%c33, %c0_75] : memref<128x128xf32, #tpu.memory_space<vmem>>, vector<1x128xf32>
      %313 = vector.shape_cast %312 : vector<1x128xf32> to vector<128xf32>
      %314 = vector.shape_cast %311 : vector<128xf32> to vector<1x128xf32>
      tpu.vector_store %arg6[%c33, %c0_75], %314 {strides = array<i32>} : memref<128x128xf32, #tpu.memory_space<vmem>>, vector<1x128xf32>,
      %c34_i32 = arith.constant 34 : i32
      %315 = arith.addi %8, %c34_i32 : i32
      %316 = arith.index_cast %315 : i32 to index
      %317 = memref.load %arg2[%316] : memref<512xi32, #tpu.memory_space<smem>>
      %318 = arith.index_cast %317 : i32 to index
      %c0_76 = arith.constant 0 : index
      %319 = vector.load %arg3[%318, %c0_76] : memref<1000x128xf32, #tpu.memory_space<vmem>>, vector<1x128xf32>
      %320 = vector.shape_cast %319 : vector<1x128xf32> to vector<128xf32>
      %c34 = arith.constant 34 : index
      %c0_77 = arith.constant 0 : index
      %321 = vector.load %arg6[%c34, %c0_77] : memref<128x128xf32, #tpu.memory_space<vmem>>, vector<1x128xf32>
      %322 = vector.shape_cast %321 : vector<1x128xf32> to vector<128xf32>
      %323 = vector.shape_cast %320 : vector<128xf32> to vector<1x128xf32>
      tpu.vector_store %arg6[%c34, %c0_77], %323 {strides = array<i32>} : memref<128x128xf32, #tpu.memory_space<vmem>>, vector<1x128xf32>,
      %c35_i32 = arith.constant 35 : i32
      %324 = arith.addi %8, %c35_i32 : i32
      %325 = arith.index_cast %324 : i32 to index
      %326 = memref.load %arg2[%325] : memref<512xi32, #tpu.memory_space<smem>>
      %327 = arith.index_cast %326 : i32 to index
      %c0_78 = arith.constant 0 : index
      %328 = vector.load %arg3[%327, %c0_78] : memref<1000x128xf32, #tpu.memory_space<vmem>>, vector<1x128xf32>
      %329 = vector.shape_cast %328 : vector<1x128xf32> to vector<128xf32>
      %c35 = arith.constant 35 : index
      %c0_79 = arith.constant 0 : index
      %330 = vector.load %arg6[%c35, %c0_79] : memref<128x128xf32, #tpu.memory_space<vmem>>, vector<1x128xf32>
      %331 = vector.shape_cast %330 : vector<1x128xf32> to vector<128xf32>
      %332 = vector.shape_cast %329 : vector<128xf32> to vector<1x128xf32>
      tpu.vector_store %arg6[%c35, %c0_79], %332 {strides = array<i32>} : memref<128x128xf32, #tpu.memory_space<vmem>>, vector<1x128xf32>,
      %c36_i32 = arith.constant 36 : i32
      %333 = arith.addi %8, %c36_i32 : i32
      %334 = arith.index_cast %333 : i32 to index
      %335 = memref.load %arg2[%334] : memref<512xi32, #tpu.memory_space<smem>>
      %336 = arith.index_cast %335 : i32 to index
      %c0_80 = arith.constant 0 : index
      %337 = vector.load %arg3[%336, %c0_80] : memref<1000x128xf32, #tpu.memory_space<vmem>>, vector<1x128xf32>
      %338 = vector.shape_cast %337 : vector<1x128xf32> to vector<128xf32>
      %c36 = arith.constant 36 : index
      %c0_81 = arith.constant 0 : index
      %339 = vector.load %arg6[%c36, %c0_81] : memref<128x128xf32, #tpu.memory_space<vmem>>, vector<1x128xf32>
      %340 = vector.shape_cast %339 : vector<1x128xf32> to vector<128xf32>
      %341 = vector.shape_cast %338 : vector<128xf32> to vector<1x128xf32>
      tpu.vector_store %arg6[%c36, %c0_81], %341 {strides = array<i32>} : memref<128x128xf32, #tpu.memory_space<vmem>>, vector<1x128xf32>,
      %c37_i32 = arith.constant 37 : i32
      %342 = arith.addi %8, %c37_i32 : i32
      %343 = arith.index_cast %342 : i32 to index
      %344 = memref.load %arg2[%343] : memref<512xi32, #tpu.memory_space<smem>>
      %345 = arith.index_cast %344 : i32 to index
      %c0_82 = arith.constant 0 : index
      %346 = vector.load %arg3[%345, %c0_82] : memref<1000x128xf32, #tpu.memory_space<vmem>>, vector<1x128xf32>
      %347 = vector.shape_cast %346 : vector<1x128xf32> to vector<128xf32>
      %c37 = arith.constant 37 : index
      %c0_83 = arith.constant 0 : index
      %348 = vector.load %arg6[%c37, %c0_83] : memref<128x128xf32, #tpu.memory_space<vmem>>, vector<1x128xf32>
      %349 = vector.shape_cast %348 : vector<1x128xf32> to vector<128xf32>
      %350 = vector.shape_cast %347 : vector<128xf32> to vector<1x128xf32>
      tpu.vector_store %arg6[%c37, %c0_83], %350 {strides = array<i32>} : memref<128x128xf32, #tpu.memory_space<vmem>>, vector<1x128xf32>,
      %c38_i32 = arith.constant 38 : i32
      %351 = arith.addi %8, %c38_i32 : i32
      %352 = arith.index_cast %351 : i32 to index
      %353 = memref.load %arg2[%352] : memref<512xi32, #tpu.memory_space<smem>>
      %354 = arith.index_cast %353 : i32 to index
      %c0_84 = arith.constant 0 : index
      %355 = vector.load %arg3[%354, %c0_84] : memref<1000x128xf32, #tpu.memory_space<vmem>>, vector<1x128xf32>
      %356 = vector.shape_cast %355 : vector<1x128xf32> to vector<128xf32>
      %c38 = arith.constant 38 : index
      %c0_85 = arith.constant 0 : index
      %357 = vector.load %arg6[%c38, %c0_85] : memref<128x128xf32, #tpu.memory_space<vmem>>, vector<1x128xf32>
      %358 = vector.shape_cast %357 : vector<1x128xf32> to vector<128xf32>
      %359 = vector.shape_cast %356 : vector<128xf32> to vector<1x128xf32>
      tpu.vector_store %arg6[%c38, %c0_85], %359 {strides = array<i32>} : memref<128x128xf32, #tpu.memory_space<vmem>>, vector<1x128xf32>,
      %c39_i32 = arith.constant 39 : i32
      %360 = arith.addi %8, %c39_i32 : i32
      %361 = arith.index_cast %360 : i32 to index
      %362 = memref.load %arg2[%361] : memref<512xi32, #tpu.memory_space<smem>>
      %363 = arith.index_cast %362 : i32 to index
      %c0_86 = arith.constant 0 : index
      %364 = vector.load %arg3[%363, %c0_86] : memref<1000x128xf32, #tpu.memory_space<vmem>>, vector<1x128xf32>
      %365 = vector.shape_cast %364 : vector<1x128xf32> to vector<128xf32>
      %c39 = arith.constant 39 : index
      %c0_87 = arith.constant 0 : index
      %366 = vector.load %arg6[%c39, %c0_87] : memref<128x128xf32, #tpu.memory_space<vmem>>, vector<1x128xf32>
      %367 = vector.shape_cast %366 : vector<1x128xf32> to vector<128xf32>
      %368 = vector.shape_cast %365 : vector<128xf32> to vector<1x128xf32>
      tpu.vector_store %arg6[%c39, %c0_87], %368 {strides = array<i32>} : memref<128x128xf32, #tpu.memory_space<vmem>>, vector<1x128xf32>,
      %c40_i32 = arith.constant 40 : i32
      %369 = arith.addi %8, %c40_i32 : i32
      %370 = arith.index_cast %369 : i32 to index
      %371 = memref.load %arg2[%370] : memref<512xi32, #tpu.memory_space<smem>>
      %372 = arith.index_cast %371 : i32 to index
      %c0_88 = arith.constant 0 : index
      %373 = vector.load %arg3[%372, %c0_88] : memref<1000x128xf32, #tpu.memory_space<vmem>>, vector<1x128xf32>
      %374 = vector.shape_cast %373 : vector<1x128xf32> to vector<128xf32>
      %c40 = arith.constant 40 : index
      %c0_89 = arith.constant 0 : index
      %375 = vector.load %arg6[%c40, %c0_89] : memref<128x128xf32, #tpu.memory_space<vmem>>, vector<1x128xf32>
      %376 = vector.shape_cast %375 : vector<1x128xf32> to vector<128xf32>
      %377 = vector.shape_cast %374 : vector<128xf32> to vector<1x128xf32>
      tpu.vector_store %arg6[%c40, %c0_89], %377 {strides = array<i32>} : memref<128x128xf32, #tpu.memory_space<vmem>>, vector<1x128xf32>,
      %c41_i32 = arith.constant 41 : i32
      %378 = arith.addi %8, %c41_i32 : i32
      %379 = arith.index_cast %378 : i32 to index
      %380 = memref.load %arg2[%379] : memref<512xi32, #tpu.memory_space<smem>>
      %381 = arith.index_cast %380 : i32 to index
      %c0_90 = arith.constant 0 : index
      %382 = vector.load %arg3[%381, %c0_90] : memref<1000x128xf32, #tpu.memory_space<vmem>>, vector<1x128xf32>
      %383 = vector.shape_cast %382 : vector<1x128xf32> to vector<128xf32>
      %c41 = arith.constant 41 : index
      %c0_91 = arith.constant 0 : index
      %384 = vector.load %arg6[%c41, %c0_91] : memref<128x128xf32, #tpu.memory_space<vmem>>, vector<1x128xf32>
      %385 = vector.shape_cast %384 : vector<1x128xf32> to vector<128xf32>
      %386 = vector.shape_cast %383 : vector<128xf32> to vector<1x128xf32>
      tpu.vector_store %arg6[%c41, %c0_91], %386 {strides = array<i32>} : memref<128x128xf32, #tpu.memory_space<vmem>>, vector<1x128xf32>,
      %c42_i32 = arith.constant 42 : i32
      %387 = arith.addi %8, %c42_i32 : i32
      %388 = arith.index_cast %387 : i32 to index
      %389 = memref.load %arg2[%388] : memref<512xi32, #tpu.memory_space<smem>>
      %390 = arith.index_cast %389 : i32 to index
      %c0_92 = arith.constant 0 : index
      %391 = vector.load %arg3[%390, %c0_92] : memref<1000x128xf32, #tpu.memory_space<vmem>>, vector<1x128xf32>
      %392 = vector.shape_cast %391 : vector<1x128xf32> to vector<128xf32>
      %c42 = arith.constant 42 : index
      %c0_93 = arith.constant 0 : index
      %393 = vector.load %arg6[%c42, %c0_93] : memref<128x128xf32, #tpu.memory_space<vmem>>, vector<1x128xf32>
      %394 = vector.shape_cast %393 : vector<1x128xf32> to vector<128xf32>
      %395 = vector.shape_cast %392 : vector<128xf32> to vector<1x128xf32>
      tpu.vector_store %arg6[%c42, %c0_93], %395 {strides = array<i32>} : memref<128x128xf32, #tpu.memory_space<vmem>>, vector<1x128xf32>,
      %c43_i32 = arith.constant 43 : i32
      %396 = arith.addi %8, %c43_i32 : i32
      %397 = arith.index_cast %396 : i32 to index
      %398 = memref.load %arg2[%397] : memref<512xi32, #tpu.memory_space<smem>>
      %399 = arith.index_cast %398 : i32 to index
      %c0_94 = arith.constant 0 : index
      %400 = vector.load %arg3[%399, %c0_94] : memref<1000x128xf32, #tpu.memory_space<vmem>>, vector<1x128xf32>
      %401 = vector.shape_cast %400 : vector<1x128xf32> to vector<128xf32>
      %c43 = arith.constant 43 : index
      %c0_95 = arith.constant 0 : index
      %402 = vector.load %arg6[%c43, %c0_95] : memref<128x128xf32, #tpu.memory_space<vmem>>, vector<1x128xf32>
      %403 = vector.shape_cast %402 : vector<1x128xf32> to vector<128xf32>
      %404 = vector.shape_cast %401 : vector<128xf32> to vector<1x128xf32>
      tpu.vector_store %arg6[%c43, %c0_95], %404 {strides = array<i32>} : memref<128x128xf32, #tpu.memory_space<vmem>>, vector<1x128xf32>,
      %c44_i32 = arith.constant 44 : i32
      %405 = arith.addi %8, %c44_i32 : i32
      %406 = arith.index_cast %405 : i32 to index
      %407 = memref.load %arg2[%406] : memref<512xi32, #tpu.memory_space<smem>>
      %408 = arith.index_cast %407 : i32 to index
      %c0_96 = arith.constant 0 : index
      %409 = vector.load %arg3[%408, %c0_96] : memref<1000x128xf32, #tpu.memory_space<vmem>>, vector<1x128xf32>
      %410 = vector.shape_cast %409 : vector<1x128xf32> to vector<128xf32>
      %c44 = arith.constant 44 : index
      %c0_97 = arith.constant 0 : index
      %411 = vector.load %arg6[%c44, %c0_97] : memref<128x128xf32, #tpu.memory_space<vmem>>, vector<1x128xf32>
      %412 = vector.shape_cast %411 : vector<1x128xf32> to vector<128xf32>
      %413 = vector.shape_cast %410 : vector<128xf32> to vector<1x128xf32>
      tpu.vector_store %arg6[%c44, %c0_97], %413 {strides = array<i32>} : memref<128x128xf32, #tpu.memory_space<vmem>>, vector<1x128xf32>,
      %c45_i32 = arith.constant 45 : i32
      %414 = arith.addi %8, %c45_i32 : i32
      %415 = arith.index_cast %414 : i32 to index
      %416 = memref.load %arg2[%415] : memref<512xi32, #tpu.memory_space<smem>>
      %417 = arith.index_cast %416 : i32 to index
      %c0_98 = arith.constant 0 : index
      %418 = vector.load %arg3[%417, %c0_98] : memref<1000x128xf32, #tpu.memory_space<vmem>>, vector<1x128xf32>
      %419 = vector.shape_cast %418 : vector<1x128xf32> to vector<128xf32>
      %c45 = arith.constant 45 : index
      %c0_99 = arith.constant 0 : index
      %420 = vector.load %arg6[%c45, %c0_99] : memref<128x128xf32, #tpu.memory_space<vmem>>, vector<1x128xf32>
      %421 = vector.shape_cast %420 : vector<1x128xf32> to vector<128xf32>
      %422 = vector.shape_cast %419 : vector<128xf32> to vector<1x128xf32>
      tpu.vector_store %arg6[%c45, %c0_99], %422 {strides = array<i32>} : memref<128x128xf32, #tpu.memory_space<vmem>>, vector<1x128xf32>,
      %c46_i32 = arith.constant 46 : i32
      %423 = arith.addi %8, %c46_i32 : i32
      %424 = arith.index_cast %423 : i32 to index
      %425 = memref.load %arg2[%424] : memref<512xi32, #tpu.memory_space<smem>>
      %426 = arith.index_cast %425 : i32 to index
      %c0_100 = arith.constant 0 : index
      %427 = vector.load %arg3[%426, %c0_100] : memref<1000x128xf32, #tpu.memory_space<vmem>>, vector<1x128xf32>
      %428 = vector.shape_cast %427 : vector<1x128xf32> to vector<128xf32>
      %c46 = arith.constant 46 : index
      %c0_101 = arith.constant 0 : index
      %429 = vector.load %arg6[%c46, %c0_101] : memref<128x128xf32, #tpu.memory_space<vmem>>, vector<1x128xf32>
      %430 = vector.shape_cast %429 : vector<1x128xf32> to vector<128xf32>
      %431 = vector.shape_cast %428 : vector<128xf32> to vector<1x128xf32>
      tpu.vector_store %arg6[%c46, %c0_101], %431 {strides = array<i32>} : memref<128x128xf32, #tpu.memory_space<vmem>>, vector<1x128xf32>,
      %c47_i32 = arith.constant 47 : i32
      %432 = arith.addi %8, %c47_i32 : i32
      %433 = arith.index_cast %432 : i32 to index
      %434 = memref.load %arg2[%433] : memref<512xi32, #tpu.memory_space<smem>>
      %435 = arith.index_cast %434 : i32 to index
      %c0_102 = arith.constant 0 : index
      %436 = vector.load %arg3[%435, %c0_102] : memref<1000x128xf32, #tpu.memory_space<vmem>>, vector<1x128xf32>
      %437 = vector.shape_cast %436 : vector<1x128xf32> to vector<128xf32>
      %c47 = arith.constant 47 : index
      %c0_103 = arith.constant 0 : index
      %438 = vector.load %arg6[%c47, %c0_103] : memref<128x128xf32, #tpu.memory_space<vmem>>, vector<1x128xf32>
      %439 = vector.shape_cast %438 : vector<1x128xf32> to vector<128xf32>
      %440 = vector.shape_cast %437 : vector<128xf32> to vector<1x128xf32>
      tpu.vector_store %arg6[%c47, %c0_103], %440 {strides = array<i32>} : memref<128x128xf32, #tpu.memory_space<vmem>>, vector<1x128xf32>,
      %c48_i32 = arith.constant 48 : i32
      %441 = arith.addi %8, %c48_i32 : i32
      %442 = arith.index_cast %441 : i32 to index
      %443 = memref.load %arg2[%442] : memref<512xi32, #tpu.memory_space<smem>>
      %444 = arith.index_cast %443 : i32 to index
      %c0_104 = arith.constant 0 : index
      %445 = vector.load %arg3[%444, %c0_104] : memref<1000x128xf32, #tpu.memory_space<vmem>>, vector<1x128xf32>
      %446 = vector.shape_cast %445 : vector<1x128xf32> to vector<128xf32>
      %c48 = arith.constant 48 : index
      %c0_105 = arith.constant 0 : index
      %447 = vector.load %arg6[%c48, %c0_105] : memref<128x128xf32, #tpu.memory_space<vmem>>, vector<1x128xf32>
      %448 = vector.shape_cast %447 : vector<1x128xf32> to vector<128xf32>
      %449 = vector.shape_cast %446 : vector<128xf32> to vector<1x128xf32>
      tpu.vector_store %arg6[%c48, %c0_105], %449 {strides = array<i32>} : memref<128x128xf32, #tpu.memory_space<vmem>>, vector<1x128xf32>,
      %c49_i32 = arith.constant 49 : i32
      %450 = arith.addi %8, %c49_i32 : i32
      %451 = arith.index_cast %450 : i32 to index
      %452 = memref.load %arg2[%451] : memref<512xi32, #tpu.memory_space<smem>>
      %453 = arith.index_cast %452 : i32 to index
      %c0_106 = arith.constant 0 : index
      %454 = vector.load %arg3[%453, %c0_106] : memref<1000x128xf32, #tpu.memory_space<vmem>>, vector<1x128xf32>
      %455 = vector.shape_cast %454 : vector<1x128xf32> to vector<128xf32>
      %c49 = arith.constant 49 : index
      %c0_107 = arith.constant 0 : index
      %456 = vector.load %arg6[%c49, %c0_107] : memref<128x128xf32, #tpu.memory_space<vmem>>, vector<1x128xf32>
      %457 = vector.shape_cast %456 : vector<1x128xf32> to vector<128xf32>
      %458 = vector.shape_cast %455 : vector<128xf32> to vector<1x128xf32>
      tpu.vector_store %arg6[%c49, %c0_107], %458 {strides = array<i32>} : memref<128x128xf32, #tpu.memory_space<vmem>>, vector<1x128xf32>,
      %c50_i32 = arith.constant 50 : i32
      %459 = arith.addi %8, %c50_i32 : i32
      %460 = arith.index_cast %459 : i32 to index
      %461 = memref.load %arg2[%460] : memref<512xi32, #tpu.memory_space<smem>>
      %462 = arith.index_cast %461 : i32 to index
      %c0_108 = arith.constant 0 : index
      %463 = vector.load %arg3[%462, %c0_108] : memref<1000x128xf32, #tpu.memory_space<vmem>>, vector<1x128xf32>
      %464 = vector.shape_cast %463 : vector<1x128xf32> to vector<128xf32>
      %c50 = arith.constant 50 : index
      %c0_109 = arith.constant 0 : index
      %465 = vector.load %arg6[%c50, %c0_109] : memref<128x128xf32, #tpu.memory_space<vmem>>, vector<1x128xf32>
      %466 = vector.shape_cast %465 : vector<1x128xf32> to vector<128xf32>
      %467 = vector.shape_cast %464 : vector<128xf32> to vector<1x128xf32>
      tpu.vector_store %arg6[%c50, %c0_109], %467 {strides = array<i32>} : memref<128x128xf32, #tpu.memory_space<vmem>>, vector<1x128xf32>,
      %c51_i32 = arith.constant 51 : i32
      %468 = arith.addi %8, %c51_i32 : i32
      %469 = arith.index_cast %468 : i32 to index
      %470 = memref.load %arg2[%469] : memref<512xi32, #tpu.memory_space<smem>>
      %471 = arith.index_cast %470 : i32 to index
      %c0_110 = arith.constant 0 : index
      %472 = vector.load %arg3[%471, %c0_110] : memref<1000x128xf32, #tpu.memory_space<vmem>>, vector<1x128xf32>
      %473 = vector.shape_cast %472 : vector<1x128xf32> to vector<128xf32>
      %c51 = arith.constant 51 : index
      %c0_111 = arith.constant 0 : index
      %474 = vector.load %arg6[%c51, %c0_111] : memref<128x128xf32, #tpu.memory_space<vmem>>, vector<1x128xf32>
      %475 = vector.shape_cast %474 : vector<1x128xf32> to vector<128xf32>
      %476 = vector.shape_cast %473 : vector<128xf32> to vector<1x128xf32>
      tpu.vector_store %arg6[%c51, %c0_111], %476 {strides = array<i32>} : memref<128x128xf32, #tpu.memory_space<vmem>>, vector<1x128xf32>,
      %c52_i32 = arith.constant 52 : i32
      %477 = arith.addi %8, %c52_i32 : i32
      %478 = arith.index_cast %477 : i32 to index
      %479 = memref.load %arg2[%478] : memref<512xi32, #tpu.memory_space<smem>>
      %480 = arith.index_cast %479 : i32 to index
      %c0_112 = arith.constant 0 : index
      %481 = vector.load %arg3[%480, %c0_112] : memref<1000x128xf32, #tpu.memory_space<vmem>>, vector<1x128xf32>
      %482 = vector.shape_cast %481 : vector<1x128xf32> to vector<128xf32>
      %c52 = arith.constant 52 : index
      %c0_113 = arith.constant 0 : index
      %483 = vector.load %arg6[%c52, %c0_113] : memref<128x128xf32, #tpu.memory_space<vmem>>, vector<1x128xf32>
      %484 = vector.shape_cast %483 : vector<1x128xf32> to vector<128xf32>
      %485 = vector.shape_cast %482 : vector<128xf32> to vector<1x128xf32>
      tpu.vector_store %arg6[%c52, %c0_113], %485 {strides = array<i32>} : memref<128x128xf32, #tpu.memory_space<vmem>>, vector<1x128xf32>,
      %c53_i32 = arith.constant 53 : i32
      %486 = arith.addi %8, %c53_i32 : i32
      %487 = arith.index_cast %486 : i32 to index
      %488 = memref.load %arg2[%487] : memref<512xi32, #tpu.memory_space<smem>>
      %489 = arith.index_cast %488 : i32 to index
      %c0_114 = arith.constant 0 : index
      %490 = vector.load %arg3[%489, %c0_114] : memref<1000x128xf32, #tpu.memory_space<vmem>>, vector<1x128xf32>
      %491 = vector.shape_cast %490 : vector<1x128xf32> to vector<128xf32>
      %c53 = arith.constant 53 : index
      %c0_115 = arith.constant 0 : index
      %492 = vector.load %arg6[%c53, %c0_115] : memref<128x128xf32, #tpu.memory_space<vmem>>, vector<1x128xf32>
      %493 = vector.shape_cast %492 : vector<1x128xf32> to vector<128xf32>
      %494 = vector.shape_cast %491 : vector<128xf32> to vector<1x128xf32>
      tpu.vector_store %arg6[%c53, %c0_115], %494 {strides = array<i32>} : memref<128x128xf32, #tpu.memory_space<vmem>>, vector<1x128xf32>,
      %c54_i32 = arith.constant 54 : i32
      %495 = arith.addi %8, %c54_i32 : i32
      %496 = arith.index_cast %495 : i32 to index
      %497 = memref.load %arg2[%496] : memref<512xi32, #tpu.memory_space<smem>>
      %498 = arith.index_cast %497 : i32 to index
      %c0_116 = arith.constant 0 : index
      %499 = vector.load %arg3[%498, %c0_116] : memref<1000x128xf32, #tpu.memory_space<vmem>>, vector<1x128xf32>
      %500 = vector.shape_cast %499 : vector<1x128xf32> to vector<128xf32>
      %c54 = arith.constant 54 : index
      %c0_117 = arith.constant 0 : index
      %501 = vector.load %arg6[%c54, %c0_117] : memref<128x128xf32, #tpu.memory_space<vmem>>, vector<1x128xf32>
      %502 = vector.shape_cast %501 : vector<1x128xf32> to vector<128xf32>
      %503 = vector.shape_cast %500 : vector<128xf32> to vector<1x128xf32>
      tpu.vector_store %arg6[%c54, %c0_117], %503 {strides = array<i32>} : memref<128x128xf32, #tpu.memory_space<vmem>>, vector<1x128xf32>,
      %c55_i32 = arith.constant 55 : i32
      %504 = arith.addi %8, %c55_i32 : i32
      %505 = arith.index_cast %504 : i32 to index
      %506 = memref.load %arg2[%505] : memref<512xi32, #tpu.memory_space<smem>>
      %507 = arith.index_cast %506 : i32 to index
      %c0_118 = arith.constant 0 : index
      %508 = vector.load %arg3[%507, %c0_118] : memref<1000x128xf32, #tpu.memory_space<vmem>>, vector<1x128xf32>
      %509 = vector.shape_cast %508 : vector<1x128xf32> to vector<128xf32>
      %c55 = arith.constant 55 : index
      %c0_119 = arith.constant 0 : index
      %510 = vector.load %arg6[%c55, %c0_119] : memref<128x128xf32, #tpu.memory_space<vmem>>, vector<1x128xf32>
      %511 = vector.shape_cast %510 : vector<1x128xf32> to vector<128xf32>
      %512 = vector.shape_cast %509 : vector<128xf32> to vector<1x128xf32>
      tpu.vector_store %arg6[%c55, %c0_119], %512 {strides = array<i32>} : memref<128x128xf32, #tpu.memory_space<vmem>>, vector<1x128xf32>,
      %c56_i32 = arith.constant 56 : i32
      %513 = arith.addi %8, %c56_i32 : i32
      %514 = arith.index_cast %513 : i32 to index
      %515 = memref.load %arg2[%514] : memref<512xi32, #tpu.memory_space<smem>>
      %516 = arith.index_cast %515 : i32 to index
      %c0_120 = arith.constant 0 : index
      %517 = vector.load %arg3[%516, %c0_120] : memref<1000x128xf32, #tpu.memory_space<vmem>>, vector<1x128xf32>
      %518 = vector.shape_cast %517 : vector<1x128xf32> to vector<128xf32>
      %c56 = arith.constant 56 : index
      %c0_121 = arith.constant 0 : index
      %519 = vector.load %arg6[%c56, %c0_121] : memref<128x128xf32, #tpu.memory_space<vmem>>, vector<1x128xf32>
      %520 = vector.shape_cast %519 : vector<1x128xf32> to vector<128xf32>
      %521 = vector.shape_cast %518 : vector<128xf32> to vector<1x128xf32>
      tpu.vector_store %arg6[%c56, %c0_121], %521 {strides = array<i32>} : memref<128x128xf32, #tpu.memory_space<vmem>>, vector<1x128xf32>,
      %c57_i32 = arith.constant 57 : i32
      %522 = arith.addi %8, %c57_i32 : i32
      %523 = arith.index_cast %522 : i32 to index
      %524 = memref.load %arg2[%523] : memref<512xi32, #tpu.memory_space<smem>>
      %525 = arith.index_cast %524 : i32 to index
      %c0_122 = arith.constant 0 : index
      %526 = vector.load %arg3[%525, %c0_122] : memref<1000x128xf32, #tpu.memory_space<vmem>>, vector<1x128xf32>
      %527 = vector.shape_cast %526 : vector<1x128xf32> to vector<128xf32>
      %c57 = arith.constant 57 : index
      %c0_123 = arith.constant 0 : index
      %528 = vector.load %arg6[%c57, %c0_123] : memref<128x128xf32, #tpu.memory_space<vmem>>, vector<1x128xf32>
      %529 = vector.shape_cast %528 : vector<1x128xf32> to vector<128xf32>
      %530 = vector.shape_cast %527 : vector<128xf32> to vector<1x128xf32>
      tpu.vector_store %arg6[%c57, %c0_123], %530 {strides = array<i32>} : memref<128x128xf32, #tpu.memory_space<vmem>>, vector<1x128xf32>,
      %c58_i32 = arith.constant 58 : i32
      %531 = arith.addi %8, %c58_i32 : i32
      %532 = arith.index_cast %531 : i32 to index
      %533 = memref.load %arg2[%532] : memref<512xi32, #tpu.memory_space<smem>>
      %534 = arith.index_cast %533 : i32 to index
      %c0_124 = arith.constant 0 : index
      %535 = vector.load %arg3[%534, %c0_124] : memref<1000x128xf32, #tpu.memory_space<vmem>>, vector<1x128xf32>
      %536 = vector.shape_cast %535 : vector<1x128xf32> to vector<128xf32>
      %c58 = arith.constant 58 : index
      %c0_125 = arith.constant 0 : index
      %537 = vector.load %arg6[%c58, %c0_125] : memref<128x128xf32, #tpu.memory_space<vmem>>, vector<1x128xf32>
      %538 = vector.shape_cast %537 : vector<1x128xf32> to vector<128xf32>
      %539 = vector.shape_cast %536 : vector<128xf32> to vector<1x128xf32>
      tpu.vector_store %arg6[%c58, %c0_125], %539 {strides = array<i32>} : memref<128x128xf32, #tpu.memory_space<vmem>>, vector<1x128xf32>,
      %c59_i32 = arith.constant 59 : i32
      %540 = arith.addi %8, %c59_i32 : i32
      %541 = arith.index_cast %540 : i32 to index
      %542 = memref.load %arg2[%541] : memref<512xi32, #tpu.memory_space<smem>>
      %543 = arith.index_cast %542 : i32 to index
      %c0_126 = arith.constant 0 : index
      %544 = vector.load %arg3[%543, %c0_126] : memref<1000x128xf32, #tpu.memory_space<vmem>>, vector<1x128xf32>
      %545 = vector.shape_cast %544 : vector<1x128xf32> to vector<128xf32>
      %c59 = arith.constant 59 : index
      %c0_127 = arith.constant 0 : index
      %546 = vector.load %arg6[%c59, %c0_127] : memref<128x128xf32, #tpu.memory_space<vmem>>, vector<1x128xf32>
      %547 = vector.shape_cast %546 : vector<1x128xf32> to vector<128xf32>
      %548 = vector.shape_cast %545 : vector<128xf32> to vector<1x128xf32>
      tpu.vector_store %arg6[%c59, %c0_127], %548 {strides = array<i32>} : memref<128x128xf32, #tpu.memory_space<vmem>>, vector<1x128xf32>,
      %c60_i32 = arith.constant 60 : i32
      %549 = arith.addi %8, %c60_i32 : i32
      %550 = arith.index_cast %549 : i32 to index
      %551 = memref.load %arg2[%550] : memref<512xi32, #tpu.memory_space<smem>>
      %552 = arith.index_cast %551 : i32 to index
      %c0_128 = arith.constant 0 : index
      %553 = vector.load %arg3[%552, %c0_128] : memref<1000x128xf32, #tpu.memory_space<vmem>>, vector<1x128xf32>
      %554 = vector.shape_cast %553 : vector<1x128xf32> to vector<128xf32>
      %c60 = arith.constant 60 : index
      %c0_129 = arith.constant 0 : index
      %555 = vector.load %arg6[%c60, %c0_129] : memref<128x128xf32, #tpu.memory_space<vmem>>, vector<1x128xf32>
      %556 = vector.shape_cast %555 : vector<1x128xf32> to vector<128xf32>
      %557 = vector.shape_cast %554 : vector<128xf32> to vector<1x128xf32>
      tpu.vector_store %arg6[%c60, %c0_129], %557 {strides = array<i32>} : memref<128x128xf32, #tpu.memory_space<vmem>>, vector<1x128xf32>,
      %c61_i32 = arith.constant 61 : i32
      %558 = arith.addi %8, %c61_i32 : i32
      %559 = arith.index_cast %558 : i32 to index
      %560 = memref.load %arg2[%559] : memref<512xi32, #tpu.memory_space<smem>>
      %561 = arith.index_cast %560 : i32 to index
      %c0_130 = arith.constant 0 : index
      %562 = vector.load %arg3[%561, %c0_130] : memref<1000x128xf32, #tpu.memory_space<vmem>>, vector<1x128xf32>
      %563 = vector.shape_cast %562 : vector<1x128xf32> to vector<128xf32>
      %c61 = arith.constant 61 : index
      %c0_131 = arith.constant 0 : index
      %564 = vector.load %arg6[%c61, %c0_131] : memref<128x128xf32, #tpu.memory_space<vmem>>, vector<1x128xf32>
      %565 = vector.shape_cast %564 : vector<1x128xf32> to vector<128xf32>
      %566 = vector.shape_cast %563 : vector<128xf32> to vector<1x128xf32>
      tpu.vector_store %arg6[%c61, %c0_131], %566 {strides = array<i32>} : memref<128x128xf32, #tpu.memory_space<vmem>>, vector<1x128xf32>,
      %c62_i32 = arith.constant 62 : i32
      %567 = arith.addi %8, %c62_i32 : i32
      %568 = arith.index_cast %567 : i32 to index
      %569 = memref.load %arg2[%568] : memref<512xi32, #tpu.memory_space<smem>>
      %570 = arith.index_cast %569 : i32 to index
      %c0_132 = arith.constant 0 : index
      %571 = vector.load %arg3[%570, %c0_132] : memref<1000x128xf32, #tpu.memory_space<vmem>>, vector<1x128xf32>
      %572 = vector.shape_cast %571 : vector<1x128xf32> to vector<128xf32>
      %c62 = arith.constant 62 : index
      %c0_133 = arith.constant 0 : index
      %573 = vector.load %arg6[%c62, %c0_133] : memref<128x128xf32, #tpu.memory_space<vmem>>, vector<1x128xf32>
      %574 = vector.shape_cast %573 : vector<1x128xf32> to vector<128xf32>
      %575 = vector.shape_cast %572 : vector<128xf32> to vector<1x128xf32>
      tpu.vector_store %arg6[%c62, %c0_133], %575 {strides = array<i32>} : memref<128x128xf32, #tpu.memory_space<vmem>>, vector<1x128xf32>,
      %c63_i32 = arith.constant 63 : i32
      %576 = arith.addi %8, %c63_i32 : i32
      %577 = arith.index_cast %576 : i32 to index
      %578 = memref.load %arg2[%577] : memref<512xi32, #tpu.memory_space<smem>>
      %579 = arith.index_cast %578 : i32 to index
      %c0_134 = arith.constant 0 : index
      %580 = vector.load %arg3[%579, %c0_134] : memref<1000x128xf32, #tpu.memory_space<vmem>>, vector<1x128xf32>
      %581 = vector.shape_cast %580 : vector<1x128xf32> to vector<128xf32>
      %c63 = arith.constant 63 : index
      %c0_135 = arith.constant 0 : index
      %582 = vector.load %arg6[%c63, %c0_135] : memref<128x128xf32, #tpu.memory_space<vmem>>, vector<1x128xf32>
      %583 = vector.shape_cast %582 : vector<1x128xf32> to vector<128xf32>
      %584 = vector.shape_cast %581 : vector<128xf32> to vector<1x128xf32>
      tpu.vector_store %arg6[%c63, %c0_135], %584 {strides = array<i32>} : memref<128x128xf32, #tpu.memory_space<vmem>>, vector<1x128xf32>,
      %c64_i32 = arith.constant 64 : i32
      %585 = arith.addi %8, %c64_i32 : i32
      %586 = arith.index_cast %585 : i32 to index
      %587 = memref.load %arg2[%586] : memref<512xi32, #tpu.memory_space<smem>>
      %588 = arith.index_cast %587 : i32 to index
      %c0_136 = arith.constant 0 : index
      %589 = vector.load %arg3[%588, %c0_136] : memref<1000x128xf32, #tpu.memory_space<vmem>>, vector<1x128xf32>
      %590 = vector.shape_cast %589 : vector<1x128xf32> to vector<128xf32>
      %c64 = arith.constant 64 : index
      %c0_137 = arith.constant 0 : index
      %591 = vector.load %arg6[%c64, %c0_137] : memref<128x128xf32, #tpu.memory_space<vmem>>, vector<1x128xf32>
      %592 = vector.shape_cast %591 : vector<1x128xf32> to vector<128xf32>
      %593 = vector.shape_cast %590 : vector<128xf32> to vector<1x128xf32>
      tpu.vector_store %arg6[%c64, %c0_137], %593 {strides = array<i32>} : memref<128x128xf32, #tpu.memory_space<vmem>>, vector<1x128xf32>,
      %c65_i32 = arith.constant 65 : i32
      %594 = arith.addi %8, %c65_i32 : i32
      %595 = arith.index_cast %594 : i32 to index
      %596 = memref.load %arg2[%595] : memref<512xi32, #tpu.memory_space<smem>>
      %597 = arith.index_cast %596 : i32 to index
      %c0_138 = arith.constant 0 : index
      %598 = vector.load %arg3[%597, %c0_138] : memref<1000x128xf32, #tpu.memory_space<vmem>>, vector<1x128xf32>
      %599 = vector.shape_cast %598 : vector<1x128xf32> to vector<128xf32>
      %c65 = arith.constant 65 : index
      %c0_139 = arith.constant 0 : index
      %600 = vector.load %arg6[%c65, %c0_139] : memref<128x128xf32, #tpu.memory_space<vmem>>, vector<1x128xf32>
      %601 = vector.shape_cast %600 : vector<1x128xf32> to vector<128xf32>
      %602 = vector.shape_cast %599 : vector<128xf32> to vector<1x128xf32>
      tpu.vector_store %arg6[%c65, %c0_139], %602 {strides = array<i32>} : memref<128x128xf32, #tpu.memory_space<vmem>>, vector<1x128xf32>,
      %c66_i32 = arith.constant 66 : i32
      %603 = arith.addi %8, %c66_i32 : i32
      %604 = arith.index_cast %603 : i32 to index
      %605 = memref.load %arg2[%604] : memref<512xi32, #tpu.memory_space<smem>>
      %606 = arith.index_cast %605 : i32 to index
      %c0_140 = arith.constant 0 : index
      %607 = vector.load %arg3[%606, %c0_140] : memref<1000x128xf32, #tpu.memory_space<vmem>>, vector<1x128xf32>
      %608 = vector.shape_cast %607 : vector<1x128xf32> to vector<128xf32>
      %c66 = arith.constant 66 : index
      %c0_141 = arith.constant 0 : index
      %609 = vector.load %arg6[%c66, %c0_141] : memref<128x128xf32, #tpu.memory_space<vmem>>, vector<1x128xf32>
      %610 = vector.shape_cast %609 : vector<1x128xf32> to vector<128xf32>
      %611 = vector.shape_cast %608 : vector<128xf32> to vector<1x128xf32>
      tpu.vector_store %arg6[%c66, %c0_141], %611 {strides = array<i32>} : memref<128x128xf32, #tpu.memory_space<vmem>>, vector<1x128xf32>,
      %c67_i32 = arith.constant 67 : i32
      %612 = arith.addi %8, %c67_i32 : i32
      %613 = arith.index_cast %612 : i32 to index
      %614 = memref.load %arg2[%613] : memref<512xi32, #tpu.memory_space<smem>>
      %615 = arith.index_cast %614 : i32 to index
      %c0_142 = arith.constant 0 : index
      %616 = vector.load %arg3[%615, %c0_142] : memref<1000x128xf32, #tpu.memory_space<vmem>>, vector<1x128xf32>
      %617 = vector.shape_cast %616 : vector<1x128xf32> to vector<128xf32>
      %c67 = arith.constant 67 : index
      %c0_143 = arith.constant 0 : index
      %618 = vector.load %arg6[%c67, %c0_143] : memref<128x128xf32, #tpu.memory_space<vmem>>, vector<1x128xf32>
      %619 = vector.shape_cast %618 : vector<1x128xf32> to vector<128xf32>
      %620 = vector.shape_cast %617 : vector<128xf32> to vector<1x128xf32>
      tpu.vector_store %arg6[%c67, %c0_143], %620 {strides = array<i32>} : memref<128x128xf32, #tpu.memory_space<vmem>>, vector<1x128xf32>,
      %c68_i32 = arith.constant 68 : i32
      %621 = arith.addi %8, %c68_i32 : i32
      %622 = arith.index_cast %621 : i32 to index
      %623 = memref.load %arg2[%622] : memref<512xi32, #tpu.memory_space<smem>>
      %624 = arith.index_cast %623 : i32 to index
      %c0_144 = arith.constant 0 : index
      %625 = vector.load %arg3[%624, %c0_144] : memref<1000x128xf32, #tpu.memory_space<vmem>>, vector<1x128xf32>
      %626 = vector.shape_cast %625 : vector<1x128xf32> to vector<128xf32>
      %c68 = arith.constant 68 : index
      %c0_145 = arith.constant 0 : index
      %627 = vector.load %arg6[%c68, %c0_145] : memref<128x128xf32, #tpu.memory_space<vmem>>, vector<1x128xf32>
      %628 = vector.shape_cast %627 : vector<1x128xf32> to vector<128xf32>
      %629 = vector.shape_cast %626 : vector<128xf32> to vector<1x128xf32>
      tpu.vector_store %arg6[%c68, %c0_145], %629 {strides = array<i32>} : memref<128x128xf32, #tpu.memory_space<vmem>>, vector<1x128xf32>,
      %c69_i32 = arith.constant 69 : i32
      %630 = arith.addi %8, %c69_i32 : i32
      %631 = arith.index_cast %630 : i32 to index
      %632 = memref.load %arg2[%631] : memref<512xi32, #tpu.memory_space<smem>>
      %633 = arith.index_cast %632 : i32 to index
      %c0_146 = arith.constant 0 : index
      %634 = vector.load %arg3[%633, %c0_146] : memref<1000x128xf32, #tpu.memory_space<vmem>>, vector<1x128xf32>
      %635 = vector.shape_cast %634 : vector<1x128xf32> to vector<128xf32>
      %c69 = arith.constant 69 : index
      %c0_147 = arith.constant 0 : index
      %636 = vector.load %arg6[%c69, %c0_147] : memref<128x128xf32, #tpu.memory_space<vmem>>, vector<1x128xf32>
      %637 = vector.shape_cast %636 : vector<1x128xf32> to vector<128xf32>
      %638 = vector.shape_cast %635 : vector<128xf32> to vector<1x128xf32>
      tpu.vector_store %arg6[%c69, %c0_147], %638 {strides = array<i32>} : memref<128x128xf32, #tpu.memory_space<vmem>>, vector<1x128xf32>,
      %c70_i32 = arith.constant 70 : i32
      %639 = arith.addi %8, %c70_i32 : i32
      %640 = arith.index_cast %639 : i32 to index
      %641 = memref.load %arg2[%640] : memref<512xi32, #tpu.memory_space<smem>>
      %642 = arith.index_cast %641 : i32 to index
      %c0_148 = arith.constant 0 : index
      %643 = vector.load %arg3[%642, %c0_148] : memref<1000x128xf32, #tpu.memory_space<vmem>>, vector<1x128xf32>
      %644 = vector.shape_cast %643 : vector<1x128xf32> to vector<128xf32>
      %c70 = arith.constant 70 : index
      %c0_149 = arith.constant 0 : index
      %645 = vector.load %arg6[%c70, %c0_149] : memref<128x128xf32, #tpu.memory_space<vmem>>, vector<1x128xf32>
      %646 = vector.shape_cast %645 : vector<1x128xf32> to vector<128xf32>
      %647 = vector.shape_cast %644 : vector<128xf32> to vector<1x128xf32>
      tpu.vector_store %arg6[%c70, %c0_149], %647 {strides = array<i32>} : memref<128x128xf32, #tpu.memory_space<vmem>>, vector<1x128xf32>,
      %c71_i32 = arith.constant 71 : i32
      %648 = arith.addi %8, %c71_i32 : i32
      %649 = arith.index_cast %648 : i32 to index
      %650 = memref.load %arg2[%649] : memref<512xi32, #tpu.memory_space<smem>>
      %651 = arith.index_cast %650 : i32 to index
      %c0_150 = arith.constant 0 : index
      %652 = vector.load %arg3[%651, %c0_150] : memref<1000x128xf32, #tpu.memory_space<vmem>>, vector<1x128xf32>
      %653 = vector.shape_cast %652 : vector<1x128xf32> to vector<128xf32>
      %c71 = arith.constant 71 : index
      %c0_151 = arith.constant 0 : index
      %654 = vector.load %arg6[%c71, %c0_151] : memref<128x128xf32, #tpu.memory_space<vmem>>, vector<1x128xf32>
      %655 = vector.shape_cast %654 : vector<1x128xf32> to vector<128xf32>
      %656 = vector.shape_cast %653 : vector<128xf32> to vector<1x128xf32>
      tpu.vector_store %arg6[%c71, %c0_151], %656 {strides = array<i32>} : memref<128x128xf32, #tpu.memory_space<vmem>>, vector<1x128xf32>,
      %c72_i32 = arith.constant 72 : i32
      %657 = arith.addi %8, %c72_i32 : i32
      %658 = arith.index_cast %657 : i32 to index
      %659 = memref.load %arg2[%658] : memref<512xi32, #tpu.memory_space<smem>>
      %660 = arith.index_cast %659 : i32 to index
      %c0_152 = arith.constant 0 : index
      %661 = vector.load %arg3[%660, %c0_152] : memref<1000x128xf32, #tpu.memory_space<vmem>>, vector<1x128xf32>
      %662 = vector.shape_cast %661 : vector<1x128xf32> to vector<128xf32>
      %c72 = arith.constant 72 : index
      %c0_153 = arith.constant 0 : index
      %663 = vector.load %arg6[%c72, %c0_153] : memref<128x128xf32, #tpu.memory_space<vmem>>, vector<1x128xf32>
      %664 = vector.shape_cast %663 : vector<1x128xf32> to vector<128xf32>
      %665 = vector.shape_cast %662 : vector<128xf32> to vector<1x128xf32>
      tpu.vector_store %arg6[%c72, %c0_153], %665 {strides = array<i32>} : memref<128x128xf32, #tpu.memory_space<vmem>>, vector<1x128xf32>,
      %c73_i32 = arith.constant 73 : i32
      %666 = arith.addi %8, %c73_i32 : i32
      %667 = arith.index_cast %666 : i32 to index
      %668 = memref.load %arg2[%667] : memref<512xi32, #tpu.memory_space<smem>>
      %669 = arith.index_cast %668 : i32 to index
      %c0_154 = arith.constant 0 : index
      %670 = vector.load %arg3[%669, %c0_154] : memref<1000x128xf32, #tpu.memory_space<vmem>>, vector<1x128xf32>
      %671 = vector.shape_cast %670 : vector<1x128xf32> to vector<128xf32>
      %c73 = arith.constant 73 : index
      %c0_155 = arith.constant 0 : index
      %672 = vector.load %arg6[%c73, %c0_155] : memref<128x128xf32, #tpu.memory_space<vmem>>, vector<1x128xf32>
      %673 = vector.shape_cast %672 : vector<1x128xf32> to vector<128xf32>
      %674 = vector.shape_cast %671 : vector<128xf32> to vector<1x128xf32>
      tpu.vector_store %arg6[%c73, %c0_155], %674 {strides = array<i32>} : memref<128x128xf32, #tpu.memory_space<vmem>>, vector<1x128xf32>,
      %c74_i32 = arith.constant 74 : i32
      %675 = arith.addi %8, %c74_i32 : i32
      %676 = arith.index_cast %675 : i32 to index
      %677 = memref.load %arg2[%676] : memref<512xi32, #tpu.memory_space<smem>>
      %678 = arith.index_cast %677 : i32 to index
      %c0_156 = arith.constant 0 : index
      %679 = vector.load %arg3[%678, %c0_156] : memref<1000x128xf32, #tpu.memory_space<vmem>>, vector<1x128xf32>
      %680 = vector.shape_cast %679 : vector<1x128xf32> to vector<128xf32>
      %c74 = arith.constant 74 : index
      %c0_157 = arith.constant 0 : index
      %681 = vector.load %arg6[%c74, %c0_157] : memref<128x128xf32, #tpu.memory_space<vmem>>, vector<1x128xf32>
      %682 = vector.shape_cast %681 : vector<1x128xf32> to vector<128xf32>
      %683 = vector.shape_cast %680 : vector<128xf32> to vector<1x128xf32>
      tpu.vector_store %arg6[%c74, %c0_157], %683 {strides = array<i32>} : memref<128x128xf32, #tpu.memory_space<vmem>>, vector<1x128xf32>,
      %c75_i32 = arith.constant 75 : i32
      %684 = arith.addi %8, %c75_i32 : i32
      %685 = arith.index_cast %684 : i32 to index
      %686 = memref.load %arg2[%685] : memref<512xi32, #tpu.memory_space<smem>>
      %687 = arith.index_cast %686 : i32 to index
      %c0_158 = arith.constant 0 : index
      %688 = vector.load %arg3[%687, %c0_158] : memref<1000x128xf32, #tpu.memory_space<vmem>>, vector<1x128xf32>
      %689 = vector.shape_cast %688 : vector<1x128xf32> to vector<128xf32>
      %c75 = arith.constant 75 : index
      %c0_159 = arith.constant 0 : index
      %690 = vector.load %arg6[%c75, %c0_159] : memref<128x128xf32, #tpu.memory_space<vmem>>, vector<1x128xf32>
      %691 = vector.shape_cast %690 : vector<1x128xf32> to vector<128xf32>
      %692 = vector.shape_cast %689 : vector<128xf32> to vector<1x128xf32>
      tpu.vector_store %arg6[%c75, %c0_159], %692 {strides = array<i32>} : memref<128x128xf32, #tpu.memory_space<vmem>>, vector<1x128xf32>,
      %c76_i32 = arith.constant 76 : i32
      %693 = arith.addi %8, %c76_i32 : i32
      %694 = arith.index_cast %693 : i32 to index
      %695 = memref.load %arg2[%694] : memref<512xi32, #tpu.memory_space<smem>>
      %696 = arith.index_cast %695 : i32 to index
      %c0_160 = arith.constant 0 : index
      %697 = vector.load %arg3[%696, %c0_160] : memref<1000x128xf32, #tpu.memory_space<vmem>>, vector<1x128xf32>
      %698 = vector.shape_cast %697 : vector<1x128xf32> to vector<128xf32>
      %c76 = arith.constant 76 : index
      %c0_161 = arith.constant 0 : index
      %699 = vector.load %arg6[%c76, %c0_161] : memref<128x128xf32, #tpu.memory_space<vmem>>, vector<1x128xf32>
      %700 = vector.shape_cast %699 : vector<1x128xf32> to vector<128xf32>
      %701 = vector.shape_cast %698 : vector<128xf32> to vector<1x128xf32>
      tpu.vector_store %arg6[%c76, %c0_161], %701 {strides = array<i32>} : memref<128x128xf32, #tpu.memory_space<vmem>>, vector<1x128xf32>,
      %c77_i32 = arith.constant 77 : i32
      %702 = arith.addi %8, %c77_i32 : i32
      %703 = arith.index_cast %702 : i32 to index
      %704 = memref.load %arg2[%703] : memref<512xi32, #tpu.memory_space<smem>>
      %705 = arith.index_cast %704 : i32 to index
      %c0_162 = arith.constant 0 : index
      %706 = vector.load %arg3[%705, %c0_162] : memref<1000x128xf32, #tpu.memory_space<vmem>>, vector<1x128xf32>
      %707 = vector.shape_cast %706 : vector<1x128xf32> to vector<128xf32>
      %c77 = arith.constant 77 : index
      %c0_163 = arith.constant 0 : index
      %708 = vector.load %arg6[%c77, %c0_163] : memref<128x128xf32, #tpu.memory_space<vmem>>, vector<1x128xf32>
      %709 = vector.shape_cast %708 : vector<1x128xf32> to vector<128xf32>
      %710 = vector.shape_cast %707 : vector<128xf32> to vector<1x128xf32>
      tpu.vector_store %arg6[%c77, %c0_163], %710 {strides = array<i32>} : memref<128x128xf32, #tpu.memory_space<vmem>>, vector<1x128xf32>,
      %c78_i32 = arith.constant 78 : i32
      %711 = arith.addi %8, %c78_i32 : i32
      %712 = arith.index_cast %711 : i32 to index
      %713 = memref.load %arg2[%712] : memref<512xi32, #tpu.memory_space<smem>>
      %714 = arith.index_cast %713 : i32 to index
      %c0_164 = arith.constant 0 : index
      %715 = vector.load %arg3[%714, %c0_164] : memref<1000x128xf32, #tpu.memory_space<vmem>>, vector<1x128xf32>
      %716 = vector.shape_cast %715 : vector<1x128xf32> to vector<128xf32>
      %c78 = arith.constant 78 : index
      %c0_165 = arith.constant 0 : index
      %717 = vector.load %arg6[%c78, %c0_165] : memref<128x128xf32, #tpu.memory_space<vmem>>, vector<1x128xf32>
      %718 = vector.shape_cast %717 : vector<1x128xf32> to vector<128xf32>
      %719 = vector.shape_cast %716 : vector<128xf32> to vector<1x128xf32>
      tpu.vector_store %arg6[%c78, %c0_165], %719 {strides = array<i32>} : memref<128x128xf32, #tpu.memory_space<vmem>>, vector<1x128xf32>,
      %c79_i32 = arith.constant 79 : i32
      %720 = arith.addi %8, %c79_i32 : i32
      %721 = arith.index_cast %720 : i32 to index
      %722 = memref.load %arg2[%721] : memref<512xi32, #tpu.memory_space<smem>>
      %723 = arith.index_cast %722 : i32 to index
      %c0_166 = arith.constant 0 : index
      %724 = vector.load %arg3[%723, %c0_166] : memref<1000x128xf32, #tpu.memory_space<vmem>>, vector<1x128xf32>
      %725 = vector.shape_cast %724 : vector<1x128xf32> to vector<128xf32>
      %c79 = arith.constant 79 : index
      %c0_167 = arith.constant 0 : index
      %726 = vector.load %arg6[%c79, %c0_167] : memref<128x128xf32, #tpu.memory_space<vmem>>, vector<1x128xf32>
      %727 = vector.shape_cast %726 : vector<1x128xf32> to vector<128xf32>
      %728 = vector.shape_cast %725 : vector<128xf32> to vector<1x128xf32>
      tpu.vector_store %arg6[%c79, %c0_167], %728 {strides = array<i32>} : memref<128x128xf32, #tpu.memory_space<vmem>>, vector<1x128xf32>,
      %c80_i32 = arith.constant 80 : i32
      %729 = arith.addi %8, %c80_i32 : i32
      %730 = arith.index_cast %729 : i32 to index
      %731 = memref.load %arg2[%730] : memref<512xi32, #tpu.memory_space<smem>>
      %732 = arith.index_cast %731 : i32 to index
      %c0_168 = arith.constant 0 : index
      %733 = vector.load %arg3[%732, %c0_168] : memref<1000x128xf32, #tpu.memory_space<vmem>>, vector<1x128xf32>
      %734 = vector.shape_cast %733 : vector<1x128xf32> to vector<128xf32>
      %c80 = arith.constant 80 : index
      %c0_169 = arith.constant 0 : index
      %735 = vector.load %arg6[%c80, %c0_169] : memref<128x128xf32, #tpu.memory_space<vmem>>, vector<1x128xf32>
      %736 = vector.shape_cast %735 : vector<1x128xf32> to vector<128xf32>
      %737 = vector.shape_cast %734 : vector<128xf32> to vector<1x128xf32>
      tpu.vector_store %arg6[%c80, %c0_169], %737 {strides = array<i32>} : memref<128x128xf32, #tpu.memory_space<vmem>>, vector<1x128xf32>,
      %c81_i32 = arith.constant 81 : i32
      %738 = arith.addi %8, %c81_i32 : i32
      %739 = arith.index_cast %738 : i32 to index
      %740 = memref.load %arg2[%739] : memref<512xi32, #tpu.memory_space<smem>>
      %741 = arith.index_cast %740 : i32 to index
      %c0_170 = arith.constant 0 : index
      %742 = vector.load %arg3[%741, %c0_170] : memref<1000x128xf32, #tpu.memory_space<vmem>>, vector<1x128xf32>
      %743 = vector.shape_cast %742 : vector<1x128xf32> to vector<128xf32>
      %c81 = arith.constant 81 : index
      %c0_171 = arith.constant 0 : index
      %744 = vector.load %arg6[%c81, %c0_171] : memref<128x128xf32, #tpu.memory_space<vmem>>, vector<1x128xf32>
      %745 = vector.shape_cast %744 : vector<1x128xf32> to vector<128xf32>
      %746 = vector.shape_cast %743 : vector<128xf32> to vector<1x128xf32>
      tpu.vector_store %arg6[%c81, %c0_171], %746 {strides = array<i32>} : memref<128x128xf32, #tpu.memory_space<vmem>>, vector<1x128xf32>,
      %c82_i32 = arith.constant 82 : i32
      %747 = arith.addi %8, %c82_i32 : i32
      %748 = arith.index_cast %747 : i32 to index
      %749 = memref.load %arg2[%748] : memref<512xi32, #tpu.memory_space<smem>>
      %750 = arith.index_cast %749 : i32 to index
      %c0_172 = arith.constant 0 : index
      %751 = vector.load %arg3[%750, %c0_172] : memref<1000x128xf32, #tpu.memory_space<vmem>>, vector<1x128xf32>
      %752 = vector.shape_cast %751 : vector<1x128xf32> to vector<128xf32>
      %c82 = arith.constant 82 : index
      %c0_173 = arith.constant 0 : index
      %753 = vector.load %arg6[%c82, %c0_173] : memref<128x128xf32, #tpu.memory_space<vmem>>, vector<1x128xf32>
      %754 = vector.shape_cast %753 : vector<1x128xf32> to vector<128xf32>
      %755 = vector.shape_cast %752 : vector<128xf32> to vector<1x128xf32>
      tpu.vector_store %arg6[%c82, %c0_173], %755 {strides = array<i32>} : memref<128x128xf32, #tpu.memory_space<vmem>>, vector<1x128xf32>,
      %c83_i32 = arith.constant 83 : i32
      %756 = arith.addi %8, %c83_i32 : i32
      %757 = arith.index_cast %756 : i32 to index
      %758 = memref.load %arg2[%757] : memref<512xi32, #tpu.memory_space<smem>>
      %759 = arith.index_cast %758 : i32 to index
      %c0_174 = arith.constant 0 : index
      %760 = vector.load %arg3[%759, %c0_174] : memref<1000x128xf32, #tpu.memory_space<vmem>>, vector<1x128xf32>
      %761 = vector.shape_cast %760 : vector<1x128xf32> to vector<128xf32>
      %c83 = arith.constant 83 : index
      %c0_175 = arith.constant 0 : index
      %762 = vector.load %arg6[%c83, %c0_175] : memref<128x128xf32, #tpu.memory_space<vmem>>, vector<1x128xf32>
      %763 = vector.shape_cast %762 : vector<1x128xf32> to vector<128xf32>
      %764 = vector.shape_cast %761 : vector<128xf32> to vector<1x128xf32>
      tpu.vector_store %arg6[%c83, %c0_175], %764 {strides = array<i32>} : memref<128x128xf32, #tpu.memory_space<vmem>>, vector<1x128xf32>,
      %c84_i32 = arith.constant 84 : i32
      %765 = arith.addi %8, %c84_i32 : i32
      %766 = arith.index_cast %765 : i32 to index
      %767 = memref.load %arg2[%766] : memref<512xi32, #tpu.memory_space<smem>>
      %768 = arith.index_cast %767 : i32 to index
      %c0_176 = arith.constant 0 : index
      %769 = vector.load %arg3[%768, %c0_176] : memref<1000x128xf32, #tpu.memory_space<vmem>>, vector<1x128xf32>
      %770 = vector.shape_cast %769 : vector<1x128xf32> to vector<128xf32>
      %c84 = arith.constant 84 : index
      %c0_177 = arith.constant 0 : index
      %771 = vector.load %arg6[%c84, %c0_177] : memref<128x128xf32, #tpu.memory_space<vmem>>, vector<1x128xf32>
      %772 = vector.shape_cast %771 : vector<1x128xf32> to vector<128xf32>
      %773 = vector.shape_cast %770 : vector<128xf32> to vector<1x128xf32>
      tpu.vector_store %arg6[%c84, %c0_177], %773 {strides = array<i32>} : memref<128x128xf32, #tpu.memory_space<vmem>>, vector<1x128xf32>,
      %c85_i32 = arith.constant 85 : i32
      %774 = arith.addi %8, %c85_i32 : i32
      %775 = arith.index_cast %774 : i32 to index
      %776 = memref.load %arg2[%775] : memref<512xi32, #tpu.memory_space<smem>>
      %777 = arith.index_cast %776 : i32 to index
      %c0_178 = arith.constant 0 : index
      %778 = vector.load %arg3[%777, %c0_178] : memref<1000x128xf32, #tpu.memory_space<vmem>>, vector<1x128xf32>
      %779 = vector.shape_cast %778 : vector<1x128xf32> to vector<128xf32>
      %c85 = arith.constant 85 : index
      %c0_179 = arith.constant 0 : index
      %780 = vector.load %arg6[%c85, %c0_179] : memref<128x128xf32, #tpu.memory_space<vmem>>, vector<1x128xf32>
      %781 = vector.shape_cast %780 : vector<1x128xf32> to vector<128xf32>
      %782 = vector.shape_cast %779 : vector<128xf32> to vector<1x128xf32>
      tpu.vector_store %arg6[%c85, %c0_179], %782 {strides = array<i32>} : memref<128x128xf32, #tpu.memory_space<vmem>>, vector<1x128xf32>,
      %c86_i32 = arith.constant 86 : i32
      %783 = arith.addi %8, %c86_i32 : i32
      %784 = arith.index_cast %783 : i32 to index
      %785 = memref.load %arg2[%784] : memref<512xi32, #tpu.memory_space<smem>>
      %786 = arith.index_cast %785 : i32 to index
      %c0_180 = arith.constant 0 : index
      %787 = vector.load %arg3[%786, %c0_180] : memref<1000x128xf32, #tpu.memory_space<vmem>>, vector<1x128xf32>
      %788 = vector.shape_cast %787 : vector<1x128xf32> to vector<128xf32>
      %c86 = arith.constant 86 : index
      %c0_181 = arith.constant 0 : index
      %789 = vector.load %arg6[%c86, %c0_181] : memref<128x128xf32, #tpu.memory_space<vmem>>, vector<1x128xf32>
      %790 = vector.shape_cast %789 : vector<1x128xf32> to vector<128xf32>
      %791 = vector.shape_cast %788 : vector<128xf32> to vector<1x128xf32>
      tpu.vector_store %arg6[%c86, %c0_181], %791 {strides = array<i32>} : memref<128x128xf32, #tpu.memory_space<vmem>>, vector<1x128xf32>,
      %c87_i32 = arith.constant 87 : i32
      %792 = arith.addi %8, %c87_i32 : i32
      %793 = arith.index_cast %792 : i32 to index
      %794 = memref.load %arg2[%793] : memref<512xi32, #tpu.memory_space<smem>>
      %795 = arith.index_cast %794 : i32 to index
      %c0_182 = arith.constant 0 : index
      %796 = vector.load %arg3[%795, %c0_182] : memref<1000x128xf32, #tpu.memory_space<vmem>>, vector<1x128xf32>
      %797 = vector.shape_cast %796 : vector<1x128xf32> to vector<128xf32>
      %c87 = arith.constant 87 : index
      %c0_183 = arith.constant 0 : index
      %798 = vector.load %arg6[%c87, %c0_183] : memref<128x128xf32, #tpu.memory_space<vmem>>, vector<1x128xf32>
      %799 = vector.shape_cast %798 : vector<1x128xf32> to vector<128xf32>
      %800 = vector.shape_cast %797 : vector<128xf32> to vector<1x128xf32>
      tpu.vector_store %arg6[%c87, %c0_183], %800 {strides = array<i32>} : memref<128x128xf32, #tpu.memory_space<vmem>>, vector<1x128xf32>,
      %c88_i32 = arith.constant 88 : i32
      %801 = arith.addi %8, %c88_i32 : i32
      %802 = arith.index_cast %801 : i32 to index
      %803 = memref.load %arg2[%802] : memref<512xi32, #tpu.memory_space<smem>>
      %804 = arith.index_cast %803 : i32 to index
      %c0_184 = arith.constant 0 : index
      %805 = vector.load %arg3[%804, %c0_184] : memref<1000x128xf32, #tpu.memory_space<vmem>>, vector<1x128xf32>
      %806 = vector.shape_cast %805 : vector<1x128xf32> to vector<128xf32>
      %c88 = arith.constant 88 : index
      %c0_185 = arith.constant 0 : index
      %807 = vector.load %arg6[%c88, %c0_185] : memref<128x128xf32, #tpu.memory_space<vmem>>, vector<1x128xf32>
      %808 = vector.shape_cast %807 : vector<1x128xf32> to vector<128xf32>
      %809 = vector.shape_cast %806 : vector<128xf32> to vector<1x128xf32>
      tpu.vector_store %arg6[%c88, %c0_185], %809 {strides = array<i32>} : memref<128x128xf32, #tpu.memory_space<vmem>>, vector<1x128xf32>,
      %c89_i32 = arith.constant 89 : i32
      %810 = arith.addi %8, %c89_i32 : i32
      %811 = arith.index_cast %810 : i32 to index
      %812 = memref.load %arg2[%811] : memref<512xi32, #tpu.memory_space<smem>>
      %813 = arith.index_cast %812 : i32 to index
      %c0_186 = arith.constant 0 : index
      %814 = vector.load %arg3[%813, %c0_186] : memref<1000x128xf32, #tpu.memory_space<vmem>>, vector<1x128xf32>
      %815 = vector.shape_cast %814 : vector<1x128xf32> to vector<128xf32>
      %c89 = arith.constant 89 : index
      %c0_187 = arith.constant 0 : index
      %816 = vector.load %arg6[%c89, %c0_187] : memref<128x128xf32, #tpu.memory_space<vmem>>, vector<1x128xf32>
      %817 = vector.shape_cast %816 : vector<1x128xf32> to vector<128xf32>
      %818 = vector.shape_cast %815 : vector<128xf32> to vector<1x128xf32>
      tpu.vector_store %arg6[%c89, %c0_187], %818 {strides = array<i32>} : memref<128x128xf32, #tpu.memory_space<vmem>>, vector<1x128xf32>,
      %c90_i32 = arith.constant 90 : i32
      %819 = arith.addi %8, %c90_i32 : i32
      %820 = arith.index_cast %819 : i32 to index
      %821 = memref.load %arg2[%820] : memref<512xi32, #tpu.memory_space<smem>>
      %822 = arith.index_cast %821 : i32 to index
      %c0_188 = arith.constant 0 : index
      %823 = vector.load %arg3[%822, %c0_188] : memref<1000x128xf32, #tpu.memory_space<vmem>>, vector<1x128xf32>
      %824 = vector.shape_cast %823 : vector<1x128xf32> to vector<128xf32>
      %c90 = arith.constant 90 : index
      %c0_189 = arith.constant 0 : index
      %825 = vector.load %arg6[%c90, %c0_189] : memref<128x128xf32, #tpu.memory_space<vmem>>, vector<1x128xf32>
      %826 = vector.shape_cast %825 : vector<1x128xf32> to vector<128xf32>
      %827 = vector.shape_cast %824 : vector<128xf32> to vector<1x128xf32>
      tpu.vector_store %arg6[%c90, %c0_189], %827 {strides = array<i32>} : memref<128x128xf32, #tpu.memory_space<vmem>>, vector<1x128xf32>,
      %c91_i32 = arith.constant 91 : i32
      %828 = arith.addi %8, %c91_i32 : i32
      %829 = arith.index_cast %828 : i32 to index
      %830 = memref.load %arg2[%829] : memref<512xi32, #tpu.memory_space<smem>>
      %831 = arith.index_cast %830 : i32 to index
      %c0_190 = arith.constant 0 : index
      %832 = vector.load %arg3[%831, %c0_190] : memref<1000x128xf32, #tpu.memory_space<vmem>>, vector<1x128xf32>
      %833 = vector.shape_cast %832 : vector<1x128xf32> to vector<128xf32>
      %c91 = arith.constant 91 : index
      %c0_191 = arith.constant 0 : index
      %834 = vector.load %arg6[%c91, %c0_191] : memref<128x128xf32, #tpu.memory_space<vmem>>, vector<1x128xf32>
      %835 = vector.shape_cast %834 : vector<1x128xf32> to vector<128xf32>
      %836 = vector.shape_cast %833 : vector<128xf32> to vector<1x128xf32>
      tpu.vector_store %arg6[%c91, %c0_191], %836 {strides = array<i32>} : memref<128x128xf32, #tpu.memory_space<vmem>>, vector<1x128xf32>,
      %c92_i32 = arith.constant 92 : i32
      %837 = arith.addi %8, %c92_i32 : i32
      %838 = arith.index_cast %837 : i32 to index
      %839 = memref.load %arg2[%838] : memref<512xi32, #tpu.memory_space<smem>>
      %840 = arith.index_cast %839 : i32 to index
      %c0_192 = arith.constant 0 : index
      %841 = vector.load %arg3[%840, %c0_192] : memref<1000x128xf32, #tpu.memory_space<vmem>>, vector<1x128xf32>
      %842 = vector.shape_cast %841 : vector<1x128xf32> to vector<128xf32>
      %c92 = arith.constant 92 : index
      %c0_193 = arith.constant 0 : index
      %843 = vector.load %arg6[%c92, %c0_193] : memref<128x128xf32, #tpu.memory_space<vmem>>, vector<1x128xf32>
      %844 = vector.shape_cast %843 : vector<1x128xf32> to vector<128xf32>
      %845 = vector.shape_cast %842 : vector<128xf32> to vector<1x128xf32>
      tpu.vector_store %arg6[%c92, %c0_193], %845 {strides = array<i32>} : memref<128x128xf32, #tpu.memory_space<vmem>>, vector<1x128xf32>,
      %c93_i32 = arith.constant 93 : i32
      %846 = arith.addi %8, %c93_i32 : i32
      %847 = arith.index_cast %846 : i32 to index
      %848 = memref.load %arg2[%847] : memref<512xi32, #tpu.memory_space<smem>>
      %849 = arith.index_cast %848 : i32 to index
      %c0_194 = arith.constant 0 : index
      %850 = vector.load %arg3[%849, %c0_194] : memref<1000x128xf32, #tpu.memory_space<vmem>>, vector<1x128xf32>
      %851 = vector.shape_cast %850 : vector<1x128xf32> to vector<128xf32>
      %c93 = arith.constant 93 : index
      %c0_195 = arith.constant 0 : index
      %852 = vector.load %arg6[%c93, %c0_195] : memref<128x128xf32, #tpu.memory_space<vmem>>, vector<1x128xf32>
      %853 = vector.shape_cast %852 : vector<1x128xf32> to vector<128xf32>
      %854 = vector.shape_cast %851 : vector<128xf32> to vector<1x128xf32>
      tpu.vector_store %arg6[%c93, %c0_195], %854 {strides = array<i32>} : memref<128x128xf32, #tpu.memory_space<vmem>>, vector<1x128xf32>,
      %c94_i32 = arith.constant 94 : i32
      %855 = arith.addi %8, %c94_i32 : i32
      %856 = arith.index_cast %855 : i32 to index
      %857 = memref.load %arg2[%856] : memref<512xi32, #tpu.memory_space<smem>>
      %858 = arith.index_cast %857 : i32 to index
      %c0_196 = arith.constant 0 : index
      %859 = vector.load %arg3[%858, %c0_196] : memref<1000x128xf32, #tpu.memory_space<vmem>>, vector<1x128xf32>
      %860 = vector.shape_cast %859 : vector<1x128xf32> to vector<128xf32>
      %c94 = arith.constant 94 : index
      %c0_197 = arith.constant 0 : index
      %861 = vector.load %arg6[%c94, %c0_197] : memref<128x128xf32, #tpu.memory_space<vmem>>, vector<1x128xf32>
      %862 = vector.shape_cast %861 : vector<1x128xf32> to vector<128xf32>
      %863 = vector.shape_cast %860 : vector<128xf32> to vector<1x128xf32>
      tpu.vector_store %arg6[%c94, %c0_197], %863 {strides = array<i32>} : memref<128x128xf32, #tpu.memory_space<vmem>>, vector<1x128xf32>,
      %c95_i32 = arith.constant 95 : i32
      %864 = arith.addi %8, %c95_i32 : i32
      %865 = arith.index_cast %864 : i32 to index
      %866 = memref.load %arg2[%865] : memref<512xi32, #tpu.memory_space<smem>>
      %867 = arith.index_cast %866 : i32 to index
      %c0_198 = arith.constant 0 : index
      %868 = vector.load %arg3[%867, %c0_198] : memref<1000x128xf32, #tpu.memory_space<vmem>>, vector<1x128xf32>
      %869 = vector.shape_cast %868 : vector<1x128xf32> to vector<128xf32>
      %c95 = arith.constant 95 : index
      %c0_199 = arith.constant 0 : index
      %870 = vector.load %arg6[%c95, %c0_199] : memref<128x128xf32, #tpu.memory_space<vmem>>, vector<1x128xf32>
      %871 = vector.shape_cast %870 : vector<1x128xf32> to vector<128xf32>
      %872 = vector.shape_cast %869 : vector<128xf32> to vector<1x128xf32>
      tpu.vector_store %arg6[%c95, %c0_199], %872 {strides = array<i32>} : memref<128x128xf32, #tpu.memory_space<vmem>>, vector<1x128xf32>,
      %c96_i32 = arith.constant 96 : i32
      %873 = arith.addi %8, %c96_i32 : i32
      %874 = arith.index_cast %873 : i32 to index
      %875 = memref.load %arg2[%874] : memref<512xi32, #tpu.memory_space<smem>>
      %876 = arith.index_cast %875 : i32 to index
      %c0_200 = arith.constant 0 : index
      %877 = vector.load %arg3[%876, %c0_200] : memref<1000x128xf32, #tpu.memory_space<vmem>>, vector<1x128xf32>
      %878 = vector.shape_cast %877 : vector<1x128xf32> to vector<128xf32>
      %c96 = arith.constant 96 : index
      %c0_201 = arith.constant 0 : index
      %879 = vector.load %arg6[%c96, %c0_201] : memref<128x128xf32, #tpu.memory_space<vmem>>, vector<1x128xf32>
      %880 = vector.shape_cast %879 : vector<1x128xf32> to vector<128xf32>
      %881 = vector.shape_cast %878 : vector<128xf32> to vector<1x128xf32>
      tpu.vector_store %arg6[%c96, %c0_201], %881 {strides = array<i32>} : memref<128x128xf32, #tpu.memory_space<vmem>>, vector<1x128xf32>,
      %c97_i32 = arith.constant 97 : i32
      %882 = arith.addi %8, %c97_i32 : i32
      %883 = arith.index_cast %882 : i32 to index
      %884 = memref.load %arg2[%883] : memref<512xi32, #tpu.memory_space<smem>>
      %885 = arith.index_cast %884 : i32 to index
      %c0_202 = arith.constant 0 : index
      %886 = vector.load %arg3[%885, %c0_202] : memref<1000x128xf32, #tpu.memory_space<vmem>>, vector<1x128xf32>
      %887 = vector.shape_cast %886 : vector<1x128xf32> to vector<128xf32>
      %c97 = arith.constant 97 : index
      %c0_203 = arith.constant 0 : index
      %888 = vector.load %arg6[%c97, %c0_203] : memref<128x128xf32, #tpu.memory_space<vmem>>, vector<1x128xf32>
      %889 = vector.shape_cast %888 : vector<1x128xf32> to vector<128xf32>
      %890 = vector.shape_cast %887 : vector<128xf32> to vector<1x128xf32>
      tpu.vector_store %arg6[%c97, %c0_203], %890 {strides = array<i32>} : memref<128x128xf32, #tpu.memory_space<vmem>>, vector<1x128xf32>,
      %c98_i32 = arith.constant 98 : i32
      %891 = arith.addi %8, %c98_i32 : i32
      %892 = arith.index_cast %891 : i32 to index
      %893 = memref.load %arg2[%892] : memref<512xi32, #tpu.memory_space<smem>>
      %894 = arith.index_cast %893 : i32 to index
      %c0_204 = arith.constant 0 : index
      %895 = vector.load %arg3[%894, %c0_204] : memref<1000x128xf32, #tpu.memory_space<vmem>>, vector<1x128xf32>
      %896 = vector.shape_cast %895 : vector<1x128xf32> to vector<128xf32>
      %c98 = arith.constant 98 : index
      %c0_205 = arith.constant 0 : index
      %897 = vector.load %arg6[%c98, %c0_205] : memref<128x128xf32, #tpu.memory_space<vmem>>, vector<1x128xf32>
      %898 = vector.shape_cast %897 : vector<1x128xf32> to vector<128xf32>
      %899 = vector.shape_cast %896 : vector<128xf32> to vector<1x128xf32>
      tpu.vector_store %arg6[%c98, %c0_205], %899 {strides = array<i32>} : memref<128x128xf32, #tpu.memory_space<vmem>>, vector<1x128xf32>,
      %c99_i32 = arith.constant 99 : i32
      %900 = arith.addi %8, %c99_i32 : i32
      %901 = arith.index_cast %900 : i32 to index
      %902 = memref.load %arg2[%901] : memref<512xi32, #tpu.memory_space<smem>>
      %903 = arith.index_cast %902 : i32 to index
      %c0_206 = arith.constant 0 : index
      %904 = vector.load %arg3[%903, %c0_206] : memref<1000x128xf32, #tpu.memory_space<vmem>>, vector<1x128xf32>
      %905 = vector.shape_cast %904 : vector<1x128xf32> to vector<128xf32>
      %c99 = arith.constant 99 : index
      %c0_207 = arith.constant 0 : index
      %906 = vector.load %arg6[%c99, %c0_207] : memref<128x128xf32, #tpu.memory_space<vmem>>, vector<1x128xf32>
      %907 = vector.shape_cast %906 : vector<1x128xf32> to vector<128xf32>
      %908 = vector.shape_cast %905 : vector<128xf32> to vector<1x128xf32>
      tpu.vector_store %arg6[%c99, %c0_207], %908 {strides = array<i32>} : memref<128x128xf32, #tpu.memory_space<vmem>>, vector<1x128xf32>,
      %c100_i32 = arith.constant 100 : i32
      %909 = arith.addi %8, %c100_i32 : i32
      %910 = arith.index_cast %909 : i32 to index
      %911 = memref.load %arg2[%910] : memref<512xi32, #tpu.memory_space<smem>>
      %912 = arith.index_cast %911 : i32 to index
      %c0_208 = arith.constant 0 : index
      %913 = vector.load %arg3[%912, %c0_208] : memref<1000x128xf32, #tpu.memory_space<vmem>>, vector<1x128xf32>
      %914 = vector.shape_cast %913 : vector<1x128xf32> to vector<128xf32>
      %c100 = arith.constant 100 : index
      %c0_209 = arith.constant 0 : index
      %915 = vector.load %arg6[%c100, %c0_209] : memref<128x128xf32, #tpu.memory_space<vmem>>, vector<1x128xf32>
      %916 = vector.shape_cast %915 : vector<1x128xf32> to vector<128xf32>
      %917 = vector.shape_cast %914 : vector<128xf32> to vector<1x128xf32>
      tpu.vector_store %arg6[%c100, %c0_209], %917 {strides = array<i32>} : memref<128x128xf32, #tpu.memory_space<vmem>>, vector<1x128xf32>,
      %c101_i32 = arith.constant 101 : i32
      %918 = arith.addi %8, %c101_i32 : i32
      %919 = arith.index_cast %918 : i32 to index
      %920 = memref.load %arg2[%919] : memref<512xi32, #tpu.memory_space<smem>>
      %921 = arith.index_cast %920 : i32 to index
      %c0_210 = arith.constant 0 : index
      %922 = vector.load %arg3[%921, %c0_210] : memref<1000x128xf32, #tpu.memory_space<vmem>>, vector<1x128xf32>
      %923 = vector.shape_cast %922 : vector<1x128xf32> to vector<128xf32>
      %c101 = arith.constant 101 : index
      %c0_211 = arith.constant 0 : index
      %924 = vector.load %arg6[%c101, %c0_211] : memref<128x128xf32, #tpu.memory_space<vmem>>, vector<1x128xf32>
      %925 = vector.shape_cast %924 : vector<1x128xf32> to vector<128xf32>
      %926 = vector.shape_cast %923 : vector<128xf32> to vector<1x128xf32>
      tpu.vector_store %arg6[%c101, %c0_211], %926 {strides = array<i32>} : memref<128x128xf32, #tpu.memory_space<vmem>>, vector<1x128xf32>,
      %c102_i32 = arith.constant 102 : i32
      %927 = arith.addi %8, %c102_i32 : i32
      %928 = arith.index_cast %927 : i32 to index
      %929 = memref.load %arg2[%928] : memref<512xi32, #tpu.memory_space<smem>>
      %930 = arith.index_cast %929 : i32 to index
      %c0_212 = arith.constant 0 : index
      %931 = vector.load %arg3[%930, %c0_212] : memref<1000x128xf32, #tpu.memory_space<vmem>>, vector<1x128xf32>
      %932 = vector.shape_cast %931 : vector<1x128xf32> to vector<128xf32>
      %c102 = arith.constant 102 : index
      %c0_213 = arith.constant 0 : index
      %933 = vector.load %arg6[%c102, %c0_213] : memref<128x128xf32, #tpu.memory_space<vmem>>, vector<1x128xf32>
      %934 = vector.shape_cast %933 : vector<1x128xf32> to vector<128xf32>
      %935 = vector.shape_cast %932 : vector<128xf32> to vector<1x128xf32>
      tpu.vector_store %arg6[%c102, %c0_213], %935 {strides = array<i32>} : memref<128x128xf32, #tpu.memory_space<vmem>>, vector<1x128xf32>,
      %c103_i32 = arith.constant 103 : i32
      %936 = arith.addi %8, %c103_i32 : i32
      %937 = arith.index_cast %936 : i32 to index
      %938 = memref.load %arg2[%937] : memref<512xi32, #tpu.memory_space<smem>>
      %939 = arith.index_cast %938 : i32 to index
      %c0_214 = arith.constant 0 : index
      %940 = vector.load %arg3[%939, %c0_214] : memref<1000x128xf32, #tpu.memory_space<vmem>>, vector<1x128xf32>
      %941 = vector.shape_cast %940 : vector<1x128xf32> to vector<128xf32>
      %c103 = arith.constant 103 : index
      %c0_215 = arith.constant 0 : index
      %942 = vector.load %arg6[%c103, %c0_215] : memref<128x128xf32, #tpu.memory_space<vmem>>, vector<1x128xf32>
      %943 = vector.shape_cast %942 : vector<1x128xf32> to vector<128xf32>
      %944 = vector.shape_cast %941 : vector<128xf32> to vector<1x128xf32>
      tpu.vector_store %arg6[%c103, %c0_215], %944 {strides = array<i32>} : memref<128x128xf32, #tpu.memory_space<vmem>>, vector<1x128xf32>,
      %c104_i32 = arith.constant 104 : i32
      %945 = arith.addi %8, %c104_i32 : i32
      %946 = arith.index_cast %945 : i32 to index
      %947 = memref.load %arg2[%946] : memref<512xi32, #tpu.memory_space<smem>>
      %948 = arith.index_cast %947 : i32 to index
      %c0_216 = arith.constant 0 : index
      %949 = vector.load %arg3[%948, %c0_216] : memref<1000x128xf32, #tpu.memory_space<vmem>>, vector<1x128xf32>
      %950 = vector.shape_cast %949 : vector<1x128xf32> to vector<128xf32>
      %c104 = arith.constant 104 : index
      %c0_217 = arith.constant 0 : index
      %951 = vector.load %arg6[%c104, %c0_217] : memref<128x128xf32, #tpu.memory_space<vmem>>, vector<1x128xf32>
      %952 = vector.shape_cast %951 : vector<1x128xf32> to vector<128xf32>
      %953 = vector.shape_cast %950 : vector<128xf32> to vector<1x128xf32>
      tpu.vector_store %arg6[%c104, %c0_217], %953 {strides = array<i32>} : memref<128x128xf32, #tpu.memory_space<vmem>>, vector<1x128xf32>,
      %c105_i32 = arith.constant 105 : i32
      %954 = arith.addi %8, %c105_i32 : i32
      %955 = arith.index_cast %954 : i32 to index
      %956 = memref.load %arg2[%955] : memref<512xi32, #tpu.memory_space<smem>>
      %957 = arith.index_cast %956 : i32 to index
      %c0_218 = arith.constant 0 : index
      %958 = vector.load %arg3[%957, %c0_218] : memref<1000x128xf32, #tpu.memory_space<vmem>>, vector<1x128xf32>
      %959 = vector.shape_cast %958 : vector<1x128xf32> to vector<128xf32>
      %c105 = arith.constant 105 : index
      %c0_219 = arith.constant 0 : index
      %960 = vector.load %arg6[%c105, %c0_219] : memref<128x128xf32, #tpu.memory_space<vmem>>, vector<1x128xf32>
      %961 = vector.shape_cast %960 : vector<1x128xf32> to vector<128xf32>
      %962 = vector.shape_cast %959 : vector<128xf32> to vector<1x128xf32>
      tpu.vector_store %arg6[%c105, %c0_219], %962 {strides = array<i32>} : memref<128x128xf32, #tpu.memory_space<vmem>>, vector<1x128xf32>,
      %c106_i32 = arith.constant 106 : i32
      %963 = arith.addi %8, %c106_i32 : i32
      %964 = arith.index_cast %963 : i32 to index
      %965 = memref.load %arg2[%964] : memref<512xi32, #tpu.memory_space<smem>>
      %966 = arith.index_cast %965 : i32 to index
      %c0_220 = arith.constant 0 : index
      %967 = vector.load %arg3[%966, %c0_220] : memref<1000x128xf32, #tpu.memory_space<vmem>>, vector<1x128xf32>
      %968 = vector.shape_cast %967 : vector<1x128xf32> to vector<128xf32>
      %c106 = arith.constant 106 : index
      %c0_221 = arith.constant 0 : index
      %969 = vector.load %arg6[%c106, %c0_221] : memref<128x128xf32, #tpu.memory_space<vmem>>, vector<1x128xf32>
      %970 = vector.shape_cast %969 : vector<1x128xf32> to vector<128xf32>
      %971 = vector.shape_cast %968 : vector<128xf32> to vector<1x128xf32>
      tpu.vector_store %arg6[%c106, %c0_221], %971 {strides = array<i32>} : memref<128x128xf32, #tpu.memory_space<vmem>>, vector<1x128xf32>,
      %c107_i32 = arith.constant 107 : i32
      %972 = arith.addi %8, %c107_i32 : i32
      %973 = arith.index_cast %972 : i32 to index
      %974 = memref.load %arg2[%973] : memref<512xi32, #tpu.memory_space<smem>>
      %975 = arith.index_cast %974 : i32 to index
      %c0_222 = arith.constant 0 : index
      %976 = vector.load %arg3[%975, %c0_222] : memref<1000x128xf32, #tpu.memory_space<vmem>>, vector<1x128xf32>
      %977 = vector.shape_cast %976 : vector<1x128xf32> to vector<128xf32>
      %c107 = arith.constant 107 : index
      %c0_223 = arith.constant 0 : index
      %978 = vector.load %arg6[%c107, %c0_223] : memref<128x128xf32, #tpu.memory_space<vmem>>, vector<1x128xf32>
      %979 = vector.shape_cast %978 : vector<1x128xf32> to vector<128xf32>
      %980 = vector.shape_cast %977 : vector<128xf32> to vector<1x128xf32>
      tpu.vector_store %arg6[%c107, %c0_223], %980 {strides = array<i32>} : memref<128x128xf32, #tpu.memory_space<vmem>>, vector<1x128xf32>,
      %c108_i32 = arith.constant 108 : i32
      %981 = arith.addi %8, %c108_i32 : i32
      %982 = arith.index_cast %981 : i32 to index
      %983 = memref.load %arg2[%982] : memref<512xi32, #tpu.memory_space<smem>>
      %984 = arith.index_cast %983 : i32 to index
      %c0_224 = arith.constant 0 : index
      %985 = vector.load %arg3[%984, %c0_224] : memref<1000x128xf32, #tpu.memory_space<vmem>>, vector<1x128xf32>
      %986 = vector.shape_cast %985 : vector<1x128xf32> to vector<128xf32>
      %c108 = arith.constant 108 : index
      %c0_225 = arith.constant 0 : index
      %987 = vector.load %arg6[%c108, %c0_225] : memref<128x128xf32, #tpu.memory_space<vmem>>, vector<1x128xf32>
      %988 = vector.shape_cast %987 : vector<1x128xf32> to vector<128xf32>
      %989 = vector.shape_cast %986 : vector<128xf32> to vector<1x128xf32>
      tpu.vector_store %arg6[%c108, %c0_225], %989 {strides = array<i32>} : memref<128x128xf32, #tpu.memory_space<vmem>>, vector<1x128xf32>,
      %c109_i32 = arith.constant 109 : i32
      %990 = arith.addi %8, %c109_i32 : i32
      %991 = arith.index_cast %990 : i32 to index
      %992 = memref.load %arg2[%991] : memref<512xi32, #tpu.memory_space<smem>>
      %993 = arith.index_cast %992 : i32 to index
      %c0_226 = arith.constant 0 : index
      %994 = vector.load %arg3[%993, %c0_226] : memref<1000x128xf32, #tpu.memory_space<vmem>>, vector<1x128xf32>
      %995 = vector.shape_cast %994 : vector<1x128xf32> to vector<128xf32>
      %c109 = arith.constant 109 : index
      %c0_227 = arith.constant 0 : index
      %996 = vector.load %arg6[%c109, %c0_227] : memref<128x128xf32, #tpu.memory_space<vmem>>, vector<1x128xf32>
      %997 = vector.shape_cast %996 : vector<1x128xf32> to vector<128xf32>
      %998 = vector.shape_cast %995 : vector<128xf32> to vector<1x128xf32>
      tpu.vector_store %arg6[%c109, %c0_227], %998 {strides = array<i32>} : memref<128x128xf32, #tpu.memory_space<vmem>>, vector<1x128xf32>,
      %c110_i32 = arith.constant 110 : i32
      %999 = arith.addi %8, %c110_i32 : i32
      %1000 = arith.index_cast %999 : i32 to index
      %1001 = memref.load %arg2[%1000] : memref<512xi32, #tpu.memory_space<smem>>
      %1002 = arith.index_cast %1001 : i32 to index
      %c0_228 = arith.constant 0 : index
      %1003 = vector.load %arg3[%1002, %c0_228] : memref<1000x128xf32, #tpu.memory_space<vmem>>, vector<1x128xf32>
      %1004 = vector.shape_cast %1003 : vector<1x128xf32> to vector<128xf32>
      %c110 = arith.constant 110 : index
      %c0_229 = arith.constant 0 : index
      %1005 = vector.load %arg6[%c110, %c0_229] : memref<128x128xf32, #tpu.memory_space<vmem>>, vector<1x128xf32>
      %1006 = vector.shape_cast %1005 : vector<1x128xf32> to vector<128xf32>
      %1007 = vector.shape_cast %1004 : vector<128xf32> to vector<1x128xf32>
      tpu.vector_store %arg6[%c110, %c0_229], %1007 {strides = array<i32>} : memref<128x128xf32, #tpu.memory_space<vmem>>, vector<1x128xf32>,
      %c111_i32 = arith.constant 111 : i32
      %1008 = arith.addi %8, %c111_i32 : i32
      %1009 = arith.index_cast %1008 : i32 to index
      %1010 = memref.load %arg2[%1009] : memref<512xi32, #tpu.memory_space<smem>>
      %1011 = arith.index_cast %1010 : i32 to index
      %c0_230 = arith.constant 0 : index
      %1012 = vector.load %arg3[%1011, %c0_230] : memref<1000x128xf32, #tpu.memory_space<vmem>>, vector<1x128xf32>
      %1013 = vector.shape_cast %1012 : vector<1x128xf32> to vector<128xf32>
      %c111 = arith.constant 111 : index
      %c0_231 = arith.constant 0 : index
      %1014 = vector.load %arg6[%c111, %c0_231] : memref<128x128xf32, #tpu.memory_space<vmem>>, vector<1x128xf32>
      %1015 = vector.shape_cast %1014 : vector<1x128xf32> to vector<128xf32>
      %1016 = vector.shape_cast %1013 : vector<128xf32> to vector<1x128xf32>
      tpu.vector_store %arg6[%c111, %c0_231], %1016 {strides = array<i32>} : memref<128x128xf32, #tpu.memory_space<vmem>>, vector<1x128xf32>,
      %c112_i32 = arith.constant 112 : i32
      %1017 = arith.addi %8, %c112_i32 : i32
      %1018 = arith.index_cast %1017 : i32 to index
      %1019 = memref.load %arg2[%1018] : memref<512xi32, #tpu.memory_space<smem>>
      %1020 = arith.index_cast %1019 : i32 to index
      %c0_232 = arith.constant 0 : index
      %1021 = vector.load %arg3[%1020, %c0_232] : memref<1000x128xf32, #tpu.memory_space<vmem>>, vector<1x128xf32>
      %1022 = vector.shape_cast %1021 : vector<1x128xf32> to vector<128xf32>
      %c112 = arith.constant 112 : index
      %c0_233 = arith.constant 0 : index
      %1023 = vector.load %arg6[%c112, %c0_233] : memref<128x128xf32, #tpu.memory_space<vmem>>, vector<1x128xf32>
      %1024 = vector.shape_cast %1023 : vector<1x128xf32> to vector<128xf32>
      %1025 = vector.shape_cast %1022 : vector<128xf32> to vector<1x128xf32>
      tpu.vector_store %arg6[%c112, %c0_233], %1025 {strides = array<i32>} : memref<128x128xf32, #tpu.memory_space<vmem>>, vector<1x128xf32>,
      %c113_i32 = arith.constant 113 : i32
      %1026 = arith.addi %8, %c113_i32 : i32
      %1027 = arith.index_cast %1026 : i32 to index
      %1028 = memref.load %arg2[%1027] : memref<512xi32, #tpu.memory_space<smem>>
      %1029 = arith.index_cast %1028 : i32 to index
      %c0_234 = arith.constant 0 : index
      %1030 = vector.load %arg3[%1029, %c0_234] : memref<1000x128xf32, #tpu.memory_space<vmem>>, vector<1x128xf32>
      %1031 = vector.shape_cast %1030 : vector<1x128xf32> to vector<128xf32>
      %c113 = arith.constant 113 : index
      %c0_235 = arith.constant 0 : index
      %1032 = vector.load %arg6[%c113, %c0_235] : memref<128x128xf32, #tpu.memory_space<vmem>>, vector<1x128xf32>
      %1033 = vector.shape_cast %1032 : vector<1x128xf32> to vector<128xf32>
      %1034 = vector.shape_cast %1031 : vector<128xf32> to vector<1x128xf32>
      tpu.vector_store %arg6[%c113, %c0_235], %1034 {strides = array<i32>} : memref<128x128xf32, #tpu.memory_space<vmem>>, vector<1x128xf32>,
      %c114_i32 = arith.constant 114 : i32
      %1035 = arith.addi %8, %c114_i32 : i32
      %1036 = arith.index_cast %1035 : i32 to index
      %1037 = memref.load %arg2[%1036] : memref<512xi32, #tpu.memory_space<smem>>
      %1038 = arith.index_cast %1037 : i32 to index
      %c0_236 = arith.constant 0 : index
      %1039 = vector.load %arg3[%1038, %c0_236] : memref<1000x128xf32, #tpu.memory_space<vmem>>, vector<1x128xf32>
      %1040 = vector.shape_cast %1039 : vector<1x128xf32> to vector<128xf32>
      %c114 = arith.constant 114 : index
      %c0_237 = arith.constant 0 : index
      %1041 = vector.load %arg6[%c114, %c0_237] : memref<128x128xf32, #tpu.memory_space<vmem>>, vector<1x128xf32>
      %1042 = vector.shape_cast %1041 : vector<1x128xf32> to vector<128xf32>
      %1043 = vector.shape_cast %1040 : vector<128xf32> to vector<1x128xf32>
      tpu.vector_store %arg6[%c114, %c0_237], %1043 {strides = array<i32>} : memref<128x128xf32, #tpu.memory_space<vmem>>, vector<1x128xf32>,
      %c115_i32 = arith.constant 115 : i32
      %1044 = arith.addi %8, %c115_i32 : i32
      %1045 = arith.index_cast %1044 : i32 to index
      %1046 = memref.load %arg2[%1045] : memref<512xi32, #tpu.memory_space<smem>>
      %1047 = arith.index_cast %1046 : i32 to index
      %c0_238 = arith.constant 0 : index
      %1048 = vector.load %arg3[%1047, %c0_238] : memref<1000x128xf32, #tpu.memory_space<vmem>>, vector<1x128xf32>
      %1049 = vector.shape_cast %1048 : vector<1x128xf32> to vector<128xf32>
      %c115 = arith.constant 115 : index
      %c0_239 = arith.constant 0 : index
      %1050 = vector.load %arg6[%c115, %c0_239] : memref<128x128xf32, #tpu.memory_space<vmem>>, vector<1x128xf32>
      %1051 = vector.shape_cast %1050 : vector<1x128xf32> to vector<128xf32>
      %1052 = vector.shape_cast %1049 : vector<128xf32> to vector<1x128xf32>
      tpu.vector_store %arg6[%c115, %c0_239], %1052 {strides = array<i32>} : memref<128x128xf32, #tpu.memory_space<vmem>>, vector<1x128xf32>,
      %c116_i32 = arith.constant 116 : i32
      %1053 = arith.addi %8, %c116_i32 : i32
      %1054 = arith.index_cast %1053 : i32 to index
      %1055 = memref.load %arg2[%1054] : memref<512xi32, #tpu.memory_space<smem>>
      %1056 = arith.index_cast %1055 : i32 to index
      %c0_240 = arith.constant 0 : index
      %1057 = vector.load %arg3[%1056, %c0_240] : memref<1000x128xf32, #tpu.memory_space<vmem>>, vector<1x128xf32>
      %1058 = vector.shape_cast %1057 : vector<1x128xf32> to vector<128xf32>
      %c116 = arith.constant 116 : index
      %c0_241 = arith.constant 0 : index
      %1059 = vector.load %arg6[%c116, %c0_241] : memref<128x128xf32, #tpu.memory_space<vmem>>, vector<1x128xf32>
      %1060 = vector.shape_cast %1059 : vector<1x128xf32> to vector<128xf32>
      %1061 = vector.shape_cast %1058 : vector<128xf32> to vector<1x128xf32>
      tpu.vector_store %arg6[%c116, %c0_241], %1061 {strides = array<i32>} : memref<128x128xf32, #tpu.memory_space<vmem>>, vector<1x128xf32>,
      %c117_i32 = arith.constant 117 : i32
      %1062 = arith.addi %8, %c117_i32 : i32
      %1063 = arith.index_cast %1062 : i32 to index
      %1064 = memref.load %arg2[%1063] : memref<512xi32, #tpu.memory_space<smem>>
      %1065 = arith.index_cast %1064 : i32 to index
      %c0_242 = arith.constant 0 : index
      %1066 = vector.load %arg3[%1065, %c0_242] : memref<1000x128xf32, #tpu.memory_space<vmem>>, vector<1x128xf32>
      %1067 = vector.shape_cast %1066 : vector<1x128xf32> to vector<128xf32>
      %c117 = arith.constant 117 : index
      %c0_243 = arith.constant 0 : index
      %1068 = vector.load %arg6[%c117, %c0_243] : memref<128x128xf32, #tpu.memory_space<vmem>>, vector<1x128xf32>
      %1069 = vector.shape_cast %1068 : vector<1x128xf32> to vector<128xf32>
      %1070 = vector.shape_cast %1067 : vector<128xf32> to vector<1x128xf32>
      tpu.vector_store %arg6[%c117, %c0_243], %1070 {strides = array<i32>} : memref<128x128xf32, #tpu.memory_space<vmem>>, vector<1x128xf32>,
      %c118_i32 = arith.constant 118 : i32
      %1071 = arith.addi %8, %c118_i32 : i32
      %1072 = arith.index_cast %1071 : i32 to index
      %1073 = memref.load %arg2[%1072] : memref<512xi32, #tpu.memory_space<smem>>
      %1074 = arith.index_cast %1073 : i32 to index
      %c0_244 = arith.constant 0 : index
      %1075 = vector.load %arg3[%1074, %c0_244] : memref<1000x128xf32, #tpu.memory_space<vmem>>, vector<1x128xf32>
      %1076 = vector.shape_cast %1075 : vector<1x128xf32> to vector<128xf32>
      %c118 = arith.constant 118 : index
      %c0_245 = arith.constant 0 : index
      %1077 = vector.load %arg6[%c118, %c0_245] : memref<128x128xf32, #tpu.memory_space<vmem>>, vector<1x128xf32>
      %1078 = vector.shape_cast %1077 : vector<1x128xf32> to vector<128xf32>
      %1079 = vector.shape_cast %1076 : vector<128xf32> to vector<1x128xf32>
      tpu.vector_store %arg6[%c118, %c0_245], %1079 {strides = array<i32>} : memref<128x128xf32, #tpu.memory_space<vmem>>, vector<1x128xf32>,
      %c119_i32 = arith.constant 119 : i32
      %1080 = arith.addi %8, %c119_i32 : i32
      %1081 = arith.index_cast %1080 : i32 to index
      %1082 = memref.load %arg2[%1081] : memref<512xi32, #tpu.memory_space<smem>>
      %1083 = arith.index_cast %1082 : i32 to index
      %c0_246 = arith.constant 0 : index
      %1084 = vector.load %arg3[%1083, %c0_246] : memref<1000x128xf32, #tpu.memory_space<vmem>>, vector<1x128xf32>
      %1085 = vector.shape_cast %1084 : vector<1x128xf32> to vector<128xf32>
      %c119 = arith.constant 119 : index
      %c0_247 = arith.constant 0 : index
      %1086 = vector.load %arg6[%c119, %c0_247] : memref<128x128xf32, #tpu.memory_space<vmem>>, vector<1x128xf32>
      %1087 = vector.shape_cast %1086 : vector<1x128xf32> to vector<128xf32>
      %1088 = vector.shape_cast %1085 : vector<128xf32> to vector<1x128xf32>
      tpu.vector_store %arg6[%c119, %c0_247], %1088 {strides = array<i32>} : memref<128x128xf32, #tpu.memory_space<vmem>>, vector<1x128xf32>,
      %c120_i32 = arith.constant 120 : i32
      %1089 = arith.addi %8, %c120_i32 : i32
      %1090 = arith.index_cast %1089 : i32 to index
      %1091 = memref.load %arg2[%1090] : memref<512xi32, #tpu.memory_space<smem>>
      %1092 = arith.index_cast %1091 : i32 to index
      %c0_248 = arith.constant 0 : index
      %1093 = vector.load %arg3[%1092, %c0_248] : memref<1000x128xf32, #tpu.memory_space<vmem>>, vector<1x128xf32>
      %1094 = vector.shape_cast %1093 : vector<1x128xf32> to vector<128xf32>
      %c120 = arith.constant 120 : index
      %c0_249 = arith.constant 0 : index
      %1095 = vector.load %arg6[%c120, %c0_249] : memref<128x128xf32, #tpu.memory_space<vmem>>, vector<1x128xf32>
      %1096 = vector.shape_cast %1095 : vector<1x128xf32> to vector<128xf32>
      %1097 = vector.shape_cast %1094 : vector<128xf32> to vector<1x128xf32>
      tpu.vector_store %arg6[%c120, %c0_249], %1097 {strides = array<i32>} : memref<128x128xf32, #tpu.memory_space<vmem>>, vector<1x128xf32>,
      %c121_i32 = arith.constant 121 : i32
      %1098 = arith.addi %8, %c121_i32 : i32
      %1099 = arith.index_cast %1098 : i32 to index
      %1100 = memref.load %arg2[%1099] : memref<512xi32, #tpu.memory_space<smem>>
      %1101 = arith.index_cast %1100 : i32 to index
      %c0_250 = arith.constant 0 : index
      %1102 = vector.load %arg3[%1101, %c0_250] : memref<1000x128xf32, #tpu.memory_space<vmem>>, vector<1x128xf32>
      %1103 = vector.shape_cast %1102 : vector<1x128xf32> to vector<128xf32>
      %c121 = arith.constant 121 : index
      %c0_251 = arith.constant 0 : index
      %1104 = vector.load %arg6[%c121, %c0_251] : memref<128x128xf32, #tpu.memory_space<vmem>>, vector<1x128xf32>
      %1105 = vector.shape_cast %1104 : vector<1x128xf32> to vector<128xf32>
      %1106 = vector.shape_cast %1103 : vector<128xf32> to vector<1x128xf32>
      tpu.vector_store %arg6[%c121, %c0_251], %1106 {strides = array<i32>} : memref<128x128xf32, #tpu.memory_space<vmem>>, vector<1x128xf32>,
      %c122_i32 = arith.constant 122 : i32
      %1107 = arith.addi %8, %c122_i32 : i32
      %1108 = arith.index_cast %1107 : i32 to index
      %1109 = memref.load %arg2[%1108] : memref<512xi32, #tpu.memory_space<smem>>
      %1110 = arith.index_cast %1109 : i32 to index
      %c0_252 = arith.constant 0 : index
      %1111 = vector.load %arg3[%1110, %c0_252] : memref<1000x128xf32, #tpu.memory_space<vmem>>, vector<1x128xf32>
      %1112 = vector.shape_cast %1111 : vector<1x128xf32> to vector<128xf32>
      %c122 = arith.constant 122 : index
      %c0_253 = arith.constant 0 : index
      %1113 = vector.load %arg6[%c122, %c0_253] : memref<128x128xf32, #tpu.memory_space<vmem>>, vector<1x128xf32>
      %1114 = vector.shape_cast %1113 : vector<1x128xf32> to vector<128xf32>
      %1115 = vector.shape_cast %1112 : vector<128xf32> to vector<1x128xf32>
      tpu.vector_store %arg6[%c122, %c0_253], %1115 {strides = array<i32>} : memref<128x128xf32, #tpu.memory_space<vmem>>, vector<1x128xf32>,
      %c123_i32 = arith.constant 123 : i32
      %1116 = arith.addi %8, %c123_i32 : i32
      %1117 = arith.index_cast %1116 : i32 to index
      %1118 = memref.load %arg2[%1117] : memref<512xi32, #tpu.memory_space<smem>>
      %1119 = arith.index_cast %1118 : i32 to index
      %c0_254 = arith.constant 0 : index
      %1120 = vector.load %arg3[%1119, %c0_254] : memref<1000x128xf32, #tpu.memory_space<vmem>>, vector<1x128xf32>
      %1121 = vector.shape_cast %1120 : vector<1x128xf32> to vector<128xf32>
      %c123 = arith.constant 123 : index
      %c0_255 = arith.constant 0 : index
      %1122 = vector.load %arg6[%c123, %c0_255] : memref<128x128xf32, #tpu.memory_space<vmem>>, vector<1x128xf32>
      %1123 = vector.shape_cast %1122 : vector<1x128xf32> to vector<128xf32>
      %1124 = vector.shape_cast %1121 : vector<128xf32> to vector<1x128xf32>
      tpu.vector_store %arg6[%c123, %c0_255], %1124 {strides = array<i32>} : memref<128x128xf32, #tpu.memory_space<vmem>>, vector<1x128xf32>,
      %c124_i32 = arith.constant 124 : i32
      %1125 = arith.addi %8, %c124_i32 : i32
      %1126 = arith.index_cast %1125 : i32 to index
      %1127 = memref.load %arg2[%1126] : memref<512xi32, #tpu.memory_space<smem>>
      %1128 = arith.index_cast %1127 : i32 to index
      %c0_256 = arith.constant 0 : index
      %1129 = vector.load %arg3[%1128, %c0_256] : memref<1000x128xf32, #tpu.memory_space<vmem>>, vector<1x128xf32>
      %1130 = vector.shape_cast %1129 : vector<1x128xf32> to vector<128xf32>
      %c124 = arith.constant 124 : index
      %c0_257 = arith.constant 0 : index
      %1131 = vector.load %arg6[%c124, %c0_257] : memref<128x128xf32, #tpu.memory_space<vmem>>, vector<1x128xf32>
      %1132 = vector.shape_cast %1131 : vector<1x128xf32> to vector<128xf32>
      %1133 = vector.shape_cast %1130 : vector<128xf32> to vector<1x128xf32>
      tpu.vector_store %arg6[%c124, %c0_257], %1133 {strides = array<i32>} : memref<128x128xf32, #tpu.memory_space<vmem>>, vector<1x128xf32>,
      %c125_i32 = arith.constant 125 : i32
      %1134 = arith.addi %8, %c125_i32 : i32
      %1135 = arith.index_cast %1134 : i32 to index
      %1136 = memref.load %arg2[%1135] : memref<512xi32, #tpu.memory_space<smem>>
      %1137 = arith.index_cast %1136 : i32 to index
      %c0_258 = arith.constant 0 : index
      %1138 = vector.load %arg3[%1137, %c0_258] : memref<1000x128xf32, #tpu.memory_space<vmem>>, vector<1x128xf32>
      %1139 = vector.shape_cast %1138 : vector<1x128xf32> to vector<128xf32>
      %c125 = arith.constant 125 : index
      %c0_259 = arith.constant 0 : index
      %1140 = vector.load %arg6[%c125, %c0_259] : memref<128x128xf32, #tpu.memory_space<vmem>>, vector<1x128xf32>
      %1141 = vector.shape_cast %1140 : vector<1x128xf32> to vector<128xf32>
      %1142 = vector.shape_cast %1139 : vector<128xf32> to vector<1x128xf32>
      tpu.vector_store %arg6[%c125, %c0_259], %1142 {strides = array<i32>} : memref<128x128xf32, #tpu.memory_space<vmem>>, vector<1x128xf32>,
      %c126_i32 = arith.constant 126 : i32
      %1143 = arith.addi %8, %c126_i32 : i32
      %1144 = arith.index_cast %1143 : i32 to index
      %1145 = memref.load %arg2[%1144] : memref<512xi32, #tpu.memory_space<smem>>
      %1146 = arith.index_cast %1145 : i32 to index
      %c0_260 = arith.constant 0 : index
      %1147 = vector.load %arg3[%1146, %c0_260] : memref<1000x128xf32, #tpu.memory_space<vmem>>, vector<1x128xf32>
      %1148 = vector.shape_cast %1147 : vector<1x128xf32> to vector<128xf32>
      %c126 = arith.constant 126 : index
      %c0_261 = arith.constant 0 : index
      %1149 = vector.load %arg6[%c126, %c0_261] : memref<128x128xf32, #tpu.memory_space<vmem>>, vector<1x128xf32>
      %1150 = vector.shape_cast %1149 : vector<1x128xf32> to vector<128xf32>
      %1151 = vector.shape_cast %1148 : vector<128xf32> to vector<1x128xf32>
      tpu.vector_store %arg6[%c126, %c0_261], %1151 {strides = array<i32>} : memref<128x128xf32, #tpu.memory_space<vmem>>, vector<1x128xf32>,
      %c127_i32 = arith.constant 127 : i32
      %1152 = arith.addi %8, %c127_i32 : i32
      %1153 = arith.index_cast %1152 : i32 to index
      %1154 = memref.load %arg2[%1153] : memref<512xi32, #tpu.memory_space<smem>>
      %1155 = arith.index_cast %1154 : i32 to index
      %c0_262 = arith.constant 0 : index
      %1156 = vector.load %arg3[%1155, %c0_262] : memref<1000x128xf32, #tpu.memory_space<vmem>>, vector<1x128xf32>
      %1157 = vector.shape_cast %1156 : vector<1x128xf32> to vector<128xf32>
      %c127 = arith.constant 127 : index
      %c0_263 = arith.constant 0 : index
      %1158 = vector.load %arg6[%c127, %c0_263] : memref<128x128xf32, #tpu.memory_space<vmem>>, vector<1x128xf32>
      %1159 = vector.shape_cast %1158 : vector<1x128xf32> to vector<128xf32>
      %1160 = vector.shape_cast %1157 : vector<128xf32> to vector<1x128xf32>
      tpu.vector_store %arg6[%c127, %c0_263], %1160 {strides = array<i32>} : memref<128x128xf32, #tpu.memory_space<vmem>>, vector<1x128xf32>,
    } else {
    }
    %c0 = arith.constant 0 : index
    %c0_1 = arith.constant 0 : index
    %3 = vector.load %arg6[%c0, %c0_1] : memref<128x128xf32, #tpu.memory_space<vmem>>, vector<128x128xf32>
    %4 = arith.truncf %3 : vector<128x128xf32> to vector<128x128xbf16>
    %c0_2 = arith.constant 0 : index
    %c0_3 = arith.constant 0 : index
    %5 = vector.load %arg4[%c0_2, %c0_3] : memref<512x128xbf16, #tpu.memory_space<vmem>>, vector<512x128xbf16>
    %cst = arith.constant dense<0.000000e+00> : vector<128x512xf32>
    %6 = tpu.matmul %4, %5, %cst {dimension_numbers = #tpu.dot_dimension_numbers<[1], [1], [0], [0], [0, 0, 1, 0], [], []>} : vector<128x128xbf16>, vector<512x128xbf16>, vector<128x512xf32> -> vector<128x512xf32>
    %c0_4 = arith.constant 0 : index
    %c0_5 = arith.constant 0 : index
    %7 = vector.load %arg5[%c0_4, %c0_5] : memref<128x512xf32, #tpu.memory_space<vmem>>, vector<128x512xf32>
    tpu.vector_store %arg5[%c0_4, %c0_5], %6 {strides = array<i32>} : memref<128x512xf32, #tpu.memory_space<vmem>>, vector<128x512xf32>,
    return
  }
  func.func @transform_0(%arg0: i32, %arg1: i32, %arg2: memref<512xi32, #tpu.memory_space<smem>>) -> (i32, i32) {
    %c0_i32 = arith.constant 0 : i32
    %c0_i32_0 = arith.constant 0 : i32
    %c0_i32_1 = arith.constant 0 : i32
    return %c0_i32, %c0_i32_0 : i32, i32
  }
  func.func @transform_1(%arg0: i32, %arg1: i32, %arg2: memref<512xi32, #tpu.memory_space<smem>>) -> (i32, i32) {
    %c0_i32 = arith.constant 0 : i32
    %c0_i32_0 = arith.constant 0 : i32
    return %arg1, %c0_i32 : i32, i32
  }
  func.func @transform_2(%arg0: i32, %arg1: i32, %arg2: memref<512xi32, #tpu.memory_space<smem>>) -> (i32, i32) {
    %c0_i32 = arith.constant 0 : i32
    return %arg0, %arg1 : i32, i32
  }
}

</mosaic_0001>

<bundles_post_ra>
// kernel: word2vec_forward.1
= control target key start
LH: loop header
LB: loop body
LE: loop exit
PB: predicated region body
PF: predicated region fallthrough
CT: control target
= control target key end

     0   :  { %s2081_s15 = smov [#allocation4]   ;;  %s2583_s0 = inlined_call_operand.vmem [shape: s32[512], index: 0, kind: input, shape index: {}]   ;;  %s2584_s1 = inlined_call_operand.hbm [shape: f32[1000,128], index: 1, kind: input, shape index: {}]   ;;  %s2585_s2 = inlined_call_operand.vmem [shape: bf16[1024,128], index: 2, kind: input, shape index: {}]   ;;  %s2586_s3 = inlined_call_operand.vmem [shape: f32[512,1024], index: 3, kind: output, shape index: {}]  }
   0x1   :  { %2587 = sst [smem:[#allocation10_spill]] %s2584_s1  ;;  %s9_s14 = sshll.u32 %s2583_s0, 4  ;;  %s10_s14 = int_to_ptr.vmem [resolvable:$true] %s9_s14 }
   0x2   :  { %2588 = sst [smem:[#allocation11_spill]] %s2585_s2 }
   0x3   :  { %12 = dma.vmem_to_smem %s10_s14, 64, %s2081_s15, [#allocation3] }
   0x4   :  { %2047 = dma.done.wait [#allocation3], 64 }
   0x5   :  { %2048 = vsyncadd [#allocation3], 4294967232 }
   0x6   :  { %15 = sfence }
   0x7   :  { %16 = vsyncpa [#allocation6], 0  ;;  %s2108_s16 = smov 0   ;;  %s2110_s17 = smov 0  }
   0x8   :  { %s2112_s18 = smov 0   ;;  %s2114_s19 = smov 0  }
   0x9   :  { %s2116_s20 = smov 0   ;;  %s2118_s21 = smov 0  }
   0xa   :  { %s2120_s0 = smov 0  }
   0xb LB: > { %s1727_s22 = sadd.s32 4294967295, %s2079_s0   ;;  %s31_s23 = sadd.s32 1, %s2071_s20  ;;  %s2079_s0 = sphi %s2120_s0, %s22_s0   ;;  %s2075_s21 = sphi %s2118_s21, %s2599_s21   ;;  %s2071_s20 = sphi %s2116_s20, %s2598_s20   ;;  %s2067_s19 = sphi %s2114_s19, %s2597_s19   ;;  %s2063_s18 = sphi %s2112_s18, %s2596_s18   ;;  %s2059_s17 = sphi %s2110_s17, %s2595_s17   ;;  %s2055_s16 = sphi %s2108_s16, %s2594_s16  }
   0xc   : > { %p32_p0 = scmp.ge.s32.totalorder %s31_s23, 2  ;;  %s34_s24 = sadd.s32 1, %s2075_s21 }
   0xd   : > { %s90_s25 = sadd.s32 1, %s2059_s17  ;;  %p100_p1 = scmp.ne.s32.totalorder %s2059_s17, %s2055_s16 }
   0xe   : > { %s2601_s23 = smov (%p32_p0, %s31_s23), 0  ;;  %s2603_s24 = smov (!%p32_p0, %s34_s24), %s2075_s21 }
   0xf   : > { %s86_s26 = ssub.s32 %s2071_s20, %s2601_s23  ;;  %p101_p2 = scmp.eq.s32.totalorder %s1727_s22, 7 }
  0x10   : > { %p36_p3 = scmp.ge.s32.totalorder %s2603_s24, 4  ;;  %p1729_p4 = scmp.ge.s32.totalorder %s2079_s0, 1 }
  0x11   : > { %p2155_p5 = por %p101_p2, %p100_p1  ;;  %p114_p6 = scmp.lt.s32.totalorder %s2079_s0, 9 }
  0x12   : > { %s2605_s24 = smov (%p36_p3, %s2603_s24), 0  ;;  %p2168_p8 = scmp.eq.s32.totalorder %s1727_s22, 0 }
  0x13   : > { %p2162_p7 = pnand %p1729_p4, %p114_p6  ;;  %s85_s29 = ssub.s32 %s2075_s21, %s2605_s24 }
  0x14   : > { %s87_s4 = sor.u32 %s86_s26, %s85_s29  ;;  %s2592_s1 = sld [smem:[#allocation10_spill]] }
  0x15   : > { %p1911_p9 = pneg %p2162_p7  ;;  %p88_p10 = scmp.eq.s32.totalorder %s87_s4, 0 }
  0x16   : > { %s2082_s9 = smov [#allocation5]   ;;  %s2083_s11 = smov 128  }
  0x17   : > { %s2178_s8 = scalar_select %p88_p10, %s2059_s17, %s90_s25  }
  0x18   : > { %s127_s10 = sshll.u32 %s2082_s9, 4  ;;  %p1912_p11 = pnand %p2168_p8, %p1911_p9  ;;  %s128_s10 = int_to_ptr.vmem [resolvable:$true] %s127_s10 }
  0x19   : > { %s2084_s12 = smov 8   ;;  %152 = sbr.rel (%p2162_p7) target bundleno = 563 (0x233), region = 28 }
  0x1a   : > { %s125_s7 = sshll.u32 %s2592_s1, 4  ;;  %s126_s7 = int_to_ptr.hbm [resolvable:$true] %s125_s7 }
  0x1b   : > { %1914 = dma.hbm_to_vmem [thread:$0]  (!%p1912_p11), %s126_s7, 16000, %s128_s10, [#allocation6], %s2083_s11, %s2083_s11, %s2084_s12  }
  0x1e   : > { %2050 = dma.done.wait (%p2168_p8), [#allocation6], 16000  }
  0x1f   : > { %2052 = vsyncadd (%p2168_p8), [#allocation6], 4294951296  ;;  %s171_s13 = sand.u32 1, %s2055_s16   ;;  %s1735_s14 = sshll.u32 %s2063_s18, 6 }
  0x20   : > { %s1734_s15 = sshll.u32 %s171_s13, 9  ;;  %p175_p12 = scmp.lt.s32.totalorder %s1735_s14, 127 }
  0x21   : > { %s2593_s2 = sld [smem:[#allocation11_spill]]  ;;  %s2195_s28 = scalar_lea.vmem [#allocation7], %s1734_s15 }
  0x22   : > { %s2607_s14 = smov (!%p175_p12, %s1735_s14), 127  ;;  %p1737_p13 = scmp.ne.s32.totalorder %s2063_s18, 0 }
  0x23   : > { %s1736_s22 = sshll.u32 %s2607_s14, 2  ;;  %s2199_s30 = sshll.u32 (!%p1737_p13), %s2067_s19, 7 }
  0x24   : > { %185 = sbr.rel (%p1737_p13) target bundleno = 235 (0xeb), region = 36  ;;  %s187_s16 = sld [smem:[#allocation4 + %s2199_s30]] (!%p1737_p13) }
  0x25   : > { %s191_s4 = sadd.s32 (!%p1737_p13), 1, %s2199_s30  ;;  %s196_s6 = sadd.s32 (!%p1737_p13), 2, %s2199_s30 }
  0x26   : > { %s192_s5 = sld [smem:[#allocation4 + %s191_s4]] (!%p1737_p13)  ;;  %s201_s9 = sadd.s32 (!%p1737_p13), 3, %s2199_s30 }
  0x27   : > { %s2193_s29 = scalar_lea.vmem %s2593_s2, %s1736_s22  ;;  %s197_s7 = sld [smem:[#allocation4 + %s196_s6]] (!%p1737_p13) }
  0x28   : > { %s202_s10 = sld [smem:[#allocation4 + %s201_s9]] (!%p1737_p13)  ;;  %s206_s11 = sadd.s32 (!%p1737_p13), 4, %s2199_s30 }
  0x29   : > { %s207_s12 = sld [smem:[#allocation4 + %s206_s11]]  ;;  %s211_s13 = sadd.s32 5, %s2199_s30 }
  0x2a   : > { %s212_s14 = sld [smem:[#allocation4 + %s211_s13]]  ;;  %s216_s15 = sadd.s32 6, %s2199_s30 }
  0x2b   : > { %s217_s22 = sld [smem:[#allocation4 + %s216_s15]]  ;;  %s188_s25 = scalar_lea.vmem [#allocation5], %s187_s16 }
  0x2c   : > { %v189_v0 = vld [vmem:[%s188_s25] sm:$0x1]  ;;  %s221_s26 = sadd.s32 7, %s2199_s30  ;;  %s193_s1 = scalar_lea.vmem [#allocation5], %s192_s5 }
  0x2d   : > { %190 = vst [vmem:[#allocation2] sm:$0x1] %v189_v0  ;;  %v194_v1 = vld [vmem:[%s193_s1] sm:$0x1]  ;;  %s222_s2 = sld [smem:[#allocation4 + %s221_s26]]  ;;  %s198_s4 = scalar_lea.vmem [#allocation5], %s197_s7 }
  0x2e   : > { %195 = vst [vmem:[#allocation2 + $0x1] sm:$0x1] %v194_v1  ;;  %v199_v2 = vld [vmem:[%s198_s4] sm:$0x1]  ;;  %s226_s6 = sadd.s32 8, %s2199_s30  ;;  %s203_s9 = scalar_lea.vmem [#allocation5], %s202_s10 }
  0x2f   : > { %200 = vst [vmem:[#allocation2 + $0x2] sm:$0x1] %v199_v2  ;;  %v204_v3 = vld [vmem:[%s203_s9] sm:$0x1]  ;;  %s227_s11 = sld [smem:[#allocation4 + %s226_s6]]  ;;  %s208_s13 = scalar_lea.vmem [#allocation5], %s207_s12 }
  0x30   : > { %205 = vst [vmem:[#allocation2 + $0x3] sm:$0x1] %v204_v3  ;;  %v209_v4 = vld [vmem:[%s208_s13] sm:$0x1]  ;;  %s231_s16 = sadd.s32 9, %s2199_s30  ;;  %s213_s15 = scalar_lea.vmem [#allocation5], %s212_s14 }
  0x31   : > { %210 = vst [vmem:[#allocation2 + $0x4] sm:$0x1] %v209_v4  ;;  %v214_v5 = vld [vmem:[%s213_s15] sm:$0x1]  ;;  %s232_s1 = sld [smem:[#allocation4 + %s231_s16]]  ;;  %s218_s5 = scalar_lea.vmem [#allocation5], %s217_s22 }
  0x32   : > { %215 = vst [vmem:[#allocation2 + $0x5] sm:$0x1] %v214_v5  ;;  %v219_v6 = vld [vmem:[%s218_s5] sm:$0x1]  ;;  %s236_s7 = sadd.s32 10, %s2199_s30  ;;  %s241_s25 = sadd.s32 11, %s2199_s30 }
  0x33   : > { %220 = vst [vmem:[#allocation2 + $0x6] sm:$0x1] %v219_v6  ;;  %s237_s10 = sld [smem:[#allocation4 + %s236_s7]]  ;;  %s223_s26 = scalar_lea.vmem [#allocation5], %s222_s2 }
  0x34   : > { %v224_v7 = vld [vmem:[%s223_s26] sm:$0x1]  ;;  %s242_s12 = sld [smem:[#allocation4 + %s241_s25]]  ;;  %s246_s4 = sadd.s32 12, %s2199_s30 }
  0x35   : > { %225 = vst [vmem:[#allocation2 + $0x7] sm:$0x1] %v224_v7  ;;  %s247_s6 = sld [smem:[#allocation4 + %s246_s4]]  ;;  %s228_s14 = scalar_lea.vmem [#allocation5], %s227_s11 }
  0x36   : > { %v229_v8 = vld [vmem:[%s228_s14] sm:$0x1]  ;;  %s251_s9 = sadd.s32 13, %s2199_s30  ;;  %s256_s13 = sadd.s32 14, %s2199_s30 }
  0x37   : > { %230 = vst [vmem:[#allocation2 + $0x8] sm:$0x1] %v229_v8  ;;  %s252_s16 = sld [smem:[#allocation4 + %s251_s9]]  ;;  %s233_s22 = scalar_lea.vmem [#allocation5], %s232_s1 }
  0x38   : > { %v234_v9 = vld [vmem:[%s233_s22] sm:$0x1]  ;;  %s257_s15 = sld [smem:[#allocation4 + %s256_s13]]  ;;  %s261_s5 = sadd.s32 15, %s2199_s30 }
  0x39   : > { %235 = vst [vmem:[#allocation2 + $0x9] sm:$0x1] %v234_v9  ;;  %s262_s2 = sld [smem:[#allocation4 + %s261_s5]]  ;;  %s238_s7 = scalar_lea.vmem [#allocation5], %s237_s10 }
  0x3a   : > { %v239_v10 = vld [vmem:[%s238_s7] sm:$0x1]  ;;  %s266_s25 = sadd.s32 16, %s2199_s30  ;;  %s243_s26 = scalar_lea.vmem [#allocation5], %s242_s12 }
  0x3b   : > { %240 = vst [vmem:[#allocation2 + $0xa] sm:$0x1] %v239_v10  ;;  %v244_v11 = vld [vmem:[%s243_s26] sm:$0x1]  ;;  %s267_s11 = sld [smem:[#allocation4 + %s266_s25]]  ;;  %s248_s4 = scalar_lea.vmem [#allocation5], %s247_s6 }
  0x3c   : > { %245 = vst [vmem:[#allocation2 + $0xb] sm:$0x1] %v244_v11  ;;  %v249_v12 = vld [vmem:[%s248_s4] sm:$0x1]  ;;  %s271_s1 = sadd.s32 17, %s2199_s30  ;;  %s276_s14 = sadd.s32 18, %s2199_s30 }
  0x3d   : > { %250 = vst [vmem:[#allocation2 + $0xc] sm:$0x1] %v249_v12  ;;  %s272_s9 = sld [smem:[#allocation4 + %s271_s1]]  ;;  %s253_s13 = scalar_lea.vmem [#allocation5], %s252_s16 }
  0x3e   : > { %v254_v13 = vld [vmem:[%s253_s13] sm:$0x1]  ;;  %s277_s10 = sld [smem:[#allocation4 + %s276_s14]]  ;;  %s258_s22 = scalar_lea.vmem [#allocation5], %s257_s15 }
  0x3f   : > { %255 = vst [vmem:[#allocation2 + $0xd] sm:$0x1] %v254_v13  ;;  %v259_v14 = vld [vmem:[%s258_s22] sm:$0x1]  ;;  %s281_s12 = sadd.s32 19, %s2199_s30  ;;  %s263_s5 = scalar_lea.vmem [#allocation5], %s262_s2 }
  0x40   : > { %260 = vst [vmem:[#allocation2 + $0xe] sm:$0x1] %v259_v14  ;;  %v264_v15 = vld [vmem:[%s263_s5] sm:$0x1]  ;;  %s282_s7 = sld [smem:[#allocation4 + %s281_s12]]  ;;  %s286_s6 = sadd.s32 20, %s2199_s30 }
  0x41   : > { %265 = vst [vmem:[#allocation2 + $0xf] sm:$0x1] %v264_v15  ;;  %s287_s25 = sld [smem:[#allocation4 + %s286_s6]]  ;;  %s268_s26 = scalar_lea.vmem [#allocation5], %s267_s11 }
  0x42   : > { %v269_v16 = vld [vmem:[%s268_s26] sm:$0x1]  ;;  %s291_s16 = sadd.s32 21, %s2199_s30  ;;  %s296_s4 = sadd.s32 22, %s2199_s30 }
  0x43   : > { %270 = vst [vmem:[#allocation2 + $0x10] sm:$0x1] %v269_v16  ;;  %s292_s1 = sld [smem:[#allocation4 + %s291_s16]]  ;;  %s273_s14 = scalar_lea.vmem [#allocation5], %s272_s9 }
  0x44   : > { %v274_v17 = vld [vmem:[%s273_s14] sm:$0x1]  ;;  %s297_s15 = sld [smem:[#allocation4 + %s296_s4]]  ;;  %s278_s2 = scalar_lea.vmem [#allocation5], %s277_s10 }
  0x45   : > { %275 = vst [vmem:[#allocation2 + $0x11] sm:$0x1] %v274_v17  ;;  %v279_v18 = vld [vmem:[%s278_s2] sm:$0x1]  ;;  %s301_s13 = sadd.s32 23, %s2199_s30  ;;  %s306_s22 = sadd.s32 24, %s2199_s30 }
  0x46   : > { %280 = vst [vmem:[#allocation2 + $0x12] sm:$0x1] %v279_v18  ;;  %s302_s12 = sld [smem:[#allocation4 + %s301_s13]]  ;;  %s283_s5 = scalar_lea.vmem [#allocation5], %s282_s7 }
  0x47   : > { %v284_v19 = vld [vmem:[%s283_s5] sm:$0x1]  ;;  %s307_s11 = sld [smem:[#allocation4 + %s306_s22]]  ;;  %s288_s6 = scalar_lea.vmem [#allocation5], %s287_s25 }
  0x48   : > { %285 = vst [vmem:[#allocation2 + $0x13] sm:$0x1] %v284_v19  ;;  %v289_v20 = vld [vmem:[%s288_s6] sm:$0x1]  ;;  %s311_s9 = sadd.s32 25, %s2199_s30  ;;  %s316_s26 = sadd.s32 26, %s2199_s30 }
  0x49   : > { %290 = vst [vmem:[#allocation2 + $0x14] sm:$0x1] %v289_v20  ;;  %s312_s16 = sld [smem:[#allocation4 + %s311_s9]]  ;;  %s293_s4 = scalar_lea.vmem [#allocation5], %s292_s1 }
  0x4a   : > { %v294_v21 = vld [vmem:[%s293_s4] sm:$0x1]  ;;  %s317_s10 = sld [smem:[#allocation4 + %s316_s26]]  ;;  %s298_s14 = scalar_lea.vmem [#allocation5], %s297_s15 }
  0x4b   : > { %295 = vst [vmem:[#allocation2 + $0x15] sm:$0x1] %v294_v21  ;;  %v299_v22 = vld [vmem:[%s298_s14] sm:$0x1]  ;;  %s321_s7 = sadd.s32 27, %s2199_s30  ;;  %s326_s2 = sadd.s32 28, %s2199_s30 }
  0x4c   : > { %300 = vst [vmem:[#allocation2 + $0x16] sm:$0x1] %v299_v22  ;;  %s322_s13 = sld [smem:[#allocation4 + %s321_s7]]  ;;  %s303_s22 = scalar_lea.vmem [#allocation5], %s302_s12 }
  0x4d   : > { %v304_v23 = vld [vmem:[%s303_s22] sm:$0x1]  ;;  %s327_s25 = sld [smem:[#allocation4 + %s326_s2]]  ;;  %s308_s5 = scalar_lea.vmem [#allocation5], %s307_s11 }
  0x4e   : > { %305 = vst [vmem:[#allocation2 + $0x17] sm:$0x1] %v304_v23  ;;  %v309_v24 = vld [vmem:[%s308_s5] sm:$0x1]  ;;  %s331_s1 = sadd.s32 29, %s2199_s30  ;;  %s336_s6 = sadd.s32 30, %s2199_s30 }
  0x4f   : > { %310 = vst [vmem:[#allocation2 + $0x18] sm:$0x1] %v309_v24  ;;  %s332_s9 = sld [smem:[#allocation4 + %s331_s1]]  ;;  %s313_s26 = scalar_lea.vmem [#allocation5], %s312_s16 }
  0x50   : > { %v314_v25 = vld [vmem:[%s313_s26] sm:$0x1]  ;;  %s337_s15 = sld [smem:[#allocation4 + %s336_s6]]  ;;  %s318_s4 = scalar_lea.vmem [#allocation5], %s317_s10 }
  0x51   : > { %315 = vst [vmem:[#allocation2 + $0x19] sm:$0x1] %v314_v25  ;;  %v319_v26 = vld [vmem:[%s318_s4] sm:$0x1]  ;;  %s341_s12 = sadd.s32 31, %s2199_s30  ;;  %s346_s14 = sadd.s32 32, %s2199_s30 }
  0x52   : > { %320 = vst [vmem:[#allocation2 + $0x1a] sm:$0x1] %v319_v26  ;;  %s342_s7 = sld [smem:[#allocation4 + %s341_s12]]  ;;  %s323_s2 = scalar_lea.vmem [#allocation5], %s322_s13 }
  0x53   : > { %v324_v27 = vld [vmem:[%s323_s2] sm:$0x1]  ;;  %s347_s11 = sld [smem:[#allocation4 + %s346_s14]]  ;;  %s328_s22 = scalar_lea.vmem [#allocation5], %s327_s25 }
  0x54   : > { %325 = vst [vmem:[#allocation2 + $0x1b] sm:$0x1] %v324_v27  ;;  %v329_v28 = vld [vmem:[%s328_s22] sm:$0x1]  ;;  %s351_s16 = sadd.s32 33, %s2199_s30  ;;  %s356_s5 = sadd.s32 34, %s2199_s30 }
  0x55   : > { %330 = vst [vmem:[#allocation2 + $0x1c] sm:$0x1] %v329_v28  ;;  %s352_s1 = sld [smem:[#allocation4 + %s351_s16]]  ;;  %s333_s6 = scalar_lea.vmem [#allocation5], %s332_s9 }
  0x56   : > { %v334_v29 = vld [vmem:[%s333_s6] sm:$0x1]  ;;  %s357_s10 = sld [smem:[#allocation4 + %s356_s5]]  ;;  %s338_s26 = scalar_lea.vmem [#allocation5], %s337_s15 }
  0x57   : > { %335 = vst [vmem:[#allocation2 + $0x1d] sm:$0x1] %v334_v29  ;;  %v339_v30 = vld [vmem:[%s338_s26] sm:$0x1]  ;;  %s361_s13 = sadd.s32 35, %s2199_s30  ;;  %s366_s4 = sadd.s32 36, %s2199_s30 }
  0x58   : > { %340 = vst [vmem:[#allocation2 + $0x1e] sm:$0x1] %v339_v30  ;;  %s362_s12 = sld [smem:[#allocation4 + %s361_s13]]  ;;  %s343_s14 = scalar_lea.vmem [#allocation5], %s342_s7 }
  0x59   : > { %v344_v31 = vld [vmem:[%s343_s14] sm:$0x1]  ;;  %s367_s25 = sld [smem:[#allocation4 + %s366_s4]]  ;;  %s348_s2 = scalar_lea.vmem [#allocation5], %s347_s11 }
  0x5a   : > { %345 = vst [vmem:[#allocation2 + $0x1f] sm:$0x1] %v344_v31  ;;  %v349_v32 = vld [vmem:[%s348_s2] sm:$0x1]  ;;  %s371_s9 = sadd.s32 37, %s2199_s30  ;;  %s376_s22 = sadd.s32 38, %s2199_s30 }
  0x5b   : > { %350 = vst [vmem:[#allocation2 + $0x20] sm:$0x1] %v349_v32  ;;  %s372_s16 = sld [smem:[#allocation4 + %s371_s9]]  ;;  %s353_s5 = scalar_lea.vmem [#allocation5], %s352_s1 }
  0x5c   : > { %v354_v33 = vld [vmem:[%s353_s5] sm:$0x1]  ;;  %s377_s15 = sld [smem:[#allocation4 + %s376_s22]]  ;;  %s358_s6 = scalar_lea.vmem [#allocation5], %s357_s10 }
  0x5d   : > { %355 = vst [vmem:[#allocation2 + $0x21] sm:$0x1] %v354_v33  ;;  %v359_v34 = vld [vmem:[%s358_s6] sm:$0x1]  ;;  %s381_s7 = sadd.s32 39, %s2199_s30  ;;  %s386_s26 = sadd.s32 40, %s2199_s30 }
  0x5e   : > { %360 = vst [vmem:[#allocation2 + $0x22] sm:$0x1] %v359_v34  ;;  %s382_s13 = sld [smem:[#allocation4 + %s381_s7]]  ;;  %s363_s4 = scalar_lea.vmem [#allocation5], %s362_s12 }
  0x5f   : > { %v364_v35 = vld [vmem:[%s363_s4] sm:$0x1]  ;;  %s387_s11 = sld [smem:[#allocation4 + %s386_s26]]  ;;  %s368_s14 = scalar_lea.vmem [#allocation5], %s367_s25 }
  0x60   : > { %365 = vst [vmem:[#allocation2 + $0x23] sm:$0x1] %v364_v35  ;;  %v369_v36 = vld [vmem:[%s368_s14] sm:$0x1]  ;;  %s391_s1 = sadd.s32 41, %s2199_s30  ;;  %s396_s2 = sadd.s32 42, %s2199_s30 }
  0x61   : > { %370 = vst [vmem:[#allocation2 + $0x24] sm:$0x1] %v369_v36  ;;  %s392_s9 = sld [smem:[#allocation4 + %s391_s1]]  ;;  %s373_s22 = scalar_lea.vmem [#allocation5], %s372_s16 }
  0x62   : > { %v374_v37 = vld [vmem:[%s373_s22] sm:$0x1]  ;;  %s397_s10 = sld [smem:[#allocation4 + %s396_s2]]  ;;  %s378_s5 = scalar_lea.vmem [#allocation5], %s377_s15 }
  0x63   : > { %375 = vst [vmem:[#allocation2 + $0x25] sm:$0x1] %v374_v37  ;;  %v379_v38 = vld [vmem:[%s378_s5] sm:$0x1]  ;;  %s401_s12 = sadd.s32 43, %s2199_s30  ;;  %s406_s6 = sadd.s32 44, %s2199_s30 }
  0x64   : > { %380 = vst [vmem:[#allocation2 + $0x26] sm:$0x1] %v379_v38  ;;  %s402_s7 = sld [smem:[#allocation4 + %s401_s12]]  ;;  %s383_s26 = scalar_lea.vmem [#allocation5], %s382_s13 }
  0x65   : > { %v384_v39 = vld [vmem:[%s383_s26] sm:$0x1]  ;;  %s407_s25 = sld [smem:[#allocation4 + %s406_s6]]  ;;  %s388_s4 = scalar_lea.vmem [#allocation5], %s387_s11 }
  0x66   : > { %385 = vst [vmem:[#allocation2 + $0x27] sm:$0x1] %v384_v39  ;;  %v389_v40 = vld [vmem:[%s388_s4] sm:$0x1]  ;;  %s411_s16 = sadd.s32 45, %s2199_s30  ;;  %s416_s14 = sadd.s32 46, %s2199_s30 }
  0x67   : > { %390 = vst [vmem:[#allocation2 + $0x28] sm:$0x1] %v389_v40  ;;  %s412_s1 = sld [smem:[#allocation4 + %s411_s16]]  ;;  %s393_s2 = scalar_lea.vmem [#allocation5], %s392_s9 }
  0x68   : > { %v394_v41 = vld [vmem:[%s393_s2] sm:$0x1]  ;;  %s417_s15 = sld [smem:[#allocation4 + %s416_s14]]  ;;  %s398_s22 = scalar_lea.vmem [#allocation5], %s397_s10 }
  0x69   : > { %395 = vst [vmem:[#allocation2 + $0x29] sm:$0x1] %v394_v41  ;;  %v399_v42 = vld [vmem:[%s398_s22] sm:$0x1]  ;;  %s421_s13 = sadd.s32 47, %s2199_s30  ;;  %s426_s5 = sadd.s32 48, %s2199_s30 }
  0x6a   : > { %400 = vst [vmem:[#allocation2 + $0x2a] sm:$0x1] %v399_v42  ;;  %s422_s12 = sld [smem:[#allocation4 + %s421_s13]]  ;;  %s403_s6 = scalar_lea.vmem [#allocation5], %s402_s7 }
  0x6b   : > { %v404_v43 = vld [vmem:[%s403_s6] sm:$0x1]  ;;  %s427_s11 = sld [smem:[#allocation4 + %s426_s5]]  ;;  %s408_s26 = scalar_lea.vmem [#allocation5], %s407_s25 }
  0x6c   : > { %405 = vst [vmem:[#allocation2 + $0x2b] sm:$0x1] %v404_v43  ;;  %v409_v44 = vld [vmem:[%s408_s26] sm:$0x1]  ;;  %s431_s9 = sadd.s32 49, %s2199_s30  ;;  %s436_s4 = sadd.s32 50, %s2199_s30 }
  0x6d   : > { %410 = vst [vmem:[#allocation2 + $0x2c] sm:$0x1] %v409_v44  ;;  %s432_s16 = sld [smem:[#allocation4 + %s431_s9]]  ;;  %s413_s14 = scalar_lea.vmem [#allocation5], %s412_s1 }
  0x6e   : > { %v414_v45 = vld [vmem:[%s413_s14] sm:$0x1]  ;;  %s437_s10 = sld [smem:[#allocation4 + %s436_s4]]  ;;  %s418_s2 = scalar_lea.vmem [#allocation5], %s417_s15 }
  0x6f   : > { %415 = vst [vmem:[#allocation2 + $0x2d] sm:$0x1] %v414_v45  ;;  %v419_v46 = vld [vmem:[%s418_s2] sm:$0x1]  ;;  %s441_s7 = sadd.s32 51, %s2199_s30  ;;  %s446_s22 = sadd.s32 52, %s2199_s30 }
  0x70   : > { %420 = vst [vmem:[#allocation2 + $0x2e] sm:$0x1] %v419_v46  ;;  %s442_s13 = sld [smem:[#allocation4 + %s441_s7]]  ;;  %s423_s5 = scalar_lea.vmem [#allocation5], %s422_s12 }
  0x71   : > { %v424_v47 = vld [vmem:[%s423_s5] sm:$0x1]  ;;  %s447_s25 = sld [smem:[#allocation4 + %s446_s22]]  ;;  %s428_s6 = scalar_lea.vmem [#allocation5], %s427_s11 }
  0x72   : > { %425 = vst [vmem:[#allocation2 + $0x2f] sm:$0x1] %v424_v47  ;;  %v429_v48 = vld [vmem:[%s428_s6] sm:$0x1]  ;;  %s451_s1 = sadd.s32 53, %s2199_s30  ;;  %s456_s26 = sadd.s32 54, %s2199_s30 }
  0x73   : > { %430 = vst [vmem:[#allocation2 + $0x30] sm:$0x1] %v429_v48  ;;  %s452_s9 = sld [smem:[#allocation4 + %s451_s1]]  ;;  %s433_s4 = scalar_lea.vmem [#allocation5], %s432_s16 }
  0x74   : > { %v434_v49 = vld [vmem:[%s433_s4] sm:$0x1]  ;;  %s457_s15 = sld [smem:[#allocation4 + %s456_s26]]  ;;  %s438_s14 = scalar_lea.vmem [#allocation5], %s437_s10 }
  0x75   : > { %435 = vst [vmem:[#allocation2 + $0x31] sm:$0x1] %v434_v49  ;;  %v439_v50 = vld [vmem:[%s438_s14] sm:$0x1]  ;;  %s461_s12 = sadd.s32 55, %s2199_s30  ;;  %s466_s2 = sadd.s32 56, %s2199_s30 }
  0x76   : > { %440 = vst [vmem:[#allocation2 + $0x32] sm:$0x1] %v439_v50  ;;  %s462_s7 = sld [smem:[#allocation4 + %s461_s12]]  ;;  %s443_s22 = scalar_lea.vmem [#allocation5], %s442_s13 }
  0x77   : > { %v444_v51 = vld [vmem:[%s443_s22] sm:$0x1]  ;;  %s467_s11 = sld [smem:[#allocation4 + %s466_s2]]  ;;  %s448_s5 = scalar_lea.vmem [#allocation5], %s447_s25 }
  0x78   : > { %445 = vst [vmem:[#allocation2 + $0x33] sm:$0x1] %v444_v51  ;;  %v449_v52 = vld [vmem:[%s448_s5] sm:$0x1]  ;;  %s471_s16 = sadd.s32 57, %s2199_s30  ;;  %s476_s6 = sadd.s32 58, %s2199_s30 }
  0x79   : > { %450 = vst [vmem:[#allocation2 + $0x34] sm:$0x1] %v449_v52  ;;  %s472_s1 = sld [smem:[#allocation4 + %s471_s16]]  ;;  %s453_s26 = scalar_lea.vmem [#allocation5], %s452_s9 }
  0x7a   : > { %v454_v53 = vld [vmem:[%s453_s26] sm:$0x1]  ;;  %s477_s10 = sld [smem:[#allocation4 + %s476_s6]]  ;;  %s458_s4 = scalar_lea.vmem [#allocation5], %s457_s15 }
  0x7b   : > { %455 = vst [vmem:[#allocation2 + $0x35] sm:$0x1] %v454_v53  ;;  %v459_v54 = vld [vmem:[%s458_s4] sm:$0x1]  ;;  %s481_s13 = sadd.s32 59, %s2199_s30  ;;  %s486_s14 = sadd.s32 60, %s2199_s30 }
  0x7c   : > { %460 = vst [vmem:[#allocation2 + $0x36] sm:$0x1] %v459_v54  ;;  %s482_s12 = sld [smem:[#allocation4 + %s481_s13]]  ;;  %s463_s2 = scalar_lea.vmem [#allocation5], %s462_s7 }
  0x7d   : > { %v464_v55 = vld [vmem:[%s463_s2] sm:$0x1]  ;;  %s487_s25 = sld [smem:[#allocation4 + %s486_s14]]  ;;  %s468_s22 = scalar_lea.vmem [#allocation5], %s467_s11 }
  0x7e   : > { %465 = vst [vmem:[#allocation2 + $0x37] sm:$0x1] %v464_v55  ;;  %v469_v56 = vld [vmem:[%s468_s22] sm:$0x1]  ;;  %s491_s9 = sadd.s32 61, %s2199_s30  ;;  %s496_s5 = sadd.s32 62, %s2199_s30 }
  0x7f   : > { %470 = vst [vmem:[#allocation2 + $0x38] sm:$0x1] %v469_v56  ;;  %s492_s16 = sld [smem:[#allocation4 + %s491_s9]]  ;;  %s473_s6 = scalar_lea.vmem [#allocation5], %s472_s1 }
  0x80   : > { %v474_v57 = vld [vmem:[%s473_s6] sm:$0x1]  ;;  %s497_s15 = sld [smem:[#allocation4 + %s496_s5]]  ;;  %s478_s26 = scalar_lea.vmem [#allocation5], %s477_s10 }
  0x81   : > { %475 = vst [vmem:[#allocation2 + $0x39] sm:$0x1] %v474_v57  ;;  %v479_v58 = vld [vmem:[%s478_s26] sm:$0x1]  ;;  %s501_s7 = sadd.s32 63, %s2199_s30  ;;  %s506_s4 = sadd.s32 64, %s2199_s30 }
  0x82   : > { %480 = vst [vmem:[#allocation2 + $0x3a] sm:$0x1] %v479_v58  ;;  %s502_s13 = sld [smem:[#allocation4 + %s501_s7]]  ;;  %s483_s14 = scalar_lea.vmem [#allocation5], %s482_s12 }
  0x83   : > { %v484_v59 = vld [vmem:[%s483_s14] sm:$0x1]  ;;  %s507_s11 = sld [smem:[#allocation4 + %s506_s4]]  ;;  %s488_s2 = scalar_lea.vmem [#allocation5], %s487_s25 }
  0x84   : > { %485 = vst [vmem:[#allocation2 + $0x3b] sm:$0x1] %v484_v59  ;;  %v489_v60 = vld [vmem:[%s488_s2] sm:$0x1]  ;;  %s511_s1 = sadd.s32 65, %s2199_s30  ;;  %s516_s22 = sadd.s32 66, %s2199_s30 }
  0x85   : > { %490 = vst [vmem:[#allocation2 + $0x3c] sm:$0x1] %v489_v60  ;;  %s512_s9 = sld [smem:[#allocation4 + %s511_s1]]  ;;  %s493_s5 = scalar_lea.vmem [#allocation5], %s492_s16 }
  0x86   : > { %v494_v61 = vld [vmem:[%s493_s5] sm:$0x1]  ;;  %s517_s10 = sld [smem:[#allocation4 + %s516_s22]]  ;;  %s498_s6 = scalar_lea.vmem [#allocation5], %s497_s15 }
  0x87   : > { %495 = vst [vmem:[#allocation2 + $0x3d] sm:$0x1] %v494_v61  ;;  %v499_v62 = vld [vmem:[%s498_s6] sm:$0x1]  ;;  %s521_s12 = sadd.s32 67, %s2199_s30  ;;  %s526_s26 = sadd.s32 68, %s2199_s30 }
  0x88   : > { %500 = vst [vmem:[#allocation2 + $0x3e] sm:$0x1] %v499_v62  ;;  %s522_s7 = sld [smem:[#allocation4 + %s521_s12]]  ;;  %s503_s4 = scalar_lea.vmem [#allocation5], %s502_s13 }
  0x89   : > { %v504_v63 = vld [vmem:[%s503_s4] sm:$0x1]  ;;  %s527_s25 = sld [smem:[#allocation4 + %s526_s26]]  ;;  %s508_s14 = scalar_lea.vmem [#allocation5], %s507_s11 }
  0x8a   : > { %505 = vst [vmem:[#allocation2 + $0x3f] sm:$0x1] %v504_v63  ;;  %v509_v0 = vld [vmem:[%s508_s14] sm:$0x1]  ;;  %s531_s16 = sadd.s32 69, %s2199_s30  ;;  %s536_s2 = sadd.s32 70, %s2199_s30 }
  0x8b   : > { %510 = vst [vmem:[#allocation2 + $0x40] sm:$0x1] %v509_v0  ;;  %s532_s1 = sld [smem:[#allocation4 + %s531_s16]]  ;;  %s513_s22 = scalar_lea.vmem [#allocation5], %s512_s9 }
  0x8c   : > { %v514_v1 = vld [vmem:[%s513_s22] sm:$0x1]  ;;  %s537_s15 = sld [smem:[#allocation4 + %s536_s2]]  ;;  %s518_s5 = scalar_lea.vmem [#allocation5], %s517_s10 }
  0x8d   : > { %515 = vst [vmem:[#allocation2 + $0x41] sm:$0x1] %v514_v1  ;;  %v519_v2 = vld [vmem:[%s518_s5] sm:$0x1]  ;;  %s541_s13 = sadd.s32 71, %s2199_s30  ;;  %s546_s6 = sadd.s32 72, %s2199_s30 }
  0x8e   : > { %520 = vst [vmem:[#allocation2 + $0x42] sm:$0x1] %v519_v2  ;;  %s542_s12 = sld [smem:[#allocation4 + %s541_s13]]  ;;  %s523_s26 = scalar_lea.vmem [#allocation5], %s522_s7 }
  0x8f   : > { %v524_v3 = vld [vmem:[%s523_s26] sm:$0x1]  ;;  %s547_s11 = sld [smem:[#allocation4 + %s546_s6]]  ;;  %s528_s4 = scalar_lea.vmem [#allocation5], %s527_s25 }
  0x90   : > { %525 = vst [vmem:[#allocation2 + $0x43] sm:$0x1] %v524_v3  ;;  %v529_v4 = vld [vmem:[%s528_s4] sm:$0x1]  ;;  %s551_s9 = sadd.s32 73, %s2199_s30  ;;  %s556_s14 = sadd.s32 74, %s2199_s30 }
  0x91   : > { %530 = vst [vmem:[#allocation2 + $0x44] sm:$0x1] %v529_v4  ;;  %s552_s16 = sld [smem:[#allocation4 + %s551_s9]]  ;;  %s533_s2 = scalar_lea.vmem [#allocation5], %s532_s1 }
  0x92   : > { %v534_v5 = vld [vmem:[%s533_s2] sm:$0x1]  ;;  %s557_s10 = sld [smem:[#allocation4 + %s556_s14]]  ;;  %s538_s22 = scalar_lea.vmem [#allocation5], %s537_s15 }
  0x93   : > { %535 = vst [vmem:[#allocation2 + $0x45] sm:$0x1] %v534_v5  ;;  %v539_v6 = vld [vmem:[%s538_s22] sm:$0x1]  ;;  %s561_s7 = sadd.s32 75, %s2199_s30  ;;  %s566_s5 = sadd.s32 76, %s2199_s30 }
  0x94   : > { %540 = vst [vmem:[#allocation2 + $0x46] sm:$0x1] %v539_v6  ;;  %s562_s13 = sld [smem:[#allocation4 + %s561_s7]]  ;;  %s543_s6 = scalar_lea.vmem [#allocation5], %s542_s12 }
  0x95   : > { %v544_v7 = vld [vmem:[%s543_s6] sm:$0x1]  ;;  %s567_s25 = sld [smem:[#allocation4 + %s566_s5]]  ;;  %s548_s26 = scalar_lea.vmem [#allocation5], %s547_s11 }
  0x96   : > { %545 = vst [vmem:[#allocation2 + $0x47] sm:$0x1] %v544_v7  ;;  %v549_v8 = vld [vmem:[%s548_s26] sm:$0x1]  ;;  %s571_s1 = sadd.s32 77, %s2199_s30  ;;  %s576_s4 = sadd.s32 78, %s2199_s30 }
  0x97   : > { %550 = vst [vmem:[#allocation2 + $0x48] sm:$0x1] %v549_v8  ;;  %s572_s9 = sld [smem:[#allocation4 + %s571_s1]]  ;;  %s553_s14 = scalar_lea.vmem [#allocation5], %s552_s16 }
  0x98   : > { %v554_v9 = vld [vmem:[%s553_s14] sm:$0x1]  ;;  %s577_s15 = sld [smem:[#allocation4 + %s576_s4]]  ;;  %s558_s2 = scalar_lea.vmem [#allocation5], %s557_s10 }
  0x99   : > { %555 = vst [vmem:[#allocation2 + $0x49] sm:$0x1] %v554_v9  ;;  %v559_v10 = vld [vmem:[%s558_s2] sm:$0x1]  ;;  %s581_s12 = sadd.s32 79, %s2199_s30  ;;  %s586_s22 = sadd.s32 80, %s2199_s30 }
  0x9a   : > { %560 = vst [vmem:[#allocation2 + $0x4a] sm:$0x1] %v559_v10  ;;  %s582_s7 = sld [smem:[#allocation4 + %s581_s12]]  ;;  %s563_s5 = scalar_lea.vmem [#allocation5], %s562_s13 }
  0x9b   : > { %v564_v11 = vld [vmem:[%s563_s5] sm:$0x1]  ;;  %s587_s11 = sld [smem:[#allocation4 + %s586_s22]]  ;;  %s568_s6 = scalar_lea.vmem [#allocation5], %s567_s25 }
  0x9c   : > { %565 = vst [vmem:[#allocation2 + $0x4b] sm:$0x1] %v564_v11  ;;  %v569_v12 = vld [vmem:[%s568_s6] sm:$0x1]  ;;  %s591_s16 = sadd.s32 81, %s2199_s30  ;;  %s596_s26 = sadd.s32 82, %s2199_s30 }
  0x9d   : > { %570 = vst [vmem:[#allocation2 + $0x4c] sm:$0x1] %v569_v12  ;;  %s592_s1 = sld [smem:[#allocation4 + %s591_s16]]  ;;  %s573_s4 = scalar_lea.vmem [#allocation5], %s572_s9 }
  0x9e   : > { %v574_v13 = vld [vmem:[%s573_s4] sm:$0x1]  ;;  %s597_s10 = sld [smem:[#allocation4 + %s596_s26]]  ;;  %s578_s14 = scalar_lea.vmem [#allocation5], %s577_s15 }
  0x9f   : > { %575 = vst [vmem:[#allocation2 + $0x4d] sm:$0x1] %v574_v13  ;;  %v579_v14 = vld [vmem:[%s578_s14] sm:$0x1]  ;;  %s601_s13 = sadd.s32 83, %s2199_s30  ;;  %s606_s2 = sadd.s32 84, %s2199_s30 }
  0xa0   : > { %580 = vst [vmem:[#allocation2 + $0x4e] sm:$0x1] %v579_v14  ;;  %s602_s12 = sld [smem:[#allocation4 + %s601_s13]]  ;;  %s583_s22 = scalar_lea.vmem [#allocation5], %s582_s7 }
  0xa1   : > { %v584_v15 = vld [vmem:[%s583_s22] sm:$0x1]  ;;  %s607_s25 = sld [smem:[#allocation4 + %s606_s2]]  ;;  %s588_s5 = scalar_lea.vmem [#allocation5], %s587_s11 }
  0xa2   : > { %585 = vst [vmem:[#allocation2 + $0x4f] sm:$0x1] %v584_v15  ;;  %v589_v16 = vld [vmem:[%s588_s5] sm:$0x1]  ;;  %s611_s9 = sadd.s32 85, %s2199_s30  ;;  %s616_s6 = sadd.s32 86, %s2199_s30 }
  0xa3   : > { %590 = vst [vmem:[#allocation2 + $0x50] sm:$0x1] %v589_v16  ;;  %s612_s16 = sld [smem:[#allocation4 + %s611_s9]]  ;;  %s593_s26 = scalar_lea.vmem [#allocation5], %s592_s1 }
  0xa4   : > { %v594_v17 = vld [vmem:[%s593_s26] sm:$0x1]  ;;  %s617_s15 = sld [smem:[#allocation4 + %s616_s6]]  ;;  %s598_s4 = scalar_lea.vmem [#allocation5], %s597_s10 }
  0xa5   : > { %595 = vst [vmem:[#allocation2 + $0x51] sm:$0x1] %v594_v17  ;;  %v599_v18 = vld [vmem:[%s598_s4] sm:$0x1]  ;;  %s621_s7 = sadd.s32 87, %s2199_s30  ;;  %s626_s14 = sadd.s32 88, %s2199_s30 }
  0xa6   : > { %600 = vst [vmem:[#allocation2 + $0x52] sm:$0x1] %v599_v18  ;;  %s622_s13 = sld [smem:[#allocation4 + %s621_s7]]  ;;  %s603_s2 = scalar_lea.vmem [#allocation5], %s602_s12 }
  0xa7   : > { %v604_v19 = vld [vmem:[%s603_s2] sm:$0x1]  ;;  %s627_s11 = sld [smem:[#allocation4 + %s626_s14]]  ;;  %s608_s22 = scalar_lea.vmem [#allocation5], %s607_s25 }
  0xa8   : > { %605 = vst [vmem:[#allocation2 + $0x53] sm:$0x1] %v604_v19  ;;  %v609_v20 = vld [vmem:[%s608_s22] sm:$0x1]  ;;  %s631_s1 = sadd.s32 89, %s2199_s30  ;;  %s636_s5 = sadd.s32 90, %s2199_s30 }
  0xa9   : > { %610 = vst [vmem:[#allocation2 + $0x54] sm:$0x1] %v609_v20  ;;  %s632_s9 = sld [smem:[#allocation4 + %s631_s1]]  ;;  %s613_s6 = scalar_lea.vmem [#allocation5], %s612_s16 }
  0xaa   : > { %v614_v21 = vld [vmem:[%s613_s6] sm:$0x1]  ;;  %s637_s10 = sld [smem:[#allocation4 + %s636_s5]]  ;;  %s618_s26 = scalar_lea.vmem [#allocation5], %s617_s15 }
  0xab   : > { %615 = vst [vmem:[#allocation2 + $0x55] sm:$0x1] %v614_v21  ;;  %v619_v22 = vld [vmem:[%s618_s26] sm:$0x1]  ;;  %s641_s12 = sadd.s32 91, %s2199_s30  ;;  %s646_s4 = sadd.s32 92, %s2199_s30 }
  0xac   : > { %620 = vst [vmem:[#allocation2 + $0x56] sm:$0x1] %v619_v22  ;;  %s642_s7 = sld [smem:[#allocation4 + %s641_s12]]  ;;  %s623_s14 = scalar_lea.vmem [#allocation5], %s622_s13 }
  0xad   : > { %v624_v23 = vld [vmem:[%s623_s14] sm:$0x1]  ;;  %s647_s25 = sld [smem:[#allocation4 + %s646_s4]]  ;;  %s628_s2 = scalar_lea.vmem [#allocation5], %s627_s11 }
  0xae   : > { %625 = vst [vmem:[#allocation2 + $0x57] sm:$0x1] %v624_v23  ;;  %v629_v24 = vld [vmem:[%s628_s2] sm:$0x1]  ;;  %s651_s16 = sadd.s32 93, %s2199_s30  ;;  %s656_s22 = sadd.s32 94, %s2199_s30 }
  0xaf   : > { %630 = vst [vmem:[#allocation2 + $0x58] sm:$0x1] %v629_v24  ;;  %s652_s1 = sld [smem:[#allocation4 + %s651_s16]]  ;;  %s633_s5 = scalar_lea.vmem [#allocation5], %s632_s9 }
  0xb0   : > { %v634_v25 = vld [vmem:[%s633_s5] sm:$0x1]  ;;  %s657_s15 = sld [smem:[#allocation4 + %s656_s22]]  ;;  %s638_s6 = scalar_lea.vmem [#allocation5], %s637_s10 }
  0xb1   : > { %635 = vst [vmem:[#allocation2 + $0x59] sm:$0x1] %v634_v25  ;;  %v639_v26 = vld [vmem:[%s638_s6] sm:$0x1]  ;;  %s661_s13 = sadd.s32 95, %s2199_s30  ;;  %s666_s26 = sadd.s32 96, %s2199_s30 }
  0xb2   : > { %640 = vst [vmem:[#allocation2 + $0x5a] sm:$0x1] %v639_v26  ;;  %s662_s12 = sld [smem:[#allocation4 + %s661_s13]]  ;;  %s643_s4 = scalar_lea.vmem [#allocation5], %s642_s7 }
  0xb3   : > { %v644_v27 = vld [vmem:[%s643_s4] sm:$0x1]  ;;  %s667_s11 = sld [smem:[#allocation4 + %s666_s26]]  ;;  %s648_s14 = scalar_lea.vmem [#allocation5], %s647_s25 }
  0xb4   : > { %645 = vst [vmem:[#allocation2 + $0x5b] sm:$0x1] %v644_v27  ;;  %v649_v28 = vld [vmem:[%s648_s14] sm:$0x1]  ;;  %s671_s9 = sadd.s32 97, %s2199_s30  ;;  %s676_s2 = sadd.s32 98, %s2199_s30 }
  0xb5   : > { %650 = vst [vmem:[#allocation2 + $0x5c] sm:$0x1] %v649_v28  ;;  %s672_s16 = sld [smem:[#allocation4 + %s671_s9]]  ;;  %s653_s22 = scalar_lea.vmem [#allocation5], %s652_s1 }
  0xb6   : > { %v654_v29 = vld [vmem:[%s653_s22] sm:$0x1]  ;;  %s677_s10 = sld [smem:[#allocation4 + %s676_s2]]  ;;  %s658_s5 = scalar_lea.vmem [#allocation5], %s657_s15 }
  0xb7   : > { %655 = vst [vmem:[#allocation2 + $0x5d] sm:$0x1] %v654_v29  ;;  %v659_v30 = vld [vmem:[%s658_s5] sm:$0x1]  ;;  %s681_s7 = sadd.s32 99, %s2199_s30  ;;  %s686_s6 = sadd.s32 100, %s2199_s30 }
  0xb8   : > { %660 = vst [vmem:[#allocation2 + $0x5e] sm:$0x1] %v659_v30  ;;  %s682_s13 = sld [smem:[#allocation4 + %s681_s7]]  ;;  %s663_s26 = scalar_lea.vmem [#allocation5], %s662_s12 }
  0xb9   : > { %v664_v31 = vld [vmem:[%s663_s26] sm:$0x1]  ;;  %s687_s25 = sld [smem:[#allocation4 + %s686_s6]]  ;;  %s668_s4 = scalar_lea.vmem [#allocation5], %s667_s11 }
  0xba   : > { %665 = vst [vmem:[#allocation2 + $0x5f] sm:$0x1] %v664_v31  ;;  %v669_v32 = vld [vmem:[%s668_s4] sm:$0x1]  ;;  %s691_s1 = sadd.s32 101, %s2199_s30  ;;  %s696_s14 = sadd.s32 102, %s2199_s30 }
  0xbb   : > { %670 = vst [vmem:[#allocation2 + $0x60] sm:$0x1] %v669_v32  ;;  %s692_s9 = sld [smem:[#allocation4 + %s691_s1]]  ;;  %s673_s2 = scalar_lea.vmem [#allocation5], %s672_s16 }
  0xbc   : > { %v674_v33 = vld [vmem:[%s673_s2] sm:$0x1]  ;;  %s697_s15 = sld [smem:[#allocation4 + %s696_s14]]  ;;  %s678_s22 = scalar_lea.vmem [#allocation5], %s677_s10 }
  0xbd   : > { %675 = vst [vmem:[#allocation2 + $0x61] sm:$0x1] %v674_v33  ;;  %v679_v34 = vld [vmem:[%s678_s22] sm:$0x1]  ;;  %s701_s12 = sadd.s32 103, %s2199_s30  ;;  %s706_s5 = sadd.s32 104, %s2199_s30 }
  0xbe   : > { %680 = vst [vmem:[#allocation2 + $0x62] sm:$0x1] %v679_v34  ;;  %s702_s7 = sld [smem:[#allocation4 + %s701_s12]]  ;;  %s683_s6 = scalar_lea.vmem [#allocation5], %s682_s13 }
  0xbf   : > { %v684_v35 = vld [vmem:[%s683_s6] sm:$0x1]  ;;  %s707_s11 = sld [smem:[#allocation4 + %s706_s5]]  ;;  %s688_s26 = scalar_lea.vmem [#allocation5], %s687_s25 }
  0xc0   : > { %685 = vst [vmem:[#allocation2 + $0x63] sm:$0x1] %v684_v35  ;;  %v689_v36 = vld [vmem:[%s688_s26] sm:$0x1]  ;;  %s711_s16 = sadd.s32 105, %s2199_s30  ;;  %s716_s4 = sadd.s32 106, %s2199_s30 }
  0xc1   : > { %690 = vst [vmem:[#allocation2 + $0x64] sm:$0x1] %v689_v36  ;;  %s712_s1 = sld [smem:[#allocation4 + %s711_s16]]  ;;  %s693_s14 = scalar_lea.vmem [#allocation5], %s692_s9 }
  0xc2   : > { %v694_v37 = vld [vmem:[%s693_s14] sm:$0x1]  ;;  %s717_s10 = sld [smem:[#allocation4 + %s716_s4]]  ;;  %s698_s2 = scalar_lea.vmem [#allocation5], %s697_s15 }
  0xc3   : > { %695 = vst [vmem:[#allocation2 + $0x65] sm:$0x1] %v694_v37  ;;  %v699_v38 = vld [vmem:[%s698_s2] sm:$0x1]  ;;  %s721_s13 = sadd.s32 107, %s2199_s30  ;;  %s726_s22 = sadd.s32 108, %s2199_s30 }
  0xc4   : > { %700 = vst [vmem:[#allocation2 + $0x66] sm:$0x1] %v699_v38  ;;  %s722_s12 = sld [smem:[#allocation4 + %s721_s13]]  ;;  %s703_s5 = scalar_lea.vmem [#allocation5], %s702_s7 }
  0xc5   : > { %v704_v39 = vld [vmem:[%s703_s5] sm:$0x1]  ;;  %s727_s25 = sld [smem:[#allocation4 + %s726_s22]]  ;;  %s708_s6 = scalar_lea.vmem [#allocation5], %s707_s11 }
  0xc6   : > { %705 = vst [vmem:[#allocation2 + $0x67] sm:$0x1] %v704_v39  ;;  %v709_v40 = vld [vmem:[%s708_s6] sm:$0x1]  ;;  %s731_s9 = sadd.s32 109, %s2199_s30  ;;  %s736_s26 = sadd.s32 110, %s2199_s30 }
  0xc7   : > { %710 = vst [vmem:[#allocation2 + $0x68] sm:$0x1] %v709_v40  ;;  %s732_s16 = sld [smem:[#allocation4 + %s731_s9]]  ;;  %s713_s4 = scalar_lea.vmem [#allocation5], %s712_s1 }
  0xc8   : > { %v714_v41 = vld [vmem:[%s713_s4] sm:$0x1]  ;;  %s737_s15 = sld [smem:[#allocation4 + %s736_s26]]  ;;  %s718_s14 = scalar_lea.vmem [#allocation5], %s717_s10 }
  0xc9   : > { %715 = vst [vmem:[#allocation2 + $0x69] sm:$0x1] %v714_v41  ;;  %v719_v42 = vld [vmem:[%s718_s14] sm:$0x1]  ;;  %s741_s7 = sadd.s32 111, %s2199_s30  ;;  %s746_s2 = sadd.s32 112, %s2199_s30 }
  0xca   : > { %720 = vst [vmem:[#allocation2 + $0x6a] sm:$0x1] %v719_v42  ;;  %s742_s13 = sld [smem:[#allocation4 + %s741_s7]]  ;;  %s723_s22 = scalar_lea.vmem [#allocation5], %s722_s12 }
  0xcb   : > { %v724_v43 = vld [vmem:[%s723_s22] sm:$0x1]  ;;  %s747_s11 = sld [smem:[#allocation4 + %s746_s2]]  ;;  %s728_s5 = scalar_lea.vmem [#allocation5], %s727_s25 }
  0xcc   : > { %725 = vst [vmem:[#allocation2 + $0x6b] sm:$0x1] %v724_v43  ;;  %v729_v44 = vld [vmem:[%s728_s5] sm:$0x1]  ;;  %s751_s1 = sadd.s32 113, %s2199_s30  ;;  %s756_s6 = sadd.s32 114, %s2199_s30 }
  0xcd   : > { %730 = vst [vmem:[#allocation2 + $0x6c] sm:$0x1] %v729_v44  ;;  %s752_s9 = sld [smem:[#allocation4 + %s751_s1]]  ;;  %s733_s26 = scalar_lea.vmem [#allocation5], %s732_s16 }
  0xce   : > { %v734_v45 = vld [vmem:[%s733_s26] sm:$0x1]  ;;  %s757_s10 = sld [smem:[#allocation4 + %s756_s6]]  ;;  %s738_s4 = scalar_lea.vmem [#allocation5], %s737_s15 }
  0xcf   : > { %735 = vst [vmem:[#allocation2 + $0x6d] sm:$0x1] %v734_v45  ;;  %v739_v46 = vld [vmem:[%s738_s4] sm:$0x1]  ;;  %s761_s12 = sadd.s32 115, %s2199_s30  ;;  %s766_s14 = sadd.s32 116, %s2199_s30 }
  0xd0   : > { %740 = vst [vmem:[#allocation2 + $0x6e] sm:$0x1] %v739_v46  ;;  %s762_s7 = sld [smem:[#allocation4 + %s761_s12]]  ;;  %s743_s2 = scalar_lea.vmem [#allocation5], %s742_s13 }
  0xd1   : > { %v744_v47 = vld [vmem:[%s743_s2] sm:$0x1]  ;;  %s767_s25 = sld [smem:[#allocation4 + %s766_s14]]  ;;  %s748_s22 = scalar_lea.vmem [#allocation5], %s747_s11 }
  0xd2   : > { %745 = vst [vmem:[#allocation2 + $0x6f] sm:$0x1] %v744_v47  ;;  %v749_v48 = vld [vmem:[%s748_s22] sm:$0x1]  ;;  %s771_s16 = sadd.s32 117, %s2199_s30  ;;  %s776_s5 = sadd.s32 118, %s2199_s30 }
  0xd3   : > { %750 = vst [vmem:[#allocation2 + $0x70] sm:$0x1] %v749_v48  ;;  %s772_s1 = sld [smem:[#allocation4 + %s771_s16]]  ;;  %s753_s6 = scalar_lea.vmem [#allocation5], %s752_s9 }
  0xd4   : > { %v754_v49 = vld [vmem:[%s753_s6] sm:$0x1]  ;;  %s777_s15 = sld [smem:[#allocation4 + %s776_s5]]  ;;  %s758_s26 = scalar_lea.vmem [#allocation5], %s757_s10 }
  0xd5   : > { %755 = vst [vmem:[#allocation2 + $0x71] sm:$0x1] %v754_v49  ;;  %v759_v50 = vld [vmem:[%s758_s26] sm:$0x1]  ;;  %s781_s13 = sadd.s32 119, %s2199_s30  ;;  %s786_s4 = sadd.s32 120, %s2199_s30 }
  0xd6   : > { %760 = vst [vmem:[#allocation2 + $0x72] sm:$0x1] %v759_v50  ;;  %s782_s12 = sld [smem:[#allocation4 + %s781_s13]]  ;;  %s763_s14 = scalar_lea.vmem [#allocation5], %s762_s7 }
  0xd7   : > { %v764_v51 = vld [vmem:[%s763_s14] sm:$0x1]  ;;  %s787_s11 = sld [smem:[#allocation4 + %s786_s4]]  ;;  %s768_s2 = scalar_lea.vmem [#allocation5], %s767_s25 }
  0xd8   : > { %765 = vst [vmem:[#allocation2 + $0x73] sm:$0x1] %v764_v51  ;;  %v769_v52 = vld [vmem:[%s768_s2] sm:$0x1]  ;;  %s791_s9 = sadd.s32 121, %s2199_s30  ;;  %s796_s22 = sadd.s32 122, %s2199_s30 }
  0xd9   : > { %770 = vst [vmem:[#allocation2 + $0x74] sm:$0x1] %v769_v52  ;;  %s792_s16 = sld [smem:[#allocation4 + %s791_s9]]  ;;  %s773_s5 = scalar_lea.vmem [#allocation5], %s772_s1 }
  0xda   : > { %v774_v53 = vld [vmem:[%s773_s5] sm:$0x1]  ;;  %s797_s10 = sld [smem:[#allocation4 + %s796_s22]]  ;;  %s778_s6 = scalar_lea.vmem [#allocation5], %s777_s15 }
  0xdb   : > { %775 = vst [vmem:[#allocation2 + $0x75] sm:$0x1] %v774_v53  ;;  %v779_v54 = vld [vmem:[%s778_s6] sm:$0x1]  ;;  %s801_s7 = sadd.s32 123, %s2199_s30  ;;  %s806_s26 = sadd.s32 124, %s2199_s30 }
  0xdc   : > { %780 = vst [vmem:[#allocation2 + $0x76] sm:$0x1] %v779_v54  ;;  %s802_s13 = sld [smem:[#allocation4 + %s801_s7]]  ;;  %s783_s4 = scalar_lea.vmem [#allocation5], %s782_s12 }
  0xdd   : > { %v784_v55 = vld [vmem:[%s783_s4] sm:$0x1]  ;;  %s807_s25 = sld [smem:[#allocation4 + %s806_s26]]  ;;  %s788_s14 = scalar_lea.vmem [#allocation5], %s787_s11 }
  0xde   : > { %785 = vst [vmem:[#allocation2 + $0x77] sm:$0x1] %v784_v55  ;;  %v789_v56 = vld [vmem:[%s788_s14] sm:$0x1]  ;;  %s811_s2 = sadd.s32 125, %s2199_s30  ;;  %s816_s1 = sadd.s32 126, %s2199_s30 }
  0xdf   : > { %790 = vst [vmem:[#allocation2 + $0x78] sm:$0x1] %v789_v56  ;;  %s812_s9 = sld [smem:[#allocation4 + %s811_s2]]  ;;  %s793_s5 = scalar_lea.vmem [#allocation5], %s792_s16 }
  0xe0   : > { %v794_v57 = vld [vmem:[%s793_s5] sm:$0x1]  ;;  %s817_s22 = sld [smem:[#allocation4 + %s816_s1]]  ;;  %s798_s15 = scalar_lea.vmem [#allocation5], %s797_s10 }
  0xe1   : > { %795 = vst [vmem:[#allocation2 + $0x79] sm:$0x1] %v794_v57  ;;  %v799_v58 = vld [vmem:[%s798_s15] sm:$0x1]  ;;  %s821_s6 = sadd.s32 127, %s2199_s30 }
  0xe2   : > { %800 = vst [vmem:[#allocation2 + $0x7a] sm:$0x1] %v799_v58  ;;  %s822_s7 = sld [smem:[#allocation4 + %s821_s6]]  ;;  %s803_s12 = scalar_lea.vmem [#allocation5], %s802_s13 }
  0xe3   : > { %v804_v59 = vld [vmem:[%s803_s12] sm:$0x1]  ;;  %s808_s26 = scalar_lea.vmem [#allocation5], %s807_s25 }
  0xe4   : > { %805 = vst [vmem:[#allocation2 + $0x7b] sm:$0x1] %v804_v59  ;;  %v809_v60 = vld [vmem:[%s808_s26] sm:$0x1] }
  0xe5   : > { %810 = vst [vmem:[#allocation2 + $0x7c] sm:$0x1] %v809_v60  ;;  %s813_s11 = scalar_lea.vmem [#allocation5], %s812_s9 }
  0xe6   : > { %v814_v61 = vld [vmem:[%s813_s11] sm:$0x1]  ;;  %s818_s4 = scalar_lea.vmem [#allocation5], %s817_s22 }
  0xe7   : > { %815 = vst [vmem:[#allocation2 + $0x7d] sm:$0x1] %v814_v61  ;;  %v819_v62 = vld [vmem:[%s818_s4] sm:$0x1] }
  0xe8   : > { %820 = vst [vmem:[#allocation2 + $0x7e] sm:$0x1] %v819_v62  ;;  %s823_s16 = scalar_lea.vmem [#allocation5], %s822_s7 }
  0xe9   : > { %v824_v63 = vld [vmem:[%s823_s16] sm:$0x1] }
  0xea   : > { %825 = vst [vmem:[#allocation2 + $0x7f] sm:$0x1] %v824_v63 }
  0xeb PF: > { %v1881_v0 = vld [vmem:[%s2193_s29 + $0x38] sm:$0xff]  ;;  %v1880_v4 = vld [vmem:[%s2193_s29 + $0x30] sm:$0xff]  ;;  %v1879_v8 = vld [vmem:[%s2193_s29 + $0x28] sm:$0xff]  ;;  %s1906_s30 = sshll.u32 (%p2155_p5), %s2067_s19, 7 }
  0xec   : > { %v1889_v1 = vld [vmem:[%s2193_s29 + $0x78] sm:$0xff]  ;;  %1106 = vmatpush.bf16.xpose.msra.mxu0 %v1881_v0  ;;  %v1888_v5 = vld [vmem:[%s2193_s29 + $0x70] sm:$0xff]  ;;  %v1887_v9 = vld [vmem:[%s2193_s29 + $0x68] sm:$0xff] }
  0xed   : > { %v1897_v2 = vld [vmem:[%s2193_s29 + $0xb8] sm:$0xff]  ;;  %1155 = vmatpush.bf16.xpose.msra.mxu1 %v1889_v1  ;;  %v1896_v6 = vld [vmem:[%s2193_s29 + $0xb0] sm:$0xff]  ;;  %v1895_v10 = vld [vmem:[%s2193_s29 + $0xa8] sm:$0xff] }
  0xee   : > { %v1905_v3 = vld [vmem:[%s2193_s29 + $0xf8] sm:$0xff]  ;;  %1204 = vmatpush.bf16.xpose.msra.mxu2 %v1897_v2  ;;  %v1904_v7 = vld [vmem:[%s2193_s29 + $0xf0] sm:$0xff]  ;;  %v1903_v11 = vld [vmem:[%s2193_s29 + $0xe8] sm:$0xff] }
  0xef   : > { %1253 = vmatpush.bf16.xpose.msra.mxu3 %v1905_v3  ;;  %v1878_v12 = vld [vmem:[%s2193_s29 + $0x20] sm:$0xff]  ;;  %v1877_v16 = vld [vmem:[%s2193_s29 + $0x18] sm:$0xff]  ;;  %v1876_v20 = vld [vmem:[%s2193_s29 + $0x10] sm:$0xff] }
  0xf0   : > { %v1886_v13 = vld [vmem:[%s2193_s29 + $0x60] sm:$0xff]  ;;  %v1885_v17 = vld [vmem:[%s2193_s29 + $0x58] sm:$0xff]  ;;  %v1884_v21 = vld [vmem:[%s2193_s29 + $0x50] sm:$0xff] }
  0xf1   : > { %v1894_v14 = vld [vmem:[%s2193_s29 + $0xa0] sm:$0xff]  ;;  %v1893_v18 = vld [vmem:[%s2193_s29 + $0x98] sm:$0xff]  ;;  %v1892_v22 = vld [vmem:[%s2193_s29 + $0x90] sm:$0xff] }
  0xf2   : > { %v1902_v15 = vld [vmem:[%s2193_s29 + $0xe0] sm:$0xff]  ;;  %v1901_v19 = vld [vmem:[%s2193_s29 + $0xd8] sm:$0xff]  ;;  %v1900_v23 = vld [vmem:[%s2193_s29 + $0xd0] sm:$0xff] }
  0xf3   : > { %v1875_v24 = vld [vmem:[%s2193_s29 + $0x8] sm:$0xff]  ;;  %v1874_v28 = vld [vmem:[%s2193_s29] sm:$0xff]  ;;  %v828_v35 = vld [vmem:[#allocation2 + $0x10] sm:$0xff] }
  0xf4   : > { %1107 = vmatpush.bf16.xpose.msra.mxu0 %v1880_v4  ;;  %v1883_v25 = vld [vmem:[%s2193_s29 + $0x48] sm:$0xff]  ;;  %v1882_v29 = vld [vmem:[%s2193_s29 + $0x40] sm:$0xff]  ;;  %v829_v36 = vld [vmem:[#allocation2 + $0x18] sm:$0xff] }
  0xf5   : > { %1156 = vmatpush.bf16.xpose.msra.mxu1 %v1888_v5  ;;  %v1891_v26 = vld [vmem:[%s2193_s29 + $0x88] sm:$0xff]  ;;  %v1890_v30 = vld [vmem:[%s2193_s29 + $0x80] sm:$0xff]  ;;  %v843_v37 = vpack.c.bf16 %v829_v36, %v828_v35  ;;  %v832_v41 = vld [vmem:[#allocation2 + $0x30] sm:$0xff] }
  0xf6   : > { %1205 = vmatpush.bf16.xpose.msra.mxu2 %v1896_v6  ;;  %v1899_v27 = vld [vmem:[%s2193_s29 + $0xc8] sm:$0xff]  ;;  %v1898_v31 = vld [vmem:[%s2193_s29 + $0xc0] sm:$0xff]  ;;  %v833_v42 = vld [vmem:[#allocation2 + $0x38] sm:$0xff]  ;;  %s1869_s29 = sshll.u32 (%p2155_p5), %s2063_s18, 2 }
  0xf7   : > { %1254 = vmatpush.bf16.xpose.msra.mxu3 %v1904_v7  ;;  %v826_v32 = vld [vmem:[#allocation2] sm:$0xff]  ;;  %v827_v33 = vld [vmem:[#allocation2 + $0x8] sm:$0xff]  ;;  %v845_v43 = vpack.c.bf16 %v833_v42, %v832_v41  ;;  %v836_v47 = vld [vmem:[#allocation2 + $0x50] sm:$0xff]  ;;  %s1376_s10 = sadd.s32 (%p2155_p5), %s1906_s30, %s1869_s29 }
  0xf8   : > { %v842_v34 = vpack.c.bf16 %v827_v33, %v826_v32  ;;  %v830_v38 = vld [vmem:[#allocation2 + $0x20] sm:$0xff]  ;;  %v831_v39 = vld [vmem:[#allocation2 + $0x28] sm:$0xff]  ;;  %v837_v48 = vld [vmem:[#allocation2 + $0x58] sm:$0xff]  ;;  %s1871_s13 = sshll.u32 (%p2155_p5), %s1376_s10, 3 }
  0xf9   : > { %v844_v40 = vpack.c.bf16 %v831_v39, %v830_v38  ;;  %v834_v44 = vld [vmem:[#allocation2 + $0x40] sm:$0xff]  ;;  %v835_v45 = vld [vmem:[#allocation2 + $0x48] sm:$0xff]  ;;  %v847_v49 = vpack.c.bf16 %v837_v48, %v836_v47  ;;  %v840_v53 = vld [vmem:[#allocation2 + $0x70] sm:$0xff]  ;;  %s2434_s14 = scalar_lea.vmem (%p2155_p5), %s2586_s3, %s1871_s13 }
  0xfa   : > { %v846_v46 = vpack.c.bf16 %v835_v45, %v834_v44  ;;  %v838_v50 = vld [vmem:[#allocation2 + $0x60] sm:$0xff]  ;;  %v839_v51 = vld [vmem:[#allocation2 + $0x68] sm:$0xff]  ;;  %v841_v54 = vld [vmem:[#allocation2 + $0x78] sm:$0xff] }
  0xfb   : > { %v848_v52 = vpack.c.bf16 %v839_v51, %v838_v50  ;;  %v849_v55 = vpack.c.bf16 %v841_v54, %v840_v53 }
  0xfc   : > { %1108 = vmatpush.bf16.xpose.msra.mxu0 %v1879_v8 }
  0xfd   : > { %1157 = vmatpush.bf16.xpose.msra.mxu1 %v1887_v9 }
  0xfe   : > { %1206 = vmatpush.bf16.xpose.msra.mxu2 %v1895_v10 }
  0xff   : > { %1255 = vmatpush.bf16.xpose.msra.mxu3 %v1903_v11 }
 0x104   : > { %1109 = vmatpush.bf16.xpose.msra.mxu0 %v1878_v12 }
 0x105   : > { %1158 = vmatpush.bf16.xpose.msra.mxu1 %v1886_v13 }
 0x106   : > { %1207 = vmatpush.bf16.xpose.msra.mxu2 %v1894_v14 }
 0x107   : > { %1256 = vmatpush.bf16.xpose.msra.mxu3 %v1902_v15 }
 0x10c   : > { %1110 = vmatpush.bf16.xpose.msra.mxu0 %v1877_v16 }
 0x10d   : > { %1159 = vmatpush.bf16.xpose.msra.mxu1 %v1885_v17 }
 0x10e   : > { %1208 = vmatpush.bf16.xpose.msra.mxu2 %v1893_v18 }
 0x10f   : > { %1257 = vmatpush.bf16.xpose.msra.mxu3 %v1901_v19 }
 0x114   : > { %1111 = vmatpush.bf16.xpose.msra.mxu0 %v1876_v20 }
 0x115   : > { %1160 = vmatpush.bf16.xpose.msra.mxu1 %v1884_v21 }
 0x116   : > { %1209 = vmatpush.bf16.xpose.msra.mxu2 %v1892_v22 }
 0x117   : > { %1258 = vmatpush.bf16.xpose.msra.mxu3 %v1900_v23 }
 0x11c   : > { %1112 = vmatpush.bf16.xpose.msra.mxu0 %v1875_v24 }
 0x11d   : > { %1161 = vmatpush.bf16.xpose.msra.mxu1 %v1883_v25 }
 0x11e   : > { %1210 = vmatpush.bf16.xpose.msra.mxu2 %v1891_v26 }
 0x11f   : > { %1259 = vmatpush.bf16.xpose.msra.mxu3 %v1899_v27 }
 0x124   : > { %1113 = vmatpush.bf16.xpose.msra.mxu0 %v1874_v28 }
 0x125   : > { %1162 = vmatpush.bf16.xpose.msra.mxu1 %v1882_v29 }
 0x126   : > { %1211 = vmatpush.bf16.xpose.msra.mxu2 %v1890_v30 }
 0x127   : > { %1260 = vmatpush.bf16.xpose.msra.mxu3 %v1898_v31 }
 0x12b   : > { %1114 = vmatmul.bf16.vlgmr.msra.gmra.mxu0 %v842_v34 }
 0x12c   : > { %1163 = vmatmul.bf16.vlgmr.msra.gmra.mxu1 %v842_v34 }
 0x12d   : > { %1212 = vmatmul.bf16.vlgmr.msra.gmra.mxu2 %v842_v34 }
 0x12e   : > { %1261 = vmatmul.bf16.vlgmr.msra.gmra.mxu3 %v842_v34 }
 0x13b   : > { %1119 = vmatmul.bf16.gmra.mxu0 %v843_v37 }
 0x13c   : > { %1168 = vmatmul.bf16.gmra.mxu1 %v843_v37 }
 0x13d   : > { %1217 = vmatmul.bf16.gmra.mxu2 %v843_v37 }
 0x13e   : > { %1266 = vmatmul.bf16.gmra.mxu3 %v843_v37 }
 0x14b   : > { %1124 = vmatmul.bf16.gmra.mxu0 %v844_v40 }
 0x14c   : > { %1173 = vmatmul.bf16.gmra.mxu1 %v844_v40 }
 0x14d   : > { %1222 = vmatmul.bf16.gmra.mxu2 %v844_v40 }
 0x14e   : > { %1271 = vmatmul.bf16.gmra.mxu3 %v844_v40 }
 0x15b   : > { %1129 = vmatmul.bf16.gmra.mxu0 %v845_v43 }
 0x15c   : > { %1178 = vmatmul.bf16.gmra.mxu1 %v845_v43 }
 0x15d   : > { %1227 = vmatmul.bf16.gmra.mxu2 %v845_v43 }
 0x15e   : > { %1276 = vmatmul.bf16.gmra.mxu3 %v845_v43 }
 0x16b   : > { %1134 = vmatmul.bf16.gmra.mxu0 %v846_v46 }
 0x16c   : > { %1183 = vmatmul.bf16.gmra.mxu1 %v846_v46 }
 0x16d   : > { %1232 = vmatmul.bf16.gmra.mxu2 %v846_v46 }
 0x16e   : > { %1281 = vmatmul.bf16.gmra.mxu3 %v846_v46 }
 0x17b   : > { %1139 = vmatmul.bf16.gmra.mxu0 %v847_v49 }
 0x17c   : > { %1188 = vmatmul.bf16.gmra.mxu1 %v847_v49 }
 0x17d   : > { %1237 = vmatmul.bf16.gmra.mxu2 %v847_v49 }
 0x17e   : > { %1286 = vmatmul.bf16.gmra.mxu3 %v847_v49 }
 0x18b   : > { %1144 = vmatmul.bf16.gmra.mxu0 %v848_v52 }
 0x18c   : > { %1193 = vmatmul.bf16.gmra.mxu1 %v848_v52 }
 0x18d   : > { %1242 = vmatmul.bf16.gmra.mxu2 %v848_v52 }
 0x18e   : > { %1291 = vmatmul.bf16.gmra.mxu3 %v848_v52 }
 0x19b   : > { %1149 = vmatmul.bf16.gmra.mxu0 %v849_v55 }
 0x19c   : > { %1198 = vmatmul.bf16.gmra.mxu1 %v849_v55 }
 0x19d   : > { %1247 = vmatmul.bf16.gmra.mxu2 %v849_v55 }
 0x19e   : > { %1296 = vmatmul.bf16.gmra.mxu3 %v849_v55 }
 0x1a8   : > { %v1115_v56 = vpop.f32.mrf.mxu0 }
 0x1a9   : > { %v1164_v57 = vpop.f32.mrf.mxu1  ;;  %1302 = vst [vmem:[%s2195_s28] sm:$0xff] %v1115_v56 }
 0x1aa   : > { %1303 = vst [vmem:[%s2195_s28 + $0x8] sm:$0xff] %v1164_v57 }
 0x1b0   : > { %v1213_v58 = vpop.f32.mrf.mxu2  ;;  %v1117_v60 = vpop.f32.mrf.mxu0  ;;  %v1391_v56 = vld [vmem:[%s2195_s28] sm:$0xff] (%p2155_p5) }
 0x1b1   : > { %v1262_v59 = vpop.f32.mrf.mxu3  ;;  %1304 = vst [vmem:[%s2195_s28 + $0x10] sm:$0xff] %v1213_v58  ;;  %v1166_v61 = vpop.f32.mrf.mxu1  ;;  %v1393_v57 = vld [vmem:[%s2195_s28 + $0x8] sm:$0xff] (%p2155_p5) }
 0x1b2   : > { %1305 = vst [vmem:[%s2195_s28 + $0x18] sm:$0xff] %v1262_v59 }
 0x1b3   : > { %1306 = vst [vmem:[%s2195_s28 + $0x20] sm:$0xff] %v1117_v60 }
 0x1b4   : > { %1307 = vst [vmem:[%s2195_s28 + $0x28] sm:$0xff] %v1166_v61 }
 0x1b5   : > { %1392 = vst [vmem:[%s2434_s14] sm:$0xff] (%p2155_p5), %v1391_v56 }
 0x1b6   : > { %1394 = vst [vmem:[%s2434_s14 + $0x8] sm:$0xff] (%p2155_p5), %v1393_v57 }
 0x1b8   : > { %v1215_v62 = vpop.f32.mrf.mxu2  ;;  %v1120_v0 = vpop.f32.mrf.mxu0  ;;  %v1395_v58 = vld [vmem:[%s2195_s28 + $0x10] sm:$0xff] (%p2155_p5) }
 0x1b9   : > { %v1264_v63 = vpop.f32.mrf.mxu3  ;;  %1308 = vst [vmem:[%s2195_s28 + $0x30] sm:$0xff] %v1215_v62  ;;  %v1169_v1 = vpop.f32.mrf.mxu1  ;;  %v1397_v59 = vld [vmem:[%s2195_s28 + $0x18] sm:$0xff] (%p2155_p5) }
 0x1ba   : > { %1309 = vst [vmem:[%s2195_s28 + $0x38] sm:$0xff] %v1264_v63  ;;  %v1399_v60 = vld [vmem:[%s2195_s28 + $0x20] sm:$0xff] (%p2155_p5) }
 0x1bb   : > { %1310 = vst [vmem:[%s2195_s28 + $0x40] sm:$0xff] %v1120_v0  ;;  %v1401_v61 = vld [vmem:[%s2195_s28 + $0x28] sm:$0xff] (%p2155_p5) }
 0x1bc   : > { %1311 = vst [vmem:[%s2195_s28 + $0x48] sm:$0xff] %v1169_v1 }
 0x1bd   : > { %1396 = vst [vmem:[%s2434_s14 + $0x10] sm:$0xff] (%p2155_p5), %v1395_v58 }
 0x1be   : > { %1398 = vst [vmem:[%s2434_s14 + $0x18] sm:$0xff] (%p2155_p5), %v1397_v59 }
 0x1bf   : > { %1400 = vst [vmem:[%s2434_s14 + $0x40] sm:$0xff] (%p2155_p5), %v1399_v60 }
 0x1c0   : > { %v1218_v2 = vpop.f32.mrf.mxu2  ;;  %v1122_v4 = vpop.f32.mrf.mxu0  ;;  %v1403_v62 = vld [vmem:[%s2195_s28 + $0x30] sm:$0xff] (%p2155_p5)  ;;  %1402 = vst [vmem:[%s2434_s14 + $0x48] sm:$0xff] (%p2155_p5), %v1401_v61 }
 0x1c1   : > { %v1267_v3 = vpop.f32.mrf.mxu3  ;;  %1312 = vst [vmem:[%s2195_s28 + $0x50] sm:$0xff] %v1218_v2  ;;  %v1171_v5 = vpop.f32.mrf.mxu1  ;;  %v1405_v63 = vld [vmem:[%s2195_s28 + $0x38] sm:$0xff] (%p2155_p5) }
 0x1c2   : > { %1313 = vst [vmem:[%s2195_s28 + $0x58] sm:$0xff] %v1267_v3  ;;  %v1407_v0 = vld [vmem:[%s2195_s28 + $0x40] sm:$0xff] (%p2155_p5) }
 0x1c3   : > { %1314 = vst [vmem:[%s2195_s28 + $0x60] sm:$0xff] %v1122_v4  ;;  %v1409_v1 = vld [vmem:[%s2195_s28 + $0x48] sm:$0xff] (%p2155_p5) }
 0x1c4   : > { %1315 = vst [vmem:[%s2195_s28 + $0x68] sm:$0xff] %v1171_v5 }
 0x1c5   : > { %1404 = vst [vmem:[%s2434_s14 + $0x50] sm:$0xff] (%p2155_p5), %v1403_v62 }
 0x1c6   : > { %1406 = vst [vmem:[%s2434_s14 + $0x58] sm:$0xff] (%p2155_p5), %v1405_v63 }
 0x1c7   : > { %1408 = vst [vmem:[%s2434_s14 + $0x80] sm:$0xff] (%p2155_p5), %v1407_v0 }
 0x1c8   : > { %v1220_v6 = vpop.f32.mrf.mxu2  ;;  %v1125_v8 = vpop.f32.mrf.mxu0  ;;  %v1411_v2 = vld [vmem:[%s2195_s28 + $0x50] sm:$0xff] (%p2155_p5)  ;;  %1410 = vst [vmem:[%s2434_s14 + $0x88] sm:$0xff] (%p2155_p5), %v1409_v1 }
 0x1c9   : > { %v1269_v7 = vpop.f32.mrf.mxu3  ;;  %1316 = vst [vmem:[%s2195_s28 + $0x70] sm:$0xff] %v1220_v6  ;;  %v1174_v9 = vpop.f32.mrf.mxu1  ;;  %v1413_v3 = vld [vmem:[%s2195_s28 + $0x58] sm:$0xff] (%p2155_p5) }
 0x1ca   : > { %1317 = vst [vmem:[%s2195_s28 + $0x78] sm:$0xff] %v1269_v7  ;;  %v1415_v4 = vld [vmem:[%s2195_s28 + $0x60] sm:$0xff] (%p2155_p5) }
 0x1cb   : > { %1318 = vst [vmem:[%s2195_s28 + $0x80] sm:$0xff] %v1125_v8  ;;  %v1417_v5 = vld [vmem:[%s2195_s28 + $0x68] sm:$0xff] (%p2155_p5) }
 0x1cc   : > { %1319 = vst [vmem:[%s2195_s28 + $0x88] sm:$0xff] %v1174_v9 }
 0x1cd   : > { %1412 = vst [vmem:[%s2434_s14 + $0x90] sm:$0xff] (%p2155_p5), %v1411_v2 }
 0x1ce   : > { %1414 = vst [vmem:[%s2434_s14 + $0x98] sm:$0xff] (%p2155_p5), %v1413_v3 }
 0x1cf   : > { %1416 = vst [vmem:[%s2434_s14 + $0xc0] sm:$0xff] (%p2155_p5), %v1415_v4 }
 0x1d0   : > { %v1223_v10 = vpop.f32.mrf.mxu2  ;;  %v1127_v12 = vpop.f32.mrf.mxu0  ;;  %v1419_v6 = vld [vmem:[%s2195_s28 + $0x70] sm:$0xff] (%p2155_p5)  ;;  %1418 = vst [vmem:[%s2434_s14 + $0xc8] sm:$0xff] (%p2155_p5), %v1417_v5 }
 0x1d1   : > { %v1272_v11 = vpop.f32.mrf.mxu3  ;;  %1320 = vst [vmem:[%s2195_s28 + $0x90] sm:$0xff] %v1223_v10  ;;  %v1176_v13 = vpop.f32.mrf.mxu1  ;;  %v1421_v7 = vld [vmem:[%s2195_s28 + $0x78] sm:$0xff] (%p2155_p5) }
 0x1d2   : > { %1321 = vst [vmem:[%s2195_s28 + $0x98] sm:$0xff] %v1272_v11  ;;  %v1423_v8 = vld [vmem:[%s2195_s28 + $0x80] sm:$0xff] (%p2155_p5) }
 0x1d3   : > { %1322 = vst [vmem:[%s2195_s28 + $0xa0] sm:$0xff] %v1127_v12  ;;  %v1425_v9 = vld [vmem:[%s2195_s28 + $0x88] sm:$0xff] (%p2155_p5) }
 0x1d4   : > { %1323 = vst [vmem:[%s2195_s28 + $0xa8] sm:$0xff] %v1176_v13 }
 0x1d5   : > { %1420 = vst [vmem:[%s2434_s14 + $0xd0] sm:$0xff] (%p2155_p5), %v1419_v6 }
 0x1d6   : > { %1422 = vst [vmem:[%s2434_s14 + $0xd8] sm:$0xff] (%p2155_p5), %v1421_v7 }
 0x1d7   : > { %1424 = vst [vmem:[%s2434_s14 + $0x100] sm:$0xff] (%p2155_p5), %v1423_v8 }
 0x1d8   : > { %v1225_v14 = vpop.f32.mrf.mxu2  ;;  %v1130_v16 = vpop.f32.mrf.mxu0  ;;  %v1427_v10 = vld [vmem:[%s2195_s28 + $0x90] sm:$0xff] (%p2155_p5)  ;;  %1426 = vst [vmem:[%s2434_s14 + $0x108] sm:$0xff] (%p2155_p5), %v1425_v9 }
 0x1d9   : > { %v1274_v15 = vpop.f32.mrf.mxu3  ;;  %1324 = vst [vmem:[%s2195_s28 + $0xb0] sm:$0xff] %v1225_v14  ;;  %v1179_v17 = vpop.f32.mrf.mxu1  ;;  %v1429_v11 = vld [vmem:[%s2195_s28 + $0x98] sm:$0xff] (%p2155_p5) }
 0x1da   : > { %1325 = vst [vmem:[%s2195_s28 + $0xb8] sm:$0xff] %v1274_v15  ;;  %v1431_v12 = vld [vmem:[%s2195_s28 + $0xa0] sm:$0xff] (%p2155_p5) }
 0x1db   : > { %1326 = vst [vmem:[%s2195_s28 + $0xc0] sm:$0xff] %v1130_v16  ;;  %v1433_v13 = vld [vmem:[%s2195_s28 + $0xa8] sm:$0xff] (%p2155_p5) }
 0x1dc   : > { %1327 = vst [vmem:[%s2195_s28 + $0xc8] sm:$0xff] %v1179_v17 }
 0x1dd   : > { %1428 = vst [vmem:[%s2434_s14 + $0x110] sm:$0xff] (%p2155_p5), %v1427_v10 }
 0x1de   : > { %1430 = vst [vmem:[%s2434_s14 + $0x118] sm:$0xff] (%p2155_p5), %v1429_v11 }
 0x1df   : > { %1432 = vst [vmem:[%s2434_s14 + $0x140] sm:$0xff] (%p2155_p5), %v1431_v12 }
 0x1e0   : > { %v1228_v18 = vpop.f32.mrf.mxu2  ;;  %v1132_v20 = vpop.f32.mrf.mxu0  ;;  %v1435_v14 = vld [vmem:[%s2195_s28 + $0xb0] sm:$0xff] (%p2155_p5)  ;;  %1434 = vst [vmem:[%s2434_s14 + $0x148] sm:$0xff] (%p2155_p5), %v1433_v13 }
 0x1e1   : > { %v1277_v19 = vpop.f32.mrf.mxu3  ;;  %1328 = vst [vmem:[%s2195_s28 + $0xd0] sm:$0xff] %v1228_v18  ;;  %v1181_v21 = vpop.f32.mrf.mxu1  ;;  %v1437_v15 = vld [vmem:[%s2195_s28 + $0xb8] sm:$0xff] (%p2155_p5) }
 0x1e2   : > { %1329 = vst [vmem:[%s2195_s28 + $0xd8] sm:$0xff] %v1277_v19  ;;  %v1439_v16 = vld [vmem:[%s2195_s28 + $0xc0] sm:$0xff] (%p2155_p5) }
 0x1e3   : > { %1330 = vst [vmem:[%s2195_s28 + $0xe0] sm:$0xff] %v1132_v20  ;;  %v1441_v17 = vld [vmem:[%s2195_s28 + $0xc8] sm:$0xff] (%p2155_p5) }
 0x1e4   : > { %1331 = vst [vmem:[%s2195_s28 + $0xe8] sm:$0xff] %v1181_v21 }
 0x1e5   : > { %1436 = vst [vmem:[%s2434_s14 + $0x150] sm:$0xff] (%p2155_p5), %v1435_v14 }
 0x1e6   : > { %1438 = vst [vmem:[%s2434_s14 + $0x158] sm:$0xff] (%p2155_p5), %v1437_v15 }
 0x1e7   : > { %1440 = vst [vmem:[%s2434_s14 + $0x180] sm:$0xff] (%p2155_p5), %v1439_v16 }
 0x1e8   : > { %v1230_v22 = vpop.f32.mrf.mxu2  ;;  %v1135_v24 = vpop.f32.mrf.mxu0  ;;  %v1443_v18 = vld [vmem:[%s2195_s28 + $0xd0] sm:$0xff] (%p2155_p5)  ;;  %1442 = vst [vmem:[%s2434_s14 + $0x188] sm:$0xff] (%p2155_p5), %v1441_v17 }
 0x1e9   : > { %v1279_v23 = vpop.f32.mrf.mxu3  ;;  %1332 = vst [vmem:[%s2195_s28 + $0xf0] sm:$0xff] %v1230_v22  ;;  %v1184_v25 = vpop.f32.mrf.mxu1  ;;  %v1445_v19 = vld [vmem:[%s2195_s28 + $0xd8] sm:$0xff] (%p2155_p5) }
 0x1ea   : > { %1333 = vst [vmem:[%s2195_s28 + $0xf8] sm:$0xff] %v1279_v23  ;;  %v1447_v20 = vld [vmem:[%s2195_s28 + $0xe0] sm:$0xff] (%p2155_p5) }
 0x1eb   : > { %1334 = vst [vmem:[%s2195_s28 + $0x100] sm:$0xff] %v1135_v24  ;;  %v1449_v21 = vld [vmem:[%s2195_s28 + $0xe8] sm:$0xff] (%p2155_p5) }
 0x1ec   : > { %1335 = vst [vmem:[%s2195_s28 + $0x108] sm:$0xff] %v1184_v25 }
 0x1ed   : > { %1444 = vst [vmem:[%s2434_s14 + $0x190] sm:$0xff] (%p2155_p5), %v1443_v18 }
 0x1ee   : > { %1446 = vst [vmem:[%s2434_s14 + $0x198] sm:$0xff] (%p2155_p5), %v1445_v19 }
 0x1ef   : > { %1448 = vst [vmem:[%s2434_s14 + $0x1c0] sm:$0xff] (%p2155_p5), %v1447_v20 }
 0x1f0   : > { %v1233_v26 = vpop.f32.mrf.mxu2  ;;  %v1137_v28 = vpop.f32.mrf.mxu0  ;;  %v1451_v22 = vld [vmem:[%s2195_s28 + $0xf0] sm:$0xff] (%p2155_p5)  ;;  %1450 = vst [vmem:[%s2434_s14 + $0x1c8] sm:$0xff] (%p2155_p5), %v1449_v21 }
 0x1f1   : > { %v1282_v27 = vpop.f32.mrf.mxu3  ;;  %1336 = vst [vmem:[%s2195_s28 + $0x110] sm:$0xff] %v1233_v26  ;;  %v1186_v29 = vpop.f32.mrf.mxu1  ;;  %v1453_v23 = vld [vmem:[%s2195_s28 + $0xf8] sm:$0xff] (%p2155_p5) }
 0x1f2   : > { %1337 = vst [vmem:[%s2195_s28 + $0x118] sm:$0xff] %v1282_v27  ;;  %v1455_v24 = vld [vmem:[%s2195_s28 + $0x100] sm:$0xff] (%p2155_p5) }
 0x1f3   : > { %1338 = vst [vmem:[%s2195_s28 + $0x120] sm:$0xff] %v1137_v28  ;;  %v1457_v25 = vld [vmem:[%s2195_s28 + $0x108] sm:$0xff] (%p2155_p5) }
 0x1f4   : > { %1339 = vst [vmem:[%s2195_s28 + $0x128] sm:$0xff] %v1186_v29 }
 0x1f5   : > { %1452 = vst [vmem:[%s2434_s14 + $0x1d0] sm:$0xff] (%p2155_p5), %v1451_v22 }
 0x1f6   : > { %1454 = vst [vmem:[%s2434_s14 + $0x1d8] sm:$0xff] (%p2155_p5), %v1453_v23 }
 0x1f7   : > { %1456 = vst [vmem:[%s2434_s14 + $0x200] sm:$0xff] (%p2155_p5), %v1455_v24 }
 0x1f8   : > { %v1235_v30 = vpop.f32.mrf.mxu2  ;;  %v1140_v32 = vpop.f32.mrf.mxu0  ;;  %v1459_v26 = vld [vmem:[%s2195_s28 + $0x110] sm:$0xff] (%p2155_p5)  ;;  %1458 = vst [vmem:[%s2434_s14 + $0x208] sm:$0xff] (%p2155_p5), %v1457_v25 }
 0x1f9   : > { %v1284_v31 = vpop.f32.mrf.mxu3  ;;  %1340 = vst [vmem:[%s2195_s28 + $0x130] sm:$0xff] %v1235_v30  ;;  %v1189_v33 = vpop.f32.mrf.mxu1  ;;  %v1461_v27 = vld [vmem:[%s2195_s28 + $0x118] sm:$0xff] (%p2155_p5) }
 0x1fa   : > { %1341 = vst [vmem:[%s2195_s28 + $0x138] sm:$0xff] %v1284_v31  ;;  %v1463_v28 = vld [vmem:[%s2195_s28 + $0x120] sm:$0xff] (%p2155_p5) }
 0x1fb   : > { %1342 = vst [vmem:[%s2195_s28 + $0x140] sm:$0xff] %v1140_v32  ;;  %v1465_v29 = vld [vmem:[%s2195_s28 + $0x128] sm:$0xff] (%p2155_p5) }
 0x1fc   : > { %1343 = vst [vmem:[%s2195_s28 + $0x148] sm:$0xff] %v1189_v33 }
 0x1fd   : > { %1460 = vst [vmem:[%s2434_s14 + $0x210] sm:$0xff] (%p2155_p5), %v1459_v26 }
 0x1fe   : > { %1462 = vst [vmem:[%s2434_s14 + $0x218] sm:$0xff] (%p2155_p5), %v1461_v27 }
 0x1ff   : > { %1464 = vst [vmem:[%s2434_s14 + $0x240] sm:$0xff] (%p2155_p5), %v1463_v28 }
 0x200   : > { %v1238_v34 = vpop.f32.mrf.mxu2  ;;  %v1142_v36 = vpop.f32.mrf.mxu0  ;;  %v1467_v30 = vld [vmem:[%s2195_s28 + $0x130] sm:$0xff] (%p2155_p5)  ;;  %1466 = vst [vmem:[%s2434_s14 + $0x248] sm:$0xff] (%p2155_p5), %v1465_v29 }
 0x201   : > { %v1287_v35 = vpop.f32.mrf.mxu3  ;;  %1344 = vst [vmem:[%s2195_s28 + $0x150] sm:$0xff] %v1238_v34  ;;  %v1191_v37 = vpop.f32.mrf.mxu1  ;;  %v1469_v31 = vld [vmem:[%s2195_s28 + $0x138] sm:$0xff] (%p2155_p5) }
 0x202   : > { %1345 = vst [vmem:[%s2195_s28 + $0x158] sm:$0xff] %v1287_v35  ;;  %v1471_v32 = vld [vmem:[%s2195_s28 + $0x140] sm:$0xff] (%p2155_p5) }
 0x203   : > { %1346 = vst [vmem:[%s2195_s28 + $0x160] sm:$0xff] %v1142_v36  ;;  %v1473_v33 = vld [vmem:[%s2195_s28 + $0x148] sm:$0xff] (%p2155_p5) }
 0x204   : > { %1347 = vst [vmem:[%s2195_s28 + $0x168] sm:$0xff] %v1191_v37 }
 0x205   : > { %1468 = vst [vmem:[%s2434_s14 + $0x250] sm:$0xff] (%p2155_p5), %v1467_v30 }
 0x206   : > { %1470 = vst [vmem:[%s2434_s14 + $0x258] sm:$0xff] (%p2155_p5), %v1469_v31 }
 0x207   : > { %1472 = vst [vmem:[%s2434_s14 + $0x280] sm:$0xff] (%p2155_p5), %v1471_v32 }
 0x208   : > { %v1240_v38 = vpop.f32.mrf.mxu2  ;;  %v1145_v40 = vpop.f32.mrf.mxu0  ;;  %v1475_v34 = vld [vmem:[%s2195_s28 + $0x150] sm:$0xff] (%p2155_p5)  ;;  %1474 = vst [vmem:[%s2434_s14 + $0x288] sm:$0xff] (%p2155_p5), %v1473_v33 }
 0x209   : > { %v1289_v39 = vpop.f32.mrf.mxu3  ;;  %1348 = vst [vmem:[%s2195_s28 + $0x170] sm:$0xff] %v1240_v38  ;;  %v1194_v41 = vpop.f32.mrf.mxu1  ;;  %v1477_v35 = vld [vmem:[%s2195_s28 + $0x158] sm:$0xff] (%p2155_p5) }
 0x20a   : > { %1349 = vst [vmem:[%s2195_s28 + $0x178] sm:$0xff] %v1289_v39  ;;  %v1479_v36 = vld [vmem:[%s2195_s28 + $0x160] sm:$0xff] (%p2155_p5) }
 0x20b   : > { %1350 = vst [vmem:[%s2195_s28 + $0x180] sm:$0xff] %v1145_v40  ;;  %v1481_v37 = vld [vmem:[%s2195_s28 + $0x168] sm:$0xff] (%p2155_p5) }
 0x20c   : > { %1351 = vst [vmem:[%s2195_s28 + $0x188] sm:$0xff] %v1194_v41 }
 0x20d   : > { %1476 = vst [vmem:[%s2434_s14 + $0x290] sm:$0xff] (%p2155_p5), %v1475_v34 }
 0x20e   : > { %1478 = vst [vmem:[%s2434_s14 + $0x298] sm:$0xff] (%p2155_p5), %v1477_v35 }
 0x20f   : > { %1480 = vst [vmem:[%s2434_s14 + $0x2c0] sm:$0xff] (%p2155_p5), %v1479_v36 }
 0x210   : > { %v1243_v42 = vpop.f32.mrf.mxu2  ;;  %v1147_v44 = vpop.f32.mrf.mxu0  ;;  %v1483_v38 = vld [vmem:[%s2195_s28 + $0x170] sm:$0xff] (%p2155_p5)  ;;  %1482 = vst [vmem:[%s2434_s14 + $0x2c8] sm:$0xff] (%p2155_p5), %v1481_v37 }
 0x211   : > { %v1292_v43 = vpop.f32.mrf.mxu3  ;;  %1352 = vst [vmem:[%s2195_s28 + $0x190] sm:$0xff] %v1243_v42  ;;  %v1196_v45 = vpop.f32.mrf.mxu1  ;;  %v1485_v39 = vld [vmem:[%s2195_s28 + $0x178] sm:$0xff] (%p2155_p5) }
 0x212   : > { %1353 = vst [vmem:[%s2195_s28 + $0x198] sm:$0xff] %v1292_v43  ;;  %v1487_v40 = vld [vmem:[%s2195_s28 + $0x180] sm:$0xff] (%p2155_p5) }
 0x213   : > { %1354 = vst [vmem:[%s2195_s28 + $0x1a0] sm:$0xff] %v1147_v44  ;;  %v1489_v41 = vld [vmem:[%s2195_s28 + $0x188] sm:$0xff] (%p2155_p5) }
 0x214   : > { %1355 = vst [vmem:[%s2195_s28 + $0x1a8] sm:$0xff] %v1196_v45 }
 0x215   : > { %1484 = vst [vmem:[%s2434_s14 + $0x2d0] sm:$0xff] (%p2155_p5), %v1483_v38 }
 0x216   : > { %1486 = vst [vmem:[%s2434_s14 + $0x2d8] sm:$0xff] (%p2155_p5), %v1485_v39 }
 0x217   : > { %1488 = vst [vmem:[%s2434_s14 + $0x300] sm:$0xff] (%p2155_p5), %v1487_v40 }
 0x218   : > { %v1245_v46 = vpop.f32.mrf.mxu2  ;;  %v1150_v48 = vpop.f32.mrf.mxu0  ;;  %v1491_v42 = vld [vmem:[%s2195_s28 + $0x190] sm:$0xff] (%p2155_p5)  ;;  %1490 = vst [vmem:[%s2434_s14 + $0x308] sm:$0xff] (%p2155_p5), %v1489_v41 }
 0x219   : > { %v1294_v47 = vpop.f32.mrf.mxu3  ;;  %1356 = vst [vmem:[%s2195_s28 + $0x1b0] sm:$0xff] %v1245_v46  ;;  %v1199_v49 = vpop.f32.mrf.mxu1  ;;  %v1493_v43 = vld [vmem:[%s2195_s28 + $0x198] sm:$0xff] (%p2155_p5) }
 0x21a   : > { %1357 = vst [vmem:[%s2195_s28 + $0x1b8] sm:$0xff] %v1294_v47  ;;  %v1495_v44 = vld [vmem:[%s2195_s28 + $0x1a0] sm:$0xff] (%p2155_p5) }
 0x21b   : > { %1358 = vst [vmem:[%s2195_s28 + $0x1c0] sm:$0xff] %v1150_v48  ;;  %v1497_v45 = vld [vmem:[%s2195_s28 + $0x1a8] sm:$0xff] (%p2155_p5) }
 0x21c   : > { %1359 = vst [vmem:[%s2195_s28 + $0x1c8] sm:$0xff] %v1199_v49 }
 0x21d   : > { %1492 = vst [vmem:[%s2434_s14 + $0x310] sm:$0xff] (%p2155_p5), %v1491_v42 }
 0x21e   : > { %1494 = vst [vmem:[%s2434_s14 + $0x318] sm:$0xff] (%p2155_p5), %v1493_v43 }
 0x21f   : > { %1496 = vst [vmem:[%s2434_s14 + $0x340] sm:$0xff] (%p2155_p5), %v1495_v44 }
 0x220   : > { %v1248_v50 = vpop.f32.mrf.mxu2  ;;  %v1152_v52 = vpop.f32.mrf.mxu0  ;;  %v1499_v46 = vld [vmem:[%s2195_s28 + $0x1b0] sm:$0xff] (%p2155_p5)  ;;  %1498 = vst [vmem:[%s2434_s14 + $0x348] sm:$0xff] (%p2155_p5), %v1497_v45 }
 0x221   : > { %v1297_v51 = vpop.f32.mrf.mxu3  ;;  %1360 = vst [vmem:[%s2195_s28 + $0x1d0] sm:$0xff] %v1248_v50  ;;  %v1201_v53 = vpop.f32.mrf.mxu1  ;;  %v1501_v47 = vld [vmem:[%s2195_s28 + $0x1b8] sm:$0xff] (%p2155_p5) }
 0x222   : > { %1361 = vst [vmem:[%s2195_s28 + $0x1d8] sm:$0xff] %v1297_v51  ;;  %v1503_v48 = vld [vmem:[%s2195_s28 + $0x1c0] sm:$0xff] (%p2155_p5) }
 0x223   : > { %1362 = vst [vmem:[%s2195_s28 + $0x1e0] sm:$0xff] %v1152_v52  ;;  %v1505_v49 = vld [vmem:[%s2195_s28 + $0x1c8] sm:$0xff] (%p2155_p5) }
 0x224   : > { %1363 = vst [vmem:[%s2195_s28 + $0x1e8] sm:$0xff] %v1201_v53 }
 0x225   : > { %1500 = vst [vmem:[%s2434_s14 + $0x350] sm:$0xff] (%p2155_p5), %v1499_v46 }
 0x226   : > { %1372 = sbr.rel (!%p2155_p5) target bundleno = 563 (0x233), region = 40  ;;  %1502 = vst [vmem:[%s2434_s14 + $0x358] sm:$0xff] (%p2155_p5), %v1501_v47 }
 0x227   : > { %1504 = vst [vmem:[%s2434_s14 + $0x380] sm:$0xff] (%p2155_p5), %v1503_v48 }
 0x228   : > { %v1250_v54 = vpop.f32.mrf.mxu2  ;;  %v1507_v50 = vld [vmem:[%s2195_s28 + $0x1d0] sm:$0xff] (%p2155_p5)  ;;  %1506 = vst [vmem:[%s2434_s14 + $0x388] sm:$0xff] (%p2155_p5), %v1505_v49 }
 0x229   : > { %v1299_v55 = vpop.f32.mrf.mxu3  ;;  %1364 = vst [vmem:[%s2195_s28 + $0x1f0] sm:$0xff] %v1250_v54  ;;  %v1509_v51 = vld [vmem:[%s2195_s28 + $0x1d8] sm:$0xff] (%p2155_p5) }
 0x22a   : > { %1365 = vst [vmem:[%s2195_s28 + $0x1f8] sm:$0xff] %v1299_v55  ;;  %v1511_v52 = vld [vmem:[%s2195_s28 + $0x1e0] sm:$0xff] (%p2155_p5) }
 0x22b   : > { %1508 = vst [vmem:[%s2434_s14 + $0x390] sm:$0xff] %v1507_v50  ;;  %v1513_v53 = vld [vmem:[%s2195_s28 + $0x1e8] sm:$0xff] }
 0x22c   : > { %1510 = vst [vmem:[%s2434_s14 + $0x398] sm:$0xff] %v1509_v51 }
 0x22d   : > { %1512 = vst [vmem:[%s2434_s14 + $0x3c0] sm:$0xff] %v1511_v52 }
 0x22e   : > { %1514 = vst [vmem:[%s2434_s14 + $0x3c8] sm:$0xff] %v1513_v53 }
 0x230   : > { %v1515_v54 = vld [vmem:[%s2195_s28 + $0x1f0] sm:$0xff] }
 0x231   : > { %v1517_v55 = vld [vmem:[%s2195_s28 + $0x1f8] sm:$0xff]  ;;  %1516 = vst [vmem:[%s2434_s14 + $0x3d0] sm:$0xff] %v1515_v54 }
 0x232   : > { %1518 = vst [vmem:[%s2434_s14 + $0x3d8] sm:$0xff] %v1517_v55 }
 0x233 PF: > { %s22_s0 = sadd.s32 1, %s2079_s0   ;;  %s2594_s16 = smov %s2059_s17 }
 0x234   : > { %p19_p0 = scmp.ge.s32.totalorder %s22_s0, 10   ;;  %s2595_s17 = smov %s2178_s8 }
 0x235   : > { %s2596_s18 = smov %s2071_s20  ;;  %s2597_s19 = smov %s2075_s21 }
 0x236   : > { %s2598_s20 = smov %s2601_s23  ;;  %s2599_s21 = smov %s2605_s24 }
 0x237   :  { %21 = sbr.rel (!%p19_p0) target bundleno = 11 (0xb), region = 218 }
 0x23c   :  { %1534 = vsyncpa [#allocation6], 1 }
 0x23d   :  { %1536 = vsyncpa [#allocation6 + $0x1], 1 }

</bundles_post_ra>
